<compile_context>
chip_gen: v5e
topology: v5e:2x2
jax: 0.10.0
libtpu: 0.0.40
codegen_flags: <defaults>
</compile_context>

<pallas_src>
import functools
import math

import jax
import jax.numpy as jnp
from jax.experimental import pallas as pl
from jax.experimental.pallas import tpu as pltpu


# ----------------------------------------------------------------------------
# Fused full-model kernel factory.
#   refs layout (positional):
#     inputs : ids, emb,
#              [w_cat, whh_blockdiag, b_cat] x (num_layers-1)          (bi layers)
#              w_ih_last, w_hh_last, b_last                            (top bwd layer)
#              w1, b1, w2, b2, w3, b3                                  (MLP head)
#     outputs: logits (Bp, out_dim)
#     scratch: xw8 (T*Bp, 8H) [if any bi layer], xw4 (T*Bp, 4H),
#              y ping-pong scratches (T*Bp, 2H) x min(num_layers-1, 2)
# ----------------------------------------------------------------------------
def _make_fused_kernel(num_layers, hidden_dim, seq_len, batch_pad):
    L, H, T, Bp = num_layers, hidden_dim, seq_len, batch_pad
    n_bi = L - 1

    def kernel(*refs):
        it = iter(refs)
        ids_ref = next(it)                     # (T*Bp, 1) int32, time-major
        emb_ref = next(it)                     # (Vp, E) f32 (rows padded to mult. of 8)
        bi_refs = [(next(it), next(it), next(it)) for _ in range(n_bi)]
        wl_ih_ref, wl_hh_ref, bl_ref = next(it), next(it), next(it)
        w1_ref, b1_ref, w2_ref, b2_ref, w3_ref, b3_ref = (next(it) for _ in range(6))
        out_ref = next(it)
        xw8_sc = next(it) if n_bi else None    # merged fwd|bwd gate pre-activations
        xw4_sc = next(it)                      # top-layer bwd gate pre-activations
        y_scs = [next(it) for _ in range(min(n_bi, 2))]

        # ---- Embedding gather in-kernel: one-hot @ table (MXU, no XLA gather) -------
        Vp = emb_ref.shape[0]
        ids = ids_ref[...]                                              # (T*Bp, 1) int32
        col = jax.lax.broadcasted_iota(jnp.int32, (T * Bp, Vp), 1)
        onehot = (col == ids).astype(jnp.float32)                       # (T*Bp, Vp)
        x = jnp.dot(onehot, emb_ref[...],
                    preferred_element_type=jnp.float32)                 # (T*Bp, E)

        # ---- Bidirectional layers 0 .. L-2 -------------------------------------------
        def bi_layer(x_val, w_cat_ref, whh_ref, b_ref, y_dst):
            # Hoisted input projection for BOTH directions in one MXU matmul.
            xw8_sc[...] = (jnp.dot(x_val, w_cat_ref[...],
                                   preferred_element_type=jnp.float32) + b_ref[...])
            whh = whh_ref[...]                                          # (2H, 8H) blockdiag
            hcat = jnp.zeros((Bp, 2 * H), jnp.float32)                  # [h_fwd | h_bwd]
            cf = jnp.zeros((Bp, H), jnp.float32)
            cb = jnp.zeros((Bp, H), jnp.float32)
            # Fully unrolled (small static T); fwd step t and bwd step T-1-t overlap.
            for t in range(T):
                tb = T - 1 - t
                # ONE fused recurrent matmul per step for both directions.
                rec = jnp.dot(hcat, whh, preferred_element_type=jnp.float32)  # (Bp, 8H)
                gf = xw8_sc[t * Bp:(t + 1) * Bp, 0:4 * H] + rec[:, 0:4 * H]
                gb = xw8_sc[tb * Bp:(tb + 1) * Bp, 4 * H:8 * H] + rec[:, 4 * H:8 * H]
                # Full-(8,128)-vreg activations (Bp=8 sublanes, 4H=128 lanes).
                sf = jax.nn.sigmoid(gf)
                sb = jax.nn.sigmoid(gb)
                cf = sf[:, H:2 * H] * cf + sf[:, 0:H] * jnp.tanh(gf[:, 2 * H:3 * H])
                cb = sb[:, H:2 * H] * cb + sb[:, 0:H] * jnp.tanh(gb[:, 2 * H:3 * H])
                hf = sf[:, 3 * H:4 * H] * jnp.tanh(cf)
                hb = sb[:, 3 * H:4 * H] * jnp.tanh(cb)
                hcat = jnp.concatenate([hf, hb], axis=1)
                # Per-timestep outputs (natural time order, [fwd|bwd]) feed the next layer.
                y_dst[t * Bp:(t + 1) * Bp, 0:H] = hf
                y_dst[tb * Bp:(tb + 1) * Bp, H:2 * H] = hb

        cur = x
        for l in range(n_bi):
            w_cat_ref, whh_ref, b_ref = bi_refs[l]
            y_dst = y_scs[l % len(y_scs)]
            bi_layer(cur, w_cat_ref, whh_ref, b_ref, y_dst)
            cur = y_dst[...]                                            # (T*Bp, 2H)

        # ---- Top layer: backward direction only (this is hn[-1]) ----------------------
        xw4_sc[...] = (jnp.dot(cur, wl_ih_ref[...],
                               preferred_element_type=jnp.float32) + bl_ref[...])
        whh_l = wl_hh_ref[...]                                          # (H, 4H)
        h = jnp.zeros((Bp, H), jnp.float32)
        c = jnp.zeros((Bp, H), jnp.float32)
        for k in range(T):                                              # time T-1 .. 0
            s = T - 1 - k
            g4 = (xw4_sc[s * Bp:(s + 1) * Bp, :] +
                  jnp.dot(h, whh_l, preferred_element_type=jnp.float32))
            sg = jax.nn.sigmoid(g4)                                     # full (8,128) vreg
            c = sg[:, H:2 * H] * c + sg[:, 0:H] * jnp.tanh(g4[:, 2 * H:3 * H])
            h = sg[:, 3 * H:4 * H] * jnp.tanh(c)

        # ---- Fused MLP head: Linear->ReLU->Linear->Dropout(id)->ReLU->Linear ----------
        z = jnp.maximum(jnp.dot(h, w1_ref[...],
                                preferred_element_type=jnp.float32) + b1_ref[...], 0.0)
        # TODO(synk): Dropout(0.6) implemented as identity (inference mode).
        z = jnp.maximum(jnp.dot(z, w2_ref[...],
                                preferred_element_type=jnp.float32) + b2_ref[...], 0.0)
        out_ref[...] = (jnp.dot(z, w3_ref[...],
                                preferred_element_type=jnp.float32)
                        + b3_ref[...]).astype(out_ref.dtype)

    return kernel


# ----------------------------------------------------------------------------
# Wrapper: pads batch to a sublane group, flattens ids time-major, single pallas_call.
# ----------------------------------------------------------------------------
def sentiment_forward(token_ids, packed, *, hidden_dim, num_layers):
    H, L = hidden_dim, num_layers
    B, T = token_ids.shape
    Bp = max(8, ((B + 7) // 8) * 8)          # pad batch to whole sublane groups
    n_bi = L - 1
    out_dim = packed['fc']['w3'].shape[1]

    ids = jnp.pad(token_ids.astype(jnp.int32), ((0, Bp - B), (0, 0)))
    ids_tm = ids.T.reshape(T * Bp, 1)        # time-major, flattened (tiny int op)

    in_arrays = [ids_tm, packed['emb']]
    for l in range(n_bi):
        p = packed['bi'][l]
        in_arrays += [p['w_cat'], p['whh_bd'], p['b_cat']]
    p = packed['last']
    in_arrays += [p['w_ih'], p['w_hh'], p['b']]
    fc = packed['fc']
    in_arrays += [fc['w1'], fc['b1'], fc['w2'], fc['b2'], fc['w3'], fc['b3']]

    scratch = []
    if n_bi:
        scratch.append(pltpu.VMEM((T * Bp, 8 * H), jnp.float32))     # merged xW_ih + b
    scratch.append(pltpu.VMEM((T * Bp, 4 * H), jnp.float32))         # top-layer xW_ih + b
    scratch += [pltpu.VMEM((T * Bp, 2 * H), jnp.float32)
                for _ in range(min(n_bi, 2))]                        # layer-output ping-pong

    kernel = _make_fused_kernel(L, H, T, Bp)
    logits = pl.pallas_call(
        kernel,
        out_shape=jax.ShapeDtypeStruct((Bp, out_dim), jnp.float32),
        in_specs=[pl.BlockSpec(memory_space=pltpu.MemorySpace.VMEM)] * len(in_arrays),
        out_specs=pl.BlockSpec(memory_space=pltpu.MemorySpace.VMEM),
        scratch_shapes=scratch,
    )(*in_arrays)
    return logits[:B]


# ----------------------------------------------------------------------------
# Parameter init (PyTorch-equivalent shapes) and kernel-layout packing (done once).
# ----------------------------------------------------------------------------
def init_params(key, vocab_size, output_size, embedding_dim, hidden_dim, num_layers):
    kit = iter(jax.random.split(key, 64))

    def uni(shape, bound):
        return jax.random.uniform(next(kit), shape, jnp.float32, -bound, bound)

    params = {'embedding': jax.random.normal(
        next(kit), (vocab_size, embedding_dim), jnp.float32)}

    k = 1.0 / math.sqrt(hidden_dim)
    lstm = []
    for layer in range(num_layers):
        d_in = embedding_dim if layer == 0 else 2 * hidden_dim
        layer_p = {}
        for direction in ('fwd', 'bwd'):
            layer_p[direction] = {
                'w_ih': uni((4 * hidden_dim, d_in), k),        # PyTorch weight_ih
                'w_hh': uni((4 * hidden_dim, hidden_dim), k),  # PyTorch weight_hh
                'b_ih': uni((4 * hidden_dim,), k),
                'b_hh': uni((4 * hidden_dim,), k),
            }
        lstm.append(layer_p)
    params['lstm'] = lstm

    def linear(out_f, in_f):
        bound = 1.0 / math.sqrt(in_f)
        return uni((out_f, in_f), bound), uni((out_f,), bound)

    w1, b1 = linear(32, hidden_dim)
    w2, b2 = linear(4, 32)
    w3, b3 = linear(output_size, 4)
    params['fc'] = {'w1': w1, 'b1': b1, 'w2': w2, 'b2': b2, 'w3': w3, 'b3': b3}
    return params


def pack_params(params, hidden_dim, num_layers):
    """One-time repack into kernel layouts: transposed weights, merged fwd|bwd input
    projection, block-diagonal recurrent weights, summed biases, padded embedding."""
    H = hidden_dim
    emb = params['embedding']
    V, _ = emb.shape
    Vp = ((V + 7) // 8) * 8
    packed = {'emb': jnp.pad(emb, ((0, Vp - V), (0, 0)))}

    bi = []
    for l in range(num_layers - 1):
        pf, pb = params['lstm'][l]['fwd'], params['lstm'][l]['bwd']
        w_cat = jnp.concatenate([pf['w_ih'].T, pb['w_ih'].T], axis=1)      # (d_in, 8H)
        b_cat = jnp.concatenate([pf['b_ih'] + pf['b_hh'],
                                 pb['b_ih'] + pb['b_hh']]).reshape(1, 8 * H)
        z = jnp.zeros((H, 4 * H), jnp.float32)
        whh_bd = jnp.concatenate(
            [jnp.concatenate([pf['w_hh'].T, z], axis=1),
             jnp.concatenate([z, pb['w_hh'].T], axis=1)], axis=0)          # (2H, 8H)
        bi.append({'w_cat': w_cat, 'whh_bd': whh_bd, 'b_cat': b_cat})
    packed['bi'] = bi

    pb = params['lstm'][num_layers - 1]['bwd']
    packed['last'] = {'w_ih': pb['w_ih'].T,                                 # (d_in, 4H)
                      'w_hh': pb['w_hh'].T,                                 # (H, 4H)
                      'b': (pb['b_ih'] + pb['b_hh']).reshape(1, 4 * H)}

    fc = params['fc']
    packed['fc'] = {'w1': fc['w1'].T, 'b1': fc['b1'].reshape(1, -1),
                    'w2': fc['w2'].T, 'b2': fc['b2'].reshape(1, -1),
                    'w3': fc['w3'].T, 'b3': fc['b3'].reshape(1, -1)}
    return packed


if __name__ == "__main__":
    vocab_size = 50
    output_size = 3
    embedding_dim = 32
    hidden_dim = 32
    num_layers = 2
    batch = 2
    seq_len = 8

    key = jax.random.PRNGKey(0)
    pkey, xkey = jax.random.split(key)
    params = init_params(pkey, vocab_size, output_size,
                         embedding_dim, hidden_dim, num_layers)
    packed = pack_params(params, hidden_dim, num_layers)
    token_ids = jax.random.randint(xkey, (batch, seq_len), 0, vocab_size,
                                   dtype=jnp.int32)

    fwd = jax.jit(functools.partial(sentiment_forward,
                                    hidden_dim=hidden_dim,
                                    num_layers=num_layers))
    logits = fwd(token_ids, packed)
    jax.block_until_ready(logits)
    assert logits.shape == (batch, output_size), logits.shape
    print("KERNEL_OK")
</pallas_src>

<mosaic_0001>
module attributes {stable_mosaic.version = 11 : i64} {
  func.func @kernel(%arg0: memref<64x1xi32, #tpu.memory_space<vmem>>, %arg1: memref<56x32xf32, #tpu.memory_space<vmem>>, %arg2: memref<32x256xf32, #tpu.memory_space<vmem>>, %arg3: memref<64x256xf32, #tpu.memory_space<vmem>>, %arg4: memref<1x256xf32, #tpu.memory_space<vmem>>, %arg5: memref<64x128xf32, #tpu.memory_space<vmem>>, %arg6: memref<32x128xf32, #tpu.memory_space<vmem>>, %arg7: memref<1x128xf32, #tpu.memory_space<vmem>>, %arg8: memref<32x32xf32, #tpu.memory_space<vmem>>, %arg9: memref<1x32xf32, #tpu.memory_space<vmem>>, %arg10: memref<32x4xf32, #tpu.memory_space<vmem>>, %arg11: memref<1x4xf32, #tpu.memory_space<vmem>>, %arg12: memref<4x3xf32, #tpu.memory_space<vmem>>, %arg13: memref<1x3xf32, #tpu.memory_space<vmem>>, %arg14: memref<8x3xf32, #tpu.memory_space<vmem>>, %arg15: memref<64x256xf32, #tpu.memory_space<vmem>>, %arg16: memref<64x128xf32, #tpu.memory_space<vmem>>, %arg17: memref<64x64xf32, #tpu.memory_space<vmem>>) attributes {dimension_semantics = [], scalar_prefetch = 0 : i64, scratch_operands = 3 : i64, tpu.core_type = #tpu.core_type<tc>} {
    %c0 = arith.constant 0 : index
    %c0_0 = arith.constant 0 : index
    %0 = vector.load %arg0[%c0, %c0_0] : memref<64x1xi32, #tpu.memory_space<vmem>>, vector<64x1xi32>
    %1 = tpu.iota {dimensions = array<i32: 1>} : vector<64x56xi32>
    %2 = vector.broadcast %0 : vector<64x1xi32> to vector<64x56xi32>
    %3 = arith.cmpi eq, %1, %2 : vector<64x56xi32>
    %4 = arith.extui %3 : vector<64x56xi1> to vector<64x56xi32>
    %5 = arith.sitofp %4 : vector<64x56xi32> to vector<64x56xf32>
    %c0_1 = arith.constant 0 : index
    %c0_2 = arith.constant 0 : index
    %6 = vector.load %arg1[%c0_1, %c0_2] : memref<56x32xf32, #tpu.memory_space<vmem>>, vector<56x32xf32>
    %cst = arith.constant dense<0.000000e+00> : vector<64x32xf32>
    %7 = tpu.matmul %5, %6, %cst {dimension_numbers = #tpu.dot_dimension_numbers<[1], [0], [0], [1], [0, 0, 1, 1], [], []>} : vector<64x56xf32>, vector<56x32xf32>, vector<64x32xf32> -> vector<64x32xf32>
    %c0_3 = arith.constant 0 : index
    %c0_4 = arith.constant 0 : index
    %8 = vector.load %arg2[%c0_3, %c0_4] : memref<32x256xf32, #tpu.memory_space<vmem>>, vector<32x256xf32>
    %cst_5 = arith.constant dense<0.000000e+00> : vector<64x256xf32>
    %9 = tpu.matmul %7, %8, %cst_5 {dimension_numbers = #tpu.dot_dimension_numbers<[1], [0], [0], [1], [0, 0, 1, 1], [], []>} : vector<64x32xf32>, vector<32x256xf32>, vector<64x256xf32> -> vector<64x256xf32>
    %c0_6 = arith.constant 0 : index
    %c0_7 = arith.constant 0 : index
    %10 = vector.load %arg4[%c0_6, %c0_7] : memref<1x256xf32, #tpu.memory_space<vmem>>, vector<1x256xf32>
    %11 = vector.broadcast %10 : vector<1x256xf32> to vector<64x256xf32>
    %12 = arith.addf %9, %11 : vector<64x256xf32>
    %c0_8 = arith.constant 0 : index
    %c0_9 = arith.constant 0 : index
    %13 = vector.load %arg15[%c0_8, %c0_9] : memref<64x256xf32, #tpu.memory_space<vmem>>, vector<64x256xf32>
    tpu.vector_store %arg15[%c0_8, %c0_9], %12 {strides = array<i32>} : memref<64x256xf32, #tpu.memory_space<vmem>>, vector<64x256xf32>,
    %c0_10 = arith.constant 0 : index
    %c0_11 = arith.constant 0 : index
    %14 = vector.load %arg3[%c0_10, %c0_11] : memref<64x256xf32, #tpu.memory_space<vmem>>, vector<64x256xf32>
    %cst_12 = arith.constant 0.000000e+00 : f32
    %15 = vector.broadcast %cst_12 : f32 to vector<8x64xf32>
    %cst_13 = arith.constant 0.000000e+00 : f32
    %16 = vector.broadcast %cst_13 : f32 to vector<8x32xf32>
    %cst_14 = arith.constant 0.000000e+00 : f32
    %17 = vector.broadcast %cst_14 : f32 to vector<8x32xf32>
    %cst_15 = arith.constant dense<0.000000e+00> : vector<8x256xf32>
    %18 = tpu.matmul %15, %14, %cst_15 {dimension_numbers = #tpu.dot_dimension_numbers<[1], [0], [0], [1], [0, 0, 1, 1], [], []>} : vector<8x64xf32>, vector<64x256xf32>, vector<8x256xf32> -> vector<8x256xf32>
    %c0_16 = arith.constant 0 : index
    %c0_17 = arith.constant 0 : index
    %19 = vector.load %arg15[%c0_16, %c0_17] : memref<64x256xf32, #tpu.memory_space<vmem>>, vector<8x128xf32>
    %20 = vector.extract_strided_slice %18 {offsets = [0, 0], sizes = [8, 128], strides = [1, 1]} : vector<8x256xf32> to vector<8x128xf32>
    %21 = arith.addf %19, %20 : vector<8x128xf32>
    %c56 = arith.constant 56 : index
    %c128 = arith.constant 128 : index
    %22 = vector.load %arg15[%c56, %c128] : memref<64x256xf32, #tpu.memory_space<vmem>>, vector<8x128xf32>
    %23 = vector.extract_strided_slice %18 {offsets = [0, 128], sizes = [8, 128], strides = [1, 1]} : vector<8x256xf32> to vector<8x128xf32>
    %24 = arith.addf %22, %23 : vector<8x128xf32>
    %25 = arith.negf %21 : vector<8x128xf32>
    %26 = math.exp %25 : vector<8x128xf32>
    %cst_18 = arith.constant 1.000000e+00 : f32
    %27 = vector.broadcast %cst_18 : f32 to vector<8x128xf32>
    %28 = arith.addf %27, %26 : vector<8x128xf32>
    %29 = arith.divf %27, %28 : vector<8x128xf32>
    %30 = arith.negf %24 : vector<8x128xf32>
    %31 = math.exp %30 : vector<8x128xf32>
    %cst_19 = arith.constant 1.000000e+00 : f32
    %32 = vector.broadcast %cst_19 : f32 to vector<8x128xf32>
    %33 = arith.addf %32, %31 : vector<8x128xf32>
    %34 = arith.divf %32, %33 : vector<8x128xf32>
    %35 = vector.extract_strided_slice %29 {offsets = [0, 32], sizes = [8, 32], strides = [1, 1]} : vector<8x128xf32> to vector<8x32xf32>
    %36 = arith.mulf %35, %16 : vector<8x32xf32>
    %37 = vector.extract_strided_slice %29 {offsets = [0, 0], sizes = [8, 32], strides = [1, 1]} : vector<8x128xf32> to vector<8x32xf32>
    %38 = vector.extract_strided_slice %21 {offsets = [0, 64], sizes = [8, 32], strides = [1, 1]} : vector<8x128xf32> to vector<8x32xf32>
    %39 = math.tanh %38 : vector<8x32xf32>
    %40 = arith.mulf %37, %39 : vector<8x32xf32>
    %41 = arith.addf %36, %40 : vector<8x32xf32>
    %42 = vector.extract_strided_slice %34 {offsets = [0, 32], sizes = [8, 32], strides = [1, 1]} : vector<8x128xf32> to vector<8x32xf32>
    %43 = arith.mulf %42, %17 : vector<8x32xf32>
    %44 = vector.extract_strided_slice %34 {offsets = [0, 0], sizes = [8, 32], strides = [1, 1]} : vector<8x128xf32> to vector<8x32xf32>
    %45 = vector.extract_strided_slice %24 {offsets = [0, 64], sizes = [8, 32], strides = [1, 1]} : vector<8x128xf32> to vector<8x32xf32>
    %46 = math.tanh %45 : vector<8x32xf32>
    %47 = arith.mulf %44, %46 : vector<8x32xf32>
    %48 = arith.addf %43, %47 : vector<8x32xf32>
    %49 = vector.extract_strided_slice %29 {offsets = [0, 96], sizes = [8, 32], strides = [1, 1]} : vector<8x128xf32> to vector<8x32xf32>
    %50 = math.tanh %41 : vector<8x32xf32>
    %51 = arith.mulf %49, %50 : vector<8x32xf32>
    %52 = vector.extract_strided_slice %34 {offsets = [0, 96], sizes = [8, 32], strides = [1, 1]} : vector<8x128xf32> to vector<8x32xf32>
    %53 = math.tanh %48 : vector<8x32xf32>
    %54 = arith.mulf %52, %53 : vector<8x32xf32>
    %55 = tpu.concatenate %51, %54 in 1 : vector<8x32xf32>, vector<8x32xf32> -> vector<8x64xf32>
    %c0_20 = arith.constant 0 : index
    %c0_21 = arith.constant 0 : index
    %56 = vector.load %arg17[%c0_20, %c0_21] : memref<64x64xf32, #tpu.memory_space<vmem>>, vector<8x32xf32>
    tpu.vector_store %arg17[%c0_20, %c0_21], %51 {strides = array<i32>} : memref<64x64xf32, #tpu.memory_space<vmem>>, vector<8x32xf32>,
    %c56_22 = arith.constant 56 : index
    %c32 = arith.constant 32 : index
    %57 = vector.load %arg17[%c56_22, %c32] : memref<64x64xf32, #tpu.memory_space<vmem>>, vector<8x32xf32>
    tpu.vector_store %arg17[%c56_22, %c32], %54 {strides = array<i32>} : memref<64x64xf32, #tpu.memory_space<vmem>>, vector<8x32xf32>,
    %cst_23 = arith.constant dense<0.000000e+00> : vector<8x256xf32>
    %58 = tpu.matmul %55, %14, %cst_23 {dimension_numbers = #tpu.dot_dimension_numbers<[1], [0], [0], [1], [0, 0, 1, 1], [], []>} : vector<8x64xf32>, vector<64x256xf32>, vector<8x256xf32> -> vector<8x256xf32>
    %c8 = arith.constant 8 : index
    %c0_24 = arith.constant 0 : index
    %59 = vector.load %arg15[%c8, %c0_24] : memref<64x256xf32, #tpu.memory_space<vmem>>, vector<8x128xf32>
    %60 = vector.extract_strided_slice %58 {offsets = [0, 0], sizes = [8, 128], strides = [1, 1]} : vector<8x256xf32> to vector<8x128xf32>
    %61 = arith.addf %59, %60 : vector<8x128xf32>
    %c48 = arith.constant 48 : index
    %c128_25 = arith.constant 128 : index
    %62 = vector.load %arg15[%c48, %c128_25] : memref<64x256xf32, #tpu.memory_space<vmem>>, vector<8x128xf32>
    %63 = vector.extract_strided_slice %58 {offsets = [0, 128], sizes = [8, 128], strides = [1, 1]} : vector<8x256xf32> to vector<8x128xf32>
    %64 = arith.addf %62, %63 : vector<8x128xf32>
    %65 = arith.negf %61 : vector<8x128xf32>
    %66 = math.exp %65 : vector<8x128xf32>
    %cst_26 = arith.constant 1.000000e+00 : f32
    %67 = vector.broadcast %cst_26 : f32 to vector<8x128xf32>
    %68 = arith.addf %67, %66 : vector<8x128xf32>
    %69 = arith.divf %67, %68 : vector<8x128xf32>
    %70 = arith.negf %64 : vector<8x128xf32>
    %71 = math.exp %70 : vector<8x128xf32>
    %cst_27 = arith.constant 1.000000e+00 : f32
    %72 = vector.broadcast %cst_27 : f32 to vector<8x128xf32>
    %73 = arith.addf %72, %71 : vector<8x128xf32>
    %74 = arith.divf %72, %73 : vector<8x128xf32>
    %75 = vector.extract_strided_slice %69 {offsets = [0, 32], sizes = [8, 32], strides = [1, 1]} : vector<8x128xf32> to vector<8x32xf32>
    %76 = arith.mulf %75, %41 : vector<8x32xf32>
    %77 = vector.extract_strided_slice %69 {offsets = [0, 0], sizes = [8, 32], strides = [1, 1]} : vector<8x128xf32> to vector<8x32xf32>
    %78 = vector.extract_strided_slice %61 {offsets = [0, 64], sizes = [8, 32], strides = [1, 1]} : vector<8x128xf32> to vector<8x32xf32>
    %79 = math.tanh %78 : vector<8x32xf32>
    %80 = arith.mulf %77, %79 : vector<8x32xf32>
    %81 = arith.addf %76, %80 : vector<8x32xf32>
    %82 = vector.extract_strided_slice %74 {offsets = [0, 32], sizes = [8, 32], strides = [1, 1]} : vector<8x128xf32> to vector<8x32xf32>
    %83 = arith.mulf %82, %48 : vector<8x32xf32>
    %84 = vector.extract_strided_slice %74 {offsets = [0, 0], sizes = [8, 32], strides = [1, 1]} : vector<8x128xf32> to vector<8x32xf32>
    %85 = vector.extract_strided_slice %64 {offsets = [0, 64], sizes = [8, 32], strides = [1, 1]} : vector<8x128xf32> to vector<8x32xf32>
    %86 = math.tanh %85 : vector<8x32xf32>
    %87 = arith.mulf %84, %86 : vector<8x32xf32>
    %88 = arith.addf %83, %87 : vector<8x32xf32>
    %89 = vector.extract_strided_slice %69 {offsets = [0, 96], sizes = [8, 32], strides = [1, 1]} : vector<8x128xf32> to vector<8x32xf32>
    %90 = math.tanh %81 : vector<8x32xf32>
    %91 = arith.mulf %89, %90 : vector<8x32xf32>
    %92 = vector.extract_strided_slice %74 {offsets = [0, 96], sizes = [8, 32], strides = [1, 1]} : vector<8x128xf32> to vector<8x32xf32>
    %93 = math.tanh %88 : vector<8x32xf32>
    %94 = arith.mulf %92, %93 : vector<8x32xf32>
    %95 = tpu.concatenate %91, %94 in 1 : vector<8x32xf32>, vector<8x32xf32> -> vector<8x64xf32>
    %c8_28 = arith.constant 8 : index
    %c0_29 = arith.constant 0 : index
    %96 = vector.load %arg17[%c8_28, %c0_29] : memref<64x64xf32, #tpu.memory_space<vmem>>, vector<8x32xf32>
    tpu.vector_store %arg17[%c8_28, %c0_29], %91 {strides = array<i32>} : memref<64x64xf32, #tpu.memory_space<vmem>>, vector<8x32xf32>,
    %c48_30 = arith.constant 48 : index
    %c32_31 = arith.constant 32 : index
    %97 = vector.load %arg17[%c48_30, %c32_31] : memref<64x64xf32, #tpu.memory_space<vmem>>, vector<8x32xf32>
    tpu.vector_store %arg17[%c48_30, %c32_31], %94 {strides = array<i32>} : memref<64x64xf32, #tpu.memory_space<vmem>>, vector<8x32xf32>,
    %cst_32 = arith.constant dense<0.000000e+00> : vector<8x256xf32>
    %98 = tpu.matmul %95, %14, %cst_32 {dimension_numbers = #tpu.dot_dimension_numbers<[1], [0], [0], [1], [0, 0, 1, 1], [], []>} : vector<8x64xf32>, vector<64x256xf32>, vector<8x256xf32> -> vector<8x256xf32>
    %c16 = arith.constant 16 : index
    %c0_33 = arith.constant 0 : index
    %99 = vector.load %arg15[%c16, %c0_33] : memref<64x256xf32, #tpu.memory_space<vmem>>, vector<8x128xf32>
    %100 = vector.extract_strided_slice %98 {offsets = [0, 0], sizes = [8, 128], strides = [1, 1]} : vector<8x256xf32> to vector<8x128xf32>
    %101 = arith.addf %99, %100 : vector<8x128xf32>
    %c40 = arith.constant 40 : index
    %c128_34 = arith.constant 128 : index
    %102 = vector.load %arg15[%c40, %c128_34] : memref<64x256xf32, #tpu.memory_space<vmem>>, vector<8x128xf32>
    %103 = vector.extract_strided_slice %98 {offsets = [0, 128], sizes = [8, 128], strides = [1, 1]} : vector<8x256xf32> to vector<8x128xf32>
    %104 = arith.addf %102, %103 : vector<8x128xf32>
    %105 = arith.negf %101 : vector<8x128xf32>
    %106 = math.exp %105 : vector<8x128xf32>
    %cst_35 = arith.constant 1.000000e+00 : f32
    %107 = vector.broadcast %cst_35 : f32 to vector<8x128xf32>
    %108 = arith.addf %107, %106 : vector<8x128xf32>
    %109 = arith.divf %107, %108 : vector<8x128xf32>
    %110 = arith.negf %104 : vector<8x128xf32>
    %111 = math.exp %110 : vector<8x128xf32>
    %cst_36 = arith.constant 1.000000e+00 : f32
    %112 = vector.broadcast %cst_36 : f32 to vector<8x128xf32>
    %113 = arith.addf %112, %111 : vector<8x128xf32>
    %114 = arith.divf %112, %113 : vector<8x128xf32>
    %115 = vector.extract_strided_slice %109 {offsets = [0, 32], sizes = [8, 32], strides = [1, 1]} : vector<8x128xf32> to vector<8x32xf32>
    %116 = arith.mulf %115, %81 : vector<8x32xf32>
    %117 = vector.extract_strided_slice %109 {offsets = [0, 0], sizes = [8, 32], strides = [1, 1]} : vector<8x128xf32> to vector<8x32xf32>
    %118 = vector.extract_strided_slice %101 {offsets = [0, 64], sizes = [8, 32], strides = [1, 1]} : vector<8x128xf32> to vector<8x32xf32>
    %119 = math.tanh %118 : vector<8x32xf32>
    %120 = arith.mulf %117, %119 : vector<8x32xf32>
    %121 = arith.addf %116, %120 : vector<8x32xf32>
    %122 = vector.extract_strided_slice %114 {offsets = [0, 32], sizes = [8, 32], strides = [1, 1]} : vector<8x128xf32> to vector<8x32xf32>
    %123 = arith.mulf %122, %88 : vector<8x32xf32>
    %124 = vector.extract_strided_slice %114 {offsets = [0, 0], sizes = [8, 32], strides = [1, 1]} : vector<8x128xf32> to vector<8x32xf32>
    %125 = vector.extract_strided_slice %104 {offsets = [0, 64], sizes = [8, 32], strides = [1, 1]} : vector<8x128xf32> to vector<8x32xf32>
    %126 = math.tanh %125 : vector<8x32xf32>
    %127 = arith.mulf %124, %126 : vector<8x32xf32>
    %128 = arith.addf %123, %127 : vector<8x32xf32>
    %129 = vector.extract_strided_slice %109 {offsets = [0, 96], sizes = [8, 32], strides = [1, 1]} : vector<8x128xf32> to vector<8x32xf32>
    %130 = math.tanh %121 : vector<8x32xf32>
    %131 = arith.mulf %129, %130 : vector<8x32xf32>
    %132 = vector.extract_strided_slice %114 {offsets = [0, 96], sizes = [8, 32], strides = [1, 1]} : vector<8x128xf32> to vector<8x32xf32>
    %133 = math.tanh %128 : vector<8x32xf32>
    %134 = arith.mulf %132, %133 : vector<8x32xf32>
    %135 = tpu.concatenate %131, %134 in 1 : vector<8x32xf32>, vector<8x32xf32> -> vector<8x64xf32>
    %c16_37 = arith.constant 16 : index
    %c0_38 = arith.constant 0 : index
    %136 = vector.load %arg17[%c16_37, %c0_38] : memref<64x64xf32, #tpu.memory_space<vmem>>, vector<8x32xf32>
    tpu.vector_store %arg17[%c16_37, %c0_38], %131 {strides = array<i32>} : memref<64x64xf32, #tpu.memory_space<vmem>>, vector<8x32xf32>,
    %c40_39 = arith.constant 40 : index
    %c32_40 = arith.constant 32 : index
    %137 = vector.load %arg17[%c40_39, %c32_40] : memref<64x64xf32, #tpu.memory_space<vmem>>, vector<8x32xf32>
    tpu.vector_store %arg17[%c40_39, %c32_40], %134 {strides = array<i32>} : memref<64x64xf32, #tpu.memory_space<vmem>>, vector<8x32xf32>,
    %cst_41 = arith.constant dense<0.000000e+00> : vector<8x256xf32>
    %138 = tpu.matmul %135, %14, %cst_41 {dimension_numbers = #tpu.dot_dimension_numbers<[1], [0], [0], [1], [0, 0, 1, 1], [], []>} : vector<8x64xf32>, vector<64x256xf32>, vector<8x256xf32> -> vector<8x256xf32>
    %c24 = arith.constant 24 : index
    %c0_42 = arith.constant 0 : index
    %139 = vector.load %arg15[%c24, %c0_42] : memref<64x256xf32, #tpu.memory_space<vmem>>, vector<8x128xf32>
    %140 = vector.extract_strided_slice %138 {offsets = [0, 0], sizes = [8, 128], strides = [1, 1]} : vector<8x256xf32> to vector<8x128xf32>
    %141 = arith.addf %139, %140 : vector<8x128xf32>
    %c32_43 = arith.constant 32 : index
    %c128_44 = arith.constant 128 : index
    %142 = vector.load %arg15[%c32_43, %c128_44] : memref<64x256xf32, #tpu.memory_space<vmem>>, vector<8x128xf32>
    %143 = vector.extract_strided_slice %138 {offsets = [0, 128], sizes = [8, 128], strides = [1, 1]} : vector<8x256xf32> to vector<8x128xf32>
    %144 = arith.addf %142, %143 : vector<8x128xf32>
    %145 = arith.negf %141 : vector<8x128xf32>
    %146 = math.exp %145 : vector<8x128xf32>
    %cst_45 = arith.constant 1.000000e+00 : f32
    %147 = vector.broadcast %cst_45 : f32 to vector<8x128xf32>
    %148 = arith.addf %147, %146 : vector<8x128xf32>
    %149 = arith.divf %147, %148 : vector<8x128xf32>
    %150 = arith.negf %144 : vector<8x128xf32>
    %151 = math.exp %150 : vector<8x128xf32>
    %cst_46 = arith.constant 1.000000e+00 : f32
    %152 = vector.broadcast %cst_46 : f32 to vector<8x128xf32>
    %153 = arith.addf %152, %151 : vector<8x128xf32>
    %154 = arith.divf %152, %153 : vector<8x128xf32>
    %155 = vector.extract_strided_slice %149 {offsets = [0, 32], sizes = [8, 32], strides = [1, 1]} : vector<8x128xf32> to vector<8x32xf32>
    %156 = arith.mulf %155, %121 : vector<8x32xf32>
    %157 = vector.extract_strided_slice %149 {offsets = [0, 0], sizes = [8, 32], strides = [1, 1]} : vector<8x128xf32> to vector<8x32xf32>
    %158 = vector.extract_strided_slice %141 {offsets = [0, 64], sizes = [8, 32], strides = [1, 1]} : vector<8x128xf32> to vector<8x32xf32>
    %159 = math.tanh %158 : vector<8x32xf32>
    %160 = arith.mulf %157, %159 : vector<8x32xf32>
    %161 = arith.addf %156, %160 : vector<8x32xf32>
    %162 = vector.extract_strided_slice %154 {offsets = [0, 32], sizes = [8, 32], strides = [1, 1]} : vector<8x128xf32> to vector<8x32xf32>
    %163 = arith.mulf %162, %128 : vector<8x32xf32>
    %164 = vector.extract_strided_slice %154 {offsets = [0, 0], sizes = [8, 32], strides = [1, 1]} : vector<8x128xf32> to vector<8x32xf32>
    %165 = vector.extract_strided_slice %144 {offsets = [0, 64], sizes = [8, 32], strides = [1, 1]} : vector<8x128xf32> to vector<8x32xf32>
    %166 = math.tanh %165 : vector<8x32xf32>
    %167 = arith.mulf %164, %166 : vector<8x32xf32>
    %168 = arith.addf %163, %167 : vector<8x32xf32>
    %169 = vector.extract_strided_slice %149 {offsets = [0, 96], sizes = [8, 32], strides = [1, 1]} : vector<8x128xf32> to vector<8x32xf32>
    %170 = math.tanh %161 : vector<8x32xf32>
    %171 = arith.mulf %169, %170 : vector<8x32xf32>
    %172 = vector.extract_strided_slice %154 {offsets = [0, 96], sizes = [8, 32], strides = [1, 1]} : vector<8x128xf32> to vector<8x32xf32>
    %173 = math.tanh %168 : vector<8x32xf32>
    %174 = arith.mulf %172, %173 : vector<8x32xf32>
    %175 = tpu.concatenate %171, %174 in 1 : vector<8x32xf32>, vector<8x32xf32> -> vector<8x64xf32>
    %c24_47 = arith.constant 24 : index
    %c0_48 = arith.constant 0 : index
    %176 = vector.load %arg17[%c24_47, %c0_48] : memref<64x64xf32, #tpu.memory_space<vmem>>, vector<8x32xf32>
    tpu.vector_store %arg17[%c24_47, %c0_48], %171 {strides = array<i32>} : memref<64x64xf32, #tpu.memory_space<vmem>>, vector<8x32xf32>,
    %c32_49 = arith.constant 32 : index
    %c32_50 = arith.constant 32 : index
    %177 = vector.load %arg17[%c32_49, %c32_50] : memref<64x64xf32, #tpu.memory_space<vmem>>, vector<8x32xf32>
    tpu.vector_store %arg17[%c32_49, %c32_50], %174 {strides = array<i32>} : memref<64x64xf32, #tpu.memory_space<vmem>>, vector<8x32xf32>,
    %cst_51 = arith.constant dense<0.000000e+00> : vector<8x256xf32>
    %178 = tpu.matmul %175, %14, %cst_51 {dimension_numbers = #tpu.dot_dimension_numbers<[1], [0], [0], [1], [0, 0, 1, 1], [], []>} : vector<8x64xf32>, vector<64x256xf32>, vector<8x256xf32> -> vector<8x256xf32>
    %c32_52 = arith.constant 32 : index
    %c0_53 = arith.constant 0 : index
    %179 = vector.load %arg15[%c32_52, %c0_53] : memref<64x256xf32, #tpu.memory_space<vmem>>, vector<8x128xf32>
    %180 = vector.extract_strided_slice %178 {offsets = [0, 0], sizes = [8, 128], strides = [1, 1]} : vector<8x256xf32> to vector<8x128xf32>
    %181 = arith.addf %179, %180 : vector<8x128xf32>
    %c24_54 = arith.constant 24 : index
    %c128_55 = arith.constant 128 : index
    %182 = vector.load %arg15[%c24_54, %c128_55] : memref<64x256xf32, #tpu.memory_space<vmem>>, vector<8x128xf32>
    %183 = vector.extract_strided_slice %178 {offsets = [0, 128], sizes = [8, 128], strides = [1, 1]} : vector<8x256xf32> to vector<8x128xf32>
    %184 = arith.addf %182, %183 : vector<8x128xf32>
    %185 = arith.negf %181 : vector<8x128xf32>
    %186 = math.exp %185 : vector<8x128xf32>
    %cst_56 = arith.constant 1.000000e+00 : f32
    %187 = vector.broadcast %cst_56 : f32 to vector<8x128xf32>
    %188 = arith.addf %187, %186 : vector<8x128xf32>
    %189 = arith.divf %187, %188 : vector<8x128xf32>
    %190 = arith.negf %184 : vector<8x128xf32>
    %191 = math.exp %190 : vector<8x128xf32>
    %cst_57 = arith.constant 1.000000e+00 : f32
    %192 = vector.broadcast %cst_57 : f32 to vector<8x128xf32>
    %193 = arith.addf %192, %191 : vector<8x128xf32>
    %194 = arith.divf %192, %193 : vector<8x128xf32>
    %195 = vector.extract_strided_slice %189 {offsets = [0, 32], sizes = [8, 32], strides = [1, 1]} : vector<8x128xf32> to vector<8x32xf32>
    %196 = arith.mulf %195, %161 : vector<8x32xf32>
    %197 = vector.extract_strided_slice %189 {offsets = [0, 0], sizes = [8, 32], strides = [1, 1]} : vector<8x128xf32> to vector<8x32xf32>
    %198 = vector.extract_strided_slice %181 {offsets = [0, 64], sizes = [8, 32], strides = [1, 1]} : vector<8x128xf32> to vector<8x32xf32>
    %199 = math.tanh %198 : vector<8x32xf32>
    %200 = arith.mulf %197, %199 : vector<8x32xf32>
    %201 = arith.addf %196, %200 : vector<8x32xf32>
    %202 = vector.extract_strided_slice %194 {offsets = [0, 32], sizes = [8, 32], strides = [1, 1]} : vector<8x128xf32> to vector<8x32xf32>
    %203 = arith.mulf %202, %168 : vector<8x32xf32>
    %204 = vector.extract_strided_slice %194 {offsets = [0, 0], sizes = [8, 32], strides = [1, 1]} : vector<8x128xf32> to vector<8x32xf32>
    %205 = vector.extract_strided_slice %184 {offsets = [0, 64], sizes = [8, 32], strides = [1, 1]} : vector<8x128xf32> to vector<8x32xf32>
    %206 = math.tanh %205 : vector<8x32xf32>
    %207 = arith.mulf %204, %206 : vector<8x32xf32>
    %208 = arith.addf %203, %207 : vector<8x32xf32>
    %209 = vector.extract_strided_slice %189 {offsets = [0, 96], sizes = [8, 32], strides = [1, 1]} : vector<8x128xf32> to vector<8x32xf32>
    %210 = math.tanh %201 : vector<8x32xf32>
    %211 = arith.mulf %209, %210 : vector<8x32xf32>
    %212 = vector.extract_strided_slice %194 {offsets = [0, 96], sizes = [8, 32], strides = [1, 1]} : vector<8x128xf32> to vector<8x32xf32>
    %213 = math.tanh %208 : vector<8x32xf32>
    %214 = arith.mulf %212, %213 : vector<8x32xf32>
    %215 = tpu.concatenate %211, %214 in 1 : vector<8x32xf32>, vector<8x32xf32> -> vector<8x64xf32>
    %c32_58 = arith.constant 32 : index
    %c0_59 = arith.constant 0 : index
    %216 = vector.load %arg17[%c32_58, %c0_59] : memref<64x64xf32, #tpu.memory_space<vmem>>, vector<8x32xf32>
    tpu.vector_store %arg17[%c32_58, %c0_59], %211 {strides = array<i32>} : memref<64x64xf32, #tpu.memory_space<vmem>>, vector<8x32xf32>,
    %c24_60 = arith.constant 24 : index
    %c32_61 = arith.constant 32 : index
    %217 = vector.load %arg17[%c24_60, %c32_61] : memref<64x64xf32, #tpu.memory_space<vmem>>, vector<8x32xf32>
    tpu.vector_store %arg17[%c24_60, %c32_61], %214 {strides = array<i32>} : memref<64x64xf32, #tpu.memory_space<vmem>>, vector<8x32xf32>,
    %cst_62 = arith.constant dense<0.000000e+00> : vector<8x256xf32>
    %218 = tpu.matmul %215, %14, %cst_62 {dimension_numbers = #tpu.dot_dimension_numbers<[1], [0], [0], [1], [0, 0, 1, 1], [], []>} : vector<8x64xf32>, vector<64x256xf32>, vector<8x256xf32> -> vector<8x256xf32>
    %c40_63 = arith.constant 40 : index
    %c0_64 = arith.constant 0 : index
    %219 = vector.load %arg15[%c40_63, %c0_64] : memref<64x256xf32, #tpu.memory_space<vmem>>, vector<8x128xf32>
    %220 = vector.extract_strided_slice %218 {offsets = [0, 0], sizes = [8, 128], strides = [1, 1]} : vector<8x256xf32> to vector<8x128xf32>
    %221 = arith.addf %219, %220 : vector<8x128xf32>
    %c16_65 = arith.constant 16 : index
    %c128_66 = arith.constant 128 : index
    %222 = vector.load %arg15[%c16_65, %c128_66] : memref<64x256xf32, #tpu.memory_space<vmem>>, vector<8x128xf32>
    %223 = vector.extract_strided_slice %218 {offsets = [0, 128], sizes = [8, 128], strides = [1, 1]} : vector<8x256xf32> to vector<8x128xf32>
    %224 = arith.addf %222, %223 : vector<8x128xf32>
    %225 = arith.negf %221 : vector<8x128xf32>
    %226 = math.exp %225 : vector<8x128xf32>
    %cst_67 = arith.constant 1.000000e+00 : f32
    %227 = vector.broadcast %cst_67 : f32 to vector<8x128xf32>
    %228 = arith.addf %227, %226 : vector<8x128xf32>
    %229 = arith.divf %227, %228 : vector<8x128xf32>
    %230 = arith.negf %224 : vector<8x128xf32>
    %231 = math.exp %230 : vector<8x128xf32>
    %cst_68 = arith.constant 1.000000e+00 : f32
    %232 = vector.broadcast %cst_68 : f32 to vector<8x128xf32>
    %233 = arith.addf %232, %231 : vector<8x128xf32>
    %234 = arith.divf %232, %233 : vector<8x128xf32>
    %235 = vector.extract_strided_slice %229 {offsets = [0, 32], sizes = [8, 32], strides = [1, 1]} : vector<8x128xf32> to vector<8x32xf32>
    %236 = arith.mulf %235, %201 : vector<8x32xf32>
    %237 = vector.extract_strided_slice %229 {offsets = [0, 0], sizes = [8, 32], strides = [1, 1]} : vector<8x128xf32> to vector<8x32xf32>
    %238 = vector.extract_strided_slice %221 {offsets = [0, 64], sizes = [8, 32], strides = [1, 1]} : vector<8x128xf32> to vector<8x32xf32>
    %239 = math.tanh %238 : vector<8x32xf32>
    %240 = arith.mulf %237, %239 : vector<8x32xf32>
    %241 = arith.addf %236, %240 : vector<8x32xf32>
    %242 = vector.extract_strided_slice %234 {offsets = [0, 32], sizes = [8, 32], strides = [1, 1]} : vector<8x128xf32> to vector<8x32xf32>
    %243 = arith.mulf %242, %208 : vector<8x32xf32>
    %244 = vector.extract_strided_slice %234 {offsets = [0, 0], sizes = [8, 32], strides = [1, 1]} : vector<8x128xf32> to vector<8x32xf32>
    %245 = vector.extract_strided_slice %224 {offsets = [0, 64], sizes = [8, 32], strides = [1, 1]} : vector<8x128xf32> to vector<8x32xf32>
    %246 = math.tanh %245 : vector<8x32xf32>
    %247 = arith.mulf %244, %246 : vector<8x32xf32>
    %248 = arith.addf %243, %247 : vector<8x32xf32>
    %249 = vector.extract_strided_slice %229 {offsets = [0, 96], sizes = [8, 32], strides = [1, 1]} : vector<8x128xf32> to vector<8x32xf32>
    %250 = math.tanh %241 : vector<8x32xf32>
    %251 = arith.mulf %249, %250 : vector<8x32xf32>
    %252 = vector.extract_strided_slice %234 {offsets = [0, 96], sizes = [8, 32], strides = [1, 1]} : vector<8x128xf32> to vector<8x32xf32>
    %253 = math.tanh %248 : vector<8x32xf32>
    %254 = arith.mulf %252, %253 : vector<8x32xf32>
    %255 = tpu.concatenate %251, %254 in 1 : vector<8x32xf32>, vector<8x32xf32> -> vector<8x64xf32>
    %c40_69 = arith.constant 40 : index
    %c0_70 = arith.constant 0 : index
    %256 = vector.load %arg17[%c40_69, %c0_70] : memref<64x64xf32, #tpu.memory_space<vmem>>, vector<8x32xf32>
    tpu.vector_store %arg17[%c40_69, %c0_70], %251 {strides = array<i32>} : memref<64x64xf32, #tpu.memory_space<vmem>>, vector<8x32xf32>,
    %c16_71 = arith.constant 16 : index
    %c32_72 = arith.constant 32 : index
    %257 = vector.load %arg17[%c16_71, %c32_72] : memref<64x64xf32, #tpu.memory_space<vmem>>, vector<8x32xf32>
    tpu.vector_store %arg17[%c16_71, %c32_72], %254 {strides = array<i32>} : memref<64x64xf32, #tpu.memory_space<vmem>>, vector<8x32xf32>,
    %cst_73 = arith.constant dense<0.000000e+00> : vector<8x256xf32>
    %258 = tpu.matmul %255, %14, %cst_73 {dimension_numbers = #tpu.dot_dimension_numbers<[1], [0], [0], [1], [0, 0, 1, 1], [], []>} : vector<8x64xf32>, vector<64x256xf32>, vector<8x256xf32> -> vector<8x256xf32>
    %c48_74 = arith.constant 48 : index
    %c0_75 = arith.constant 0 : index
    %259 = vector.load %arg15[%c48_74, %c0_75] : memref<64x256xf32, #tpu.memory_space<vmem>>, vector<8x128xf32>
    %260 = vector.extract_strided_slice %258 {offsets = [0, 0], sizes = [8, 128], strides = [1, 1]} : vector<8x256xf32> to vector<8x128xf32>
    %261 = arith.addf %259, %260 : vector<8x128xf32>
    %c8_76 = arith.constant 8 : index
    %c128_77 = arith.constant 128 : index
    %262 = vector.load %arg15[%c8_76, %c128_77] : memref<64x256xf32, #tpu.memory_space<vmem>>, vector<8x128xf32>
    %263 = vector.extract_strided_slice %258 {offsets = [0, 128], sizes = [8, 128], strides = [1, 1]} : vector<8x256xf32> to vector<8x128xf32>
    %264 = arith.addf %262, %263 : vector<8x128xf32>
    %265 = arith.negf %261 : vector<8x128xf32>
    %266 = math.exp %265 : vector<8x128xf32>
    %cst_78 = arith.constant 1.000000e+00 : f32
    %267 = vector.broadcast %cst_78 : f32 to vector<8x128xf32>
    %268 = arith.addf %267, %266 : vector<8x128xf32>
    %269 = arith.divf %267, %268 : vector<8x128xf32>
    %270 = arith.negf %264 : vector<8x128xf32>
    %271 = math.exp %270 : vector<8x128xf32>
    %cst_79 = arith.constant 1.000000e+00 : f32
    %272 = vector.broadcast %cst_79 : f32 to vector<8x128xf32>
    %273 = arith.addf %272, %271 : vector<8x128xf32>
    %274 = arith.divf %272, %273 : vector<8x128xf32>
    %275 = vector.extract_strided_slice %269 {offsets = [0, 32], sizes = [8, 32], strides = [1, 1]} : vector<8x128xf32> to vector<8x32xf32>
    %276 = arith.mulf %275, %241 : vector<8x32xf32>
    %277 = vector.extract_strided_slice %269 {offsets = [0, 0], sizes = [8, 32], strides = [1, 1]} : vector<8x128xf32> to vector<8x32xf32>
    %278 = vector.extract_strided_slice %261 {offsets = [0, 64], sizes = [8, 32], strides = [1, 1]} : vector<8x128xf32> to vector<8x32xf32>
    %279 = math.tanh %278 : vector<8x32xf32>
    %280 = arith.mulf %277, %279 : vector<8x32xf32>
    %281 = arith.addf %276, %280 : vector<8x32xf32>
    %282 = vector.extract_strided_slice %274 {offsets = [0, 32], sizes = [8, 32], strides = [1, 1]} : vector<8x128xf32> to vector<8x32xf32>
    %283 = arith.mulf %282, %248 : vector<8x32xf32>
    %284 = vector.extract_strided_slice %274 {offsets = [0, 0], sizes = [8, 32], strides = [1, 1]} : vector<8x128xf32> to vector<8x32xf32>
    %285 = vector.extract_strided_slice %264 {offsets = [0, 64], sizes = [8, 32], strides = [1, 1]} : vector<8x128xf32> to vector<8x32xf32>
    %286 = math.tanh %285 : vector<8x32xf32>
    %287 = arith.mulf %284, %286 : vector<8x32xf32>
    %288 = arith.addf %283, %287 : vector<8x32xf32>
    %289 = vector.extract_strided_slice %269 {offsets = [0, 96], sizes = [8, 32], strides = [1, 1]} : vector<8x128xf32> to vector<8x32xf32>
    %290 = math.tanh %281 : vector<8x32xf32>
    %291 = arith.mulf %289, %290 : vector<8x32xf32>
    %292 = vector.extract_strided_slice %274 {offsets = [0, 96], sizes = [8, 32], strides = [1, 1]} : vector<8x128xf32> to vector<8x32xf32>
    %293 = math.tanh %288 : vector<8x32xf32>
    %294 = arith.mulf %292, %293 : vector<8x32xf32>
    %295 = tpu.concatenate %291, %294 in 1 : vector<8x32xf32>, vector<8x32xf32> -> vector<8x64xf32>
    %c48_80 = arith.constant 48 : index
    %c0_81 = arith.constant 0 : index
    %296 = vector.load %arg17[%c48_80, %c0_81] : memref<64x64xf32, #tpu.memory_space<vmem>>, vector<8x32xf32>
    tpu.vector_store %arg17[%c48_80, %c0_81], %291 {strides = array<i32>} : memref<64x64xf32, #tpu.memory_space<vmem>>, vector<8x32xf32>,
    %c8_82 = arith.constant 8 : index
    %c32_83 = arith.constant 32 : index
    %297 = vector.load %arg17[%c8_82, %c32_83] : memref<64x64xf32, #tpu.memory_space<vmem>>, vector<8x32xf32>
    tpu.vector_store %arg17[%c8_82, %c32_83], %294 {strides = array<i32>} : memref<64x64xf32, #tpu.memory_space<vmem>>, vector<8x32xf32>,
    %cst_84 = arith.constant dense<0.000000e+00> : vector<8x256xf32>
    %298 = tpu.matmul %295, %14, %cst_84 {dimension_numbers = #tpu.dot_dimension_numbers<[1], [0], [0], [1], [0, 0, 1, 1], [], []>} : vector<8x64xf32>, vector<64x256xf32>, vector<8x256xf32> -> vector<8x256xf32>
    %c56_85 = arith.constant 56 : index
    %c0_86 = arith.constant 0 : index
    %299 = vector.load %arg15[%c56_85, %c0_86] : memref<64x256xf32, #tpu.memory_space<vmem>>, vector<8x128xf32>
    %300 = vector.extract_strided_slice %298 {offsets = [0, 0], sizes = [8, 128], strides = [1, 1]} : vector<8x256xf32> to vector<8x128xf32>
    %301 = arith.addf %299, %300 : vector<8x128xf32>
    %c0_87 = arith.constant 0 : index
    %c128_88 = arith.constant 128 : index
    %302 = vector.load %arg15[%c0_87, %c128_88] : memref<64x256xf32, #tpu.memory_space<vmem>>, vector<8x128xf32>
    %303 = vector.extract_strided_slice %298 {offsets = [0, 128], sizes = [8, 128], strides = [1, 1]} : vector<8x256xf32> to vector<8x128xf32>
    %304 = arith.addf %302, %303 : vector<8x128xf32>
    %305 = arith.negf %301 : vector<8x128xf32>
    %306 = math.exp %305 : vector<8x128xf32>
    %cst_89 = arith.constant 1.000000e+00 : f32
    %307 = vector.broadcast %cst_89 : f32 to vector<8x128xf32>
    %308 = arith.addf %307, %306 : vector<8x128xf32>
    %309 = arith.divf %307, %308 : vector<8x128xf32>
    %310 = arith.negf %304 : vector<8x128xf32>
    %311 = math.exp %310 : vector<8x128xf32>
    %cst_90 = arith.constant 1.000000e+00 : f32
    %312 = vector.broadcast %cst_90 : f32 to vector<8x128xf32>
    %313 = arith.addf %312, %311 : vector<8x128xf32>
    %314 = arith.divf %312, %313 : vector<8x128xf32>
    %315 = vector.extract_strided_slice %309 {offsets = [0, 32], sizes = [8, 32], strides = [1, 1]} : vector<8x128xf32> to vector<8x32xf32>
    %316 = arith.mulf %315, %281 : vector<8x32xf32>
    %317 = vector.extract_strided_slice %309 {offsets = [0, 0], sizes = [8, 32], strides = [1, 1]} : vector<8x128xf32> to vector<8x32xf32>
    %318 = vector.extract_strided_slice %301 {offsets = [0, 64], sizes = [8, 32], strides = [1, 1]} : vector<8x128xf32> to vector<8x32xf32>
    %319 = math.tanh %318 : vector<8x32xf32>
    %320 = arith.mulf %317, %319 : vector<8x32xf32>
    %321 = arith.addf %316, %320 : vector<8x32xf32>
    %322 = vector.extract_strided_slice %314 {offsets = [0, 32], sizes = [8, 32], strides = [1, 1]} : vector<8x128xf32> to vector<8x32xf32>
    %323 = arith.mulf %322, %288 : vector<8x32xf32>
    %324 = vector.extract_strided_slice %314 {offsets = [0, 0], sizes = [8, 32], strides = [1, 1]} : vector<8x128xf32> to vector<8x32xf32>
    %325 = vector.extract_strided_slice %304 {offsets = [0, 64], sizes = [8, 32], strides = [1, 1]} : vector<8x128xf32> to vector<8x32xf32>
    %326 = math.tanh %325 : vector<8x32xf32>
    %327 = arith.mulf %324, %326 : vector<8x32xf32>
    %328 = arith.addf %323, %327 : vector<8x32xf32>
    %329 = vector.extract_strided_slice %309 {offsets = [0, 96], sizes = [8, 32], strides = [1, 1]} : vector<8x128xf32> to vector<8x32xf32>
    %330 = math.tanh %321 : vector<8x32xf32>
    %331 = arith.mulf %329, %330 : vector<8x32xf32>
    %332 = vector.extract_strided_slice %314 {offsets = [0, 96], sizes = [8, 32], strides = [1, 1]} : vector<8x128xf32> to vector<8x32xf32>
    %333 = math.tanh %328 : vector<8x32xf32>
    %334 = arith.mulf %332, %333 : vector<8x32xf32>
    %c56_91 = arith.constant 56 : index
    %c0_92 = arith.constant 0 : index
    %335 = vector.load %arg17[%c56_91, %c0_92] : memref<64x64xf32, #tpu.memory_space<vmem>>, vector<8x32xf32>
    tpu.vector_store %arg17[%c56_91, %c0_92], %331 {strides = array<i32>} : memref<64x64xf32, #tpu.memory_space<vmem>>, vector<8x32xf32>,
    %c0_93 = arith.constant 0 : index
    %c32_94 = arith.constant 32 : index
    %336 = vector.load %arg17[%c0_93, %c32_94] : memref<64x64xf32, #tpu.memory_space<vmem>>, vector<8x32xf32>
    tpu.vector_store %arg17[%c0_93, %c32_94], %334 {strides = array<i32>} : memref<64x64xf32, #tpu.memory_space<vmem>>, vector<8x32xf32>,
    %c0_95 = arith.constant 0 : index
    %c0_96 = arith.constant 0 : index
    %337 = vector.load %arg17[%c0_95, %c0_96] : memref<64x64xf32, #tpu.memory_space<vmem>>, vector<64x64xf32>
    %c0_97 = arith.constant 0 : index
    %c0_98 = arith.constant 0 : index
    %338 = vector.load %arg5[%c0_97, %c0_98] : memref<64x128xf32, #tpu.memory_space<vmem>>, vector<64x128xf32>
    %cst_99 = arith.constant dense<0.000000e+00> : vector<64x128xf32>
    %339 = tpu.matmul %337, %338, %cst_99 {dimension_numbers = #tpu.dot_dimension_numbers<[1], [0], [0], [1], [0, 0, 1, 1], [], []>} : vector<64x64xf32>, vector<64x128xf32>, vector<64x128xf32> -> vector<64x128xf32>
    %c0_100 = arith.constant 0 : index
    %c0_101 = arith.constant 0 : index
    %340 = vector.load %arg7[%c0_100, %c0_101] : memref<1x128xf32, #tpu.memory_space<vmem>>, vector<1x128xf32>
    %341 = vector.broadcast %340 : vector<1x128xf32> to vector<64x128xf32>
    %342 = arith.addf %339, %341 : vector<64x128xf32>
    %c0_102 = arith.constant 0 : index
    %c0_103 = arith.constant 0 : index
    %343 = vector.load %arg16[%c0_102, %c0_103] : memref<64x128xf32, #tpu.memory_space<vmem>>, vector<64x128xf32>
    tpu.vector_store %arg16[%c0_102, %c0_103], %342 {strides = array<i32>} : memref<64x128xf32, #tpu.memory_space<vmem>>, vector<64x128xf32>,
    %c0_104 = arith.constant 0 : index
    %c0_105 = arith.constant 0 : index
    %344 = vector.load %arg6[%c0_104, %c0_105] : memref<32x128xf32, #tpu.memory_space<vmem>>, vector<32x128xf32>
    %cst_106 = arith.constant 0.000000e+00 : f32
    %345 = vector.broadcast %cst_106 : f32 to vector<8x32xf32>
    %cst_107 = arith.constant 0.000000e+00 : f32
    %346 = vector.broadcast %cst_107 : f32 to vector<8x32xf32>
    %c56_108 = arith.constant 56 : index
    %c0_109 = arith.constant 0 : index
    %347 = vector.load %arg16[%c56_108, %c0_109] : memref<64x128xf32, #tpu.memory_space<vmem>>, vector<8x128xf32>
    %cst_110 = arith.constant dense<0.000000e+00> : vector<8x128xf32>
    %348 = tpu.matmul %345, %344, %cst_110 {dimension_numbers = #tpu.dot_dimension_numbers<[1], [0], [0], [1], [0, 0, 1, 1], [], []>} : vector<8x32xf32>, vector<32x128xf32>, vector<8x128xf32> -> vector<8x128xf32>
    %349 = arith.addf %347, %348 : vector<8x128xf32>
    %350 = arith.negf %349 : vector<8x128xf32>
    %351 = math.exp %350 : vector<8x128xf32>
    %cst_111 = arith.constant 1.000000e+00 : f32
    %352 = vector.broadcast %cst_111 : f32 to vector<8x128xf32>
    %353 = arith.addf %352, %351 : vector<8x128xf32>
    %354 = arith.divf %352, %353 : vector<8x128xf32>
    %355 = vector.extract_strided_slice %354 {offsets = [0, 32], sizes = [8, 32], strides = [1, 1]} : vector<8x128xf32> to vector<8x32xf32>
    %356 = arith.mulf %355, %346 : vector<8x32xf32>
    %357 = vector.extract_strided_slice %354 {offsets = [0, 0], sizes = [8, 32], strides = [1, 1]} : vector<8x128xf32> to vector<8x32xf32>
    %358 = vector.extract_strided_slice %349 {offsets = [0, 64], sizes = [8, 32], strides = [1, 1]} : vector<8x128xf32> to vector<8x32xf32>
    %359 = math.tanh %358 : vector<8x32xf32>
    %360 = arith.mulf %357, %359 : vector<8x32xf32>
    %361 = arith.addf %356, %360 : vector<8x32xf32>
    %362 = vector.extract_strided_slice %354 {offsets = [0, 96], sizes = [8, 32], strides = [1, 1]} : vector<8x128xf32> to vector<8x32xf32>
    %363 = math.tanh %361 : vector<8x32xf32>
    %364 = arith.mulf %362, %363 : vector<8x32xf32>
    %c48_112 = arith.constant 48 : index
    %c0_113 = arith.constant 0 : index
    %365 = vector.load %arg16[%c48_112, %c0_113] : memref<64x128xf32, #tpu.memory_space<vmem>>, vector<8x128xf32>
    %cst_114 = arith.constant dense<0.000000e+00> : vector<8x128xf32>
    %366 = tpu.matmul %364, %344, %cst_114 {dimension_numbers = #tpu.dot_dimension_numbers<[1], [0], [0], [1], [0, 0, 1, 1], [], []>} : vector<8x32xf32>, vector<32x128xf32>, vector<8x128xf32> -> vector<8x128xf32>
    %367 = arith.addf %365, %366 : vector<8x128xf32>
    %368 = arith.negf %367 : vector<8x128xf32>
    %369 = math.exp %368 : vector<8x128xf32>
    %cst_115 = arith.constant 1.000000e+00 : f32
    %370 = vector.broadcast %cst_115 : f32 to vector<8x128xf32>
    %371 = arith.addf %370, %369 : vector<8x128xf32>
    %372 = arith.divf %370, %371 : vector<8x128xf32>
    %373 = vector.extract_strided_slice %372 {offsets = [0, 32], sizes = [8, 32], strides = [1, 1]} : vector<8x128xf32> to vector<8x32xf32>
    %374 = arith.mulf %373, %361 : vector<8x32xf32>
    %375 = vector.extract_strided_slice %372 {offsets = [0, 0], sizes = [8, 32], strides = [1, 1]} : vector<8x128xf32> to vector<8x32xf32>
    %376 = vector.extract_strided_slice %367 {offsets = [0, 64], sizes = [8, 32], strides = [1, 1]} : vector<8x128xf32> to vector<8x32xf32>
    %377 = math.tanh %376 : vector<8x32xf32>
    %378 = arith.mulf %375, %377 : vector<8x32xf32>
    %379 = arith.addf %374, %378 : vector<8x32xf32>
    %380 = vector.extract_strided_slice %372 {offsets = [0, 96], sizes = [8, 32], strides = [1, 1]} : vector<8x128xf32> to vector<8x32xf32>
    %381 = math.tanh %379 : vector<8x32xf32>
    %382 = arith.mulf %380, %381 : vector<8x32xf32>
    %c40_116 = arith.constant 40 : index
    %c0_117 = arith.constant 0 : index
    %383 = vector.load %arg16[%c40_116, %c0_117] : memref<64x128xf32, #tpu.memory_space<vmem>>, vector<8x128xf32>
    %cst_118 = arith.constant dense<0.000000e+00> : vector<8x128xf32>
    %384 = tpu.matmul %382, %344, %cst_118 {dimension_numbers = #tpu.dot_dimension_numbers<[1], [0], [0], [1], [0, 0, 1, 1], [], []>} : vector<8x32xf32>, vector<32x128xf32>, vector<8x128xf32> -> vector<8x128xf32>
    %385 = arith.addf %383, %384 : vector<8x128xf32>
    %386 = arith.negf %385 : vector<8x128xf32>
    %387 = math.exp %386 : vector<8x128xf32>
    %cst_119 = arith.constant 1.000000e+00 : f32
    %388 = vector.broadcast %cst_119 : f32 to vector<8x128xf32>
    %389 = arith.addf %388, %387 : vector<8x128xf32>
    %390 = arith.divf %388, %389 : vector<8x128xf32>
    %391 = vector.extract_strided_slice %390 {offsets = [0, 32], sizes = [8, 32], strides = [1, 1]} : vector<8x128xf32> to vector<8x32xf32>
    %392 = arith.mulf %391, %379 : vector<8x32xf32>
    %393 = vector.extract_strided_slice %390 {offsets = [0, 0], sizes = [8, 32], strides = [1, 1]} : vector<8x128xf32> to vector<8x32xf32>
    %394 = vector.extract_strided_slice %385 {offsets = [0, 64], sizes = [8, 32], strides = [1, 1]} : vector<8x128xf32> to vector<8x32xf32>
    %395 = math.tanh %394 : vector<8x32xf32>
    %396 = arith.mulf %393, %395 : vector<8x32xf32>
    %397 = arith.addf %392, %396 : vector<8x32xf32>
    %398 = vector.extract_strided_slice %390 {offsets = [0, 96], sizes = [8, 32], strides = [1, 1]} : vector<8x128xf32> to vector<8x32xf32>
    %399 = math.tanh %397 : vector<8x32xf32>
    %400 = arith.mulf %398, %399 : vector<8x32xf32>
    %c32_120 = arith.constant 32 : index
    %c0_121 = arith.constant 0 : index
    %401 = vector.load %arg16[%c32_120, %c0_121] : memref<64x128xf32, #tpu.memory_space<vmem>>, vector<8x128xf32>
    %cst_122 = arith.constant dense<0.000000e+00> : vector<8x128xf32>
    %402 = tpu.matmul %400, %344, %cst_122 {dimension_numbers = #tpu.dot_dimension_numbers<[1], [0], [0], [1], [0, 0, 1, 1], [], []>} : vector<8x32xf32>, vector<32x128xf32>, vector<8x128xf32> -> vector<8x128xf32>
    %403 = arith.addf %401, %402 : vector<8x128xf32>
    %404 = arith.negf %403 : vector<8x128xf32>
    %405 = math.exp %404 : vector<8x128xf32>
    %cst_123 = arith.constant 1.000000e+00 : f32
    %406 = vector.broadcast %cst_123 : f32 to vector<8x128xf32>
    %407 = arith.addf %406, %405 : vector<8x128xf32>
    %408 = arith.divf %406, %407 : vector<8x128xf32>
    %409 = vector.extract_strided_slice %408 {offsets = [0, 32], sizes = [8, 32], strides = [1, 1]} : vector<8x128xf32> to vector<8x32xf32>
    %410 = arith.mulf %409, %397 : vector<8x32xf32>
    %411 = vector.extract_strided_slice %408 {offsets = [0, 0], sizes = [8, 32], strides = [1, 1]} : vector<8x128xf32> to vector<8x32xf32>
    %412 = vector.extract_strided_slice %403 {offsets = [0, 64], sizes = [8, 32], strides = [1, 1]} : vector<8x128xf32> to vector<8x32xf32>
    %413 = math.tanh %412 : vector<8x32xf32>
    %414 = arith.mulf %411, %413 : vector<8x32xf32>
    %415 = arith.addf %410, %414 : vector<8x32xf32>
    %416 = vector.extract_strided_slice %408 {offsets = [0, 96], sizes = [8, 32], strides = [1, 1]} : vector<8x128xf32> to vector<8x32xf32>
    %417 = math.tanh %415 : vector<8x32xf32>
    %418 = arith.mulf %416, %417 : vector<8x32xf32>
    %c24_124 = arith.constant 24 : index
    %c0_125 = arith.constant 0 : index
    %419 = vector.load %arg16[%c24_124, %c0_125] : memref<64x128xf32, #tpu.memory_space<vmem>>, vector<8x128xf32>
    %cst_126 = arith.constant dense<0.000000e+00> : vector<8x128xf32>
    %420 = tpu.matmul %418, %344, %cst_126 {dimension_numbers = #tpu.dot_dimension_numbers<[1], [0], [0], [1], [0, 0, 1, 1], [], []>} : vector<8x32xf32>, vector<32x128xf32>, vector<8x128xf32> -> vector<8x128xf32>
    %421 = arith.addf %419, %420 : vector<8x128xf32>
    %422 = arith.negf %421 : vector<8x128xf32>
    %423 = math.exp %422 : vector<8x128xf32>
    %cst_127 = arith.constant 1.000000e+00 : f32
    %424 = vector.broadcast %cst_127 : f32 to vector<8x128xf32>
    %425 = arith.addf %424, %423 : vector<8x128xf32>
    %426 = arith.divf %424, %425 : vector<8x128xf32>
    %427 = vector.extract_strided_slice %426 {offsets = [0, 32], sizes = [8, 32], strides = [1, 1]} : vector<8x128xf32> to vector<8x32xf32>
    %428 = arith.mulf %427, %415 : vector<8x32xf32>
    %429 = vector.extract_strided_slice %426 {offsets = [0, 0], sizes = [8, 32], strides = [1, 1]} : vector<8x128xf32> to vector<8x32xf32>
    %430 = vector.extract_strided_slice %421 {offsets = [0, 64], sizes = [8, 32], strides = [1, 1]} : vector<8x128xf32> to vector<8x32xf32>
    %431 = math.tanh %430 : vector<8x32xf32>
    %432 = arith.mulf %429, %431 : vector<8x32xf32>
    %433 = arith.addf %428, %432 : vector<8x32xf32>
    %434 = vector.extract_strided_slice %426 {offsets = [0, 96], sizes = [8, 32], strides = [1, 1]} : vector<8x128xf32> to vector<8x32xf32>
    %435 = math.tanh %433 : vector<8x32xf32>
    %436 = arith.mulf %434, %435 : vector<8x32xf32>
    %c16_128 = arith.constant 16 : index
    %c0_129 = arith.constant 0 : index
    %437 = vector.load %arg16[%c16_128, %c0_129] : memref<64x128xf32, #tpu.memory_space<vmem>>, vector<8x128xf32>
    %cst_130 = arith.constant dense<0.000000e+00> : vector<8x128xf32>
    %438 = tpu.matmul %436, %344, %cst_130 {dimension_numbers = #tpu.dot_dimension_numbers<[1], [0], [0], [1], [0, 0, 1, 1], [], []>} : vector<8x32xf32>, vector<32x128xf32>, vector<8x128xf32> -> vector<8x128xf32>
    %439 = arith.addf %437, %438 : vector<8x128xf32>
    %440 = arith.negf %439 : vector<8x128xf32>
    %441 = math.exp %440 : vector<8x128xf32>
    %cst_131 = arith.constant 1.000000e+00 : f32
    %442 = vector.broadcast %cst_131 : f32 to vector<8x128xf32>
    %443 = arith.addf %442, %441 : vector<8x128xf32>
    %444 = arith.divf %442, %443 : vector<8x128xf32>
    %445 = vector.extract_strided_slice %444 {offsets = [0, 32], sizes = [8, 32], strides = [1, 1]} : vector<8x128xf32> to vector<8x32xf32>
    %446 = arith.mulf %445, %433 : vector<8x32xf32>
    %447 = vector.extract_strided_slice %444 {offsets = [0, 0], sizes = [8, 32], strides = [1, 1]} : vector<8x128xf32> to vector<8x32xf32>
    %448 = vector.extract_strided_slice %439 {offsets = [0, 64], sizes = [8, 32], strides = [1, 1]} : vector<8x128xf32> to vector<8x32xf32>
    %449 = math.tanh %448 : vector<8x32xf32>
    %450 = arith.mulf %447, %449 : vector<8x32xf32>
    %451 = arith.addf %446, %450 : vector<8x32xf32>
    %452 = vector.extract_strided_slice %444 {offsets = [0, 96], sizes = [8, 32], strides = [1, 1]} : vector<8x128xf32> to vector<8x32xf32>
    %453 = math.tanh %451 : vector<8x32xf32>
    %454 = arith.mulf %452, %453 : vector<8x32xf32>
    %c8_132 = arith.constant 8 : index
    %c0_133 = arith.constant 0 : index
    %455 = vector.load %arg16[%c8_132, %c0_133] : memref<64x128xf32, #tpu.memory_space<vmem>>, vector<8x128xf32>
    %cst_134 = arith.constant dense<0.000000e+00> : vector<8x128xf32>
    %456 = tpu.matmul %454, %344, %cst_134 {dimension_numbers = #tpu.dot_dimension_numbers<[1], [0], [0], [1], [0, 0, 1, 1], [], []>} : vector<8x32xf32>, vector<32x128xf32>, vector<8x128xf32> -> vector<8x128xf32>
    %457 = arith.addf %455, %456 : vector<8x128xf32>
    %458 = arith.negf %457 : vector<8x128xf32>
    %459 = math.exp %458 : vector<8x128xf32>
    %cst_135 = arith.constant 1.000000e+00 : f32
    %460 = vector.broadcast %cst_135 : f32 to vector<8x128xf32>
    %461 = arith.addf %460, %459 : vector<8x128xf32>
    %462 = arith.divf %460, %461 : vector<8x128xf32>
    %463 = vector.extract_strided_slice %462 {offsets = [0, 32], sizes = [8, 32], strides = [1, 1]} : vector<8x128xf32> to vector<8x32xf32>
    %464 = arith.mulf %463, %451 : vector<8x32xf32>
    %465 = vector.extract_strided_slice %462 {offsets = [0, 0], sizes = [8, 32], strides = [1, 1]} : vector<8x128xf32> to vector<8x32xf32>
    %466 = vector.extract_strided_slice %457 {offsets = [0, 64], sizes = [8, 32], strides = [1, 1]} : vector<8x128xf32> to vector<8x32xf32>
    %467 = math.tanh %466 : vector<8x32xf32>
    %468 = arith.mulf %465, %467 : vector<8x32xf32>
    %469 = arith.addf %464, %468 : vector<8x32xf32>
    %470 = vector.extract_strided_slice %462 {offsets = [0, 96], sizes = [8, 32], strides = [1, 1]} : vector<8x128xf32> to vector<8x32xf32>
    %471 = math.tanh %469 : vector<8x32xf32>
    %472 = arith.mulf %470, %471 : vector<8x32xf32>
    %c0_136 = arith.constant 0 : index
    %c0_137 = arith.constant 0 : index
    %473 = vector.load %arg16[%c0_136, %c0_137] : memref<64x128xf32, #tpu.memory_space<vmem>>, vector<8x128xf32>
    %cst_138 = arith.constant dense<0.000000e+00> : vector<8x128xf32>
    %474 = tpu.matmul %472, %344, %cst_138 {dimension_numbers = #tpu.dot_dimension_numbers<[1], [0], [0], [1], [0, 0, 1, 1], [], []>} : vector<8x32xf32>, vector<32x128xf32>, vector<8x128xf32> -> vector<8x128xf32>
    %475 = arith.addf %473, %474 : vector<8x128xf32>
    %476 = arith.negf %475 : vector<8x128xf32>
    %477 = math.exp %476 : vector<8x128xf32>
    %cst_139 = arith.constant 1.000000e+00 : f32
    %478 = vector.broadcast %cst_139 : f32 to vector<8x128xf32>
    %479 = arith.addf %478, %477 : vector<8x128xf32>
    %480 = arith.divf %478, %479 : vector<8x128xf32>
    %481 = vector.extract_strided_slice %480 {offsets = [0, 32], sizes = [8, 32], strides = [1, 1]} : vector<8x128xf32> to vector<8x32xf32>
    %482 = arith.mulf %481, %469 : vector<8x32xf32>
    %483 = vector.extract_strided_slice %480 {offsets = [0, 0], sizes = [8, 32], strides = [1, 1]} : vector<8x128xf32> to vector<8x32xf32>
    %484 = vector.extract_strided_slice %475 {offsets = [0, 64], sizes = [8, 32], strides = [1, 1]} : vector<8x128xf32> to vector<8x32xf32>
    %485 = math.tanh %484 : vector<8x32xf32>
    %486 = arith.mulf %483, %485 : vector<8x32xf32>
    %487 = arith.addf %482, %486 : vector<8x32xf32>
    %488 = vector.extract_strided_slice %480 {offsets = [0, 96], sizes = [8, 32], strides = [1, 1]} : vector<8x128xf32> to vector<8x32xf32>
    %489 = math.tanh %487 : vector<8x32xf32>
    %490 = arith.mulf %488, %489 : vector<8x32xf32>
    %c0_140 = arith.constant 0 : index
    %c0_141 = arith.constant 0 : index
    %491 = vector.load %arg8[%c0_140, %c0_141] : memref<32x32xf32, #tpu.memory_space<vmem>>, vector<32x32xf32>
    %cst_142 = arith.constant dense<0.000000e+00> : vector<8x32xf32>
    %492 = tpu.matmul %490, %491, %cst_142 {dimension_numbers = #tpu.dot_dimension_numbers<[1], [0], [0], [1], [0, 0, 1, 1], [], []>} : vector<8x32xf32>, vector<32x32xf32>, vector<8x32xf32> -> vector<8x32xf32>
    %c0_143 = arith.constant 0 : index
    %c0_144 = arith.constant 0 : index
    %493 = vector.load %arg9[%c0_143, %c0_144] : memref<1x32xf32, #tpu.memory_space<vmem>>, vector<1x32xf32>
    %494 = vector.broadcast %493 : vector<1x32xf32> to vector<8x32xf32>
    %495 = arith.addf %492, %494 : vector<8x32xf32>
    %cst_145 = arith.constant 0.000000e+00 : f32
    %496 = vector.broadcast %cst_145 : f32 to vector<8x32xf32>
    %497 = arith.maximumf %495, %496 : vector<8x32xf32>
    %c0_146 = arith.constant 0 : index
    %c0_147 = arith.constant 0 : index
    %498 = vector.load %arg10[%c0_146, %c0_147] : memref<32x4xf32, #tpu.memory_space<vmem>>, vector<32x4xf32>
    %cst_148 = arith.constant dense<0.000000e+00> : vector<8x4xf32>
    %499 = tpu.matmul %497, %498, %cst_148 {dimension_numbers = #tpu.dot_dimension_numbers<[1], [0], [0], [1], [0, 0, 1, 1], [], []>} : vector<8x32xf32>, vector<32x4xf32>, vector<8x4xf32> -> vector<8x4xf32>
    %c0_149 = arith.constant 0 : index
    %c0_150 = arith.constant 0 : index
    %500 = vector.load %arg11[%c0_149, %c0_150] : memref<1x4xf32, #tpu.memory_space<vmem>>, vector<1x4xf32>
    %501 = vector.broadcast %500 : vector<1x4xf32> to vector<8x4xf32>
    %502 = arith.addf %499, %501 : vector<8x4xf32>
    %cst_151 = arith.constant 0.000000e+00 : f32
    %503 = vector.broadcast %cst_151 : f32 to vector<8x4xf32>
    %504 = arith.maximumf %502, %503 : vector<8x4xf32>
    %c0_152 = arith.constant 0 : index
    %c0_153 = arith.constant 0 : index
    %505 = vector.load %arg12[%c0_152, %c0_153] : memref<4x3xf32, #tpu.memory_space<vmem>>, vector<4x3xf32>
    %cst_154 = arith.constant dense<0.000000e+00> : vector<8x3xf32>
    %506 = tpu.matmul %504, %505, %cst_154 {dimension_numbers = #tpu.dot_dimension_numbers<[1], [0], [0], [1], [0, 0, 1, 1], [], []>} : vector<8x4xf32>, vector<4x3xf32>, vector<8x3xf32> -> vector<8x3xf32>
    %c0_155 = arith.constant 0 : index
    %c0_156 = arith.constant 0 : index
    %507 = vector.load %arg13[%c0_155, %c0_156] : memref<1x3xf32, #tpu.memory_space<vmem>>, vector<1x3xf32>
    %508 = vector.broadcast %507 : vector<1x3xf32> to vector<8x3xf32>
    %509 = arith.addf %506, %508 : vector<8x3xf32>
    %c0_157 = arith.constant 0 : index
    %c0_158 = arith.constant 0 : index
    %510 = vector.load %arg14[%c0_157, %c0_158] : memref<8x3xf32, #tpu.memory_space<vmem>>, vector<8x3xf32>
    tpu.vector_store %arg14[%c0_157, %c0_158], %509 {strides = array<i32>} : memref<8x3xf32, #tpu.memory_space<vmem>>, vector<8x3xf32>,
    return
  }
}

</mosaic_0001>

<bundles_post_ra>
// kernel: sentiment_forward.1
= control target key start
LH: loop header
LB: loop body
LE: loop exit
PB: predicated region body
PF: predicated region fallthrough
CT: control target
= control target key end

     0   :  { %19 = vsyncpa [#allocation6], 0  ;;  %s3295_s0 = inlined_call_operand.vmem [shape: s32[64,1], index: 0, kind: input, shape index: {}]   ;;  %s3296_s1 = inlined_call_operand.vmem [shape: f32[56,32], index: 1, kind: input, shape index: {}]   ;;  %s3297_s2 = inlined_call_operand.hbm [shape: f32[32,256], index: 2, kind: input, shape index: {}]   ;;  %s3298_s3 = inlined_call_operand.vmem [shape: f32[64,256], index: 3, kind: input, shape index: {}]   ;;  %s3299_s4 = inlined_call_operand.vmem [shape: f32[1,256], index: 4, kind: input, shape index: {}]   ;;  %s3300_s5 = inlined_call_operand.hbm [shape: f32[64,128], index: 5, kind: input, shape index: {}]   ;;  %s3301_s6 = inlined_call_operand.vmem [shape: f32[32,128], index: 6, kind: input, shape index: {}]   ;;  %s3302_s7 = inlined_call_operand.vmem [shape: f32[1,128], index: 7, kind: input, shape index: {}]   ;;  %s3303_s8 = inlined_call_operand.hbm [shape: f32[32,32], index: 8, kind: input, shape index: {}]   ;;  %s3304_s9 = inlined_call_operand.vmem [shape: f32[1,32], index: 9, kind: input, shape index: {}]   ;;  %s3305_s10 = inlined_call_operand.vmem [shape: f32[32,4], index: 10, kind: input, shape index: {}]   ;;  %s3306_s11 = inlined_call_operand.vmem [shape: f32[1,4], index: 11, kind: input, shape index: {}]   ;;  %s3307_s12 = inlined_call_operand.vmem [shape: f32[4,3], index: 12, kind: input, shape index: {}]   ;;  %s3308_s13 = inlined_call_operand.vmem [shape: f32[1,3], index: 13, kind: input, shape index: {}]   ;;  %s3309_s14 = inlined_call_operand.vmem [shape: f32[8,3], index: 14, kind: output, shape index: {}]  }
   0x1   :  { %20 = vsyncpa [#allocation8], 0  ;;  %s46_s15 = sshll.u32 %s3300_s5, 4  ;;  %s2531_s16 = smov [#allocation7]   ;;  %s47_s15 = int_to_ptr.hbm [resolvable:$true] %s46_s15 }
   0x2   :  { %s48_s17 = sshll.u32 %s2531_s16, 4  ;;  %s29_s20 = sshll.u32 %s3297_s2, 4  ;;  %s49_s17 = int_to_ptr.vmem [resolvable:$true] %s48_s17  ;;  %s30_s20 = int_to_ptr.hbm [resolvable:$true] %s29_s20 }
   0x3   :  { %s2532_s21 = smov 128   ;;  %s2533_s22 = smov 8  }
   0x4   :  { %54 = dma.hbm_to_vmem [thread:$0]  %s47_s15, 1024, %s49_s17, [#allocation8], %s2532_s21, %s2532_s21, %s2533_s22  }
   0x5   :  { %s2534_s23 = smov [#allocation5]   ;;  %s2535_s25 = smov 256  }
   0x6   :  { %s31_s24 = sshll.u32 %s2534_s23, 4  ;;  %s2536_s26 = smov 16   ;;  %s32_s24 = int_to_ptr.vmem [resolvable:$true] %s31_s24 }
   0x7   :  { %37 = dma.hbm_to_vmem [thread:$0]  %s30_s20, 1024, %s32_s24, [#allocation6], %s2535_s25, %s2535_s25, %s2536_s26  }
   0x8   :  { %s63_s28 = sshll.u32 %s3303_s8, 4  ;;  %s2537_s29 = smov [#allocation9]   ;;  %s64_s28 = int_to_ptr.hbm [resolvable:$true] %s63_s28 }
   0x9   :  { %s65_s30 = sshll.u32 %s2537_s29, 4  ;;  %s66_s30 = int_to_ptr.vmem [resolvable:$true] %s65_s30 }
   0xa   :  { %71 = dma.hbm_to_vmem [thread:$0]  %s64_s28, 512, %s66_s30, [#allocation8], %s2532_s21, %s2532_s21, %s2533_s22  }
   0xb   :  { %2527 = dma.done.wait [#allocation6], 1024  }
   0xc   :  { %2528 = vsyncadd [#allocation6], 4294966272 }
   0xd   :  { %2529 = dma.done.wait [#allocation8], 1536  }
   0xe   :  { %2530 = vsyncadd [#allocation8], 4294965760  ;;  %v2538_v0 = vmov 0   ;;  %v96_v1 = vld [vmem:[%s3295_s0 + $0x10] sm:$0xff]  ;;  %v94_v2 = vld [vmem:[%s3295_s0] sm:$0xff]  ;;  %v102_v16 = vlaneseq  ;;  %vm159_vm0 = vcmask 457728  }
   0xf   :  { %2257 = vset.pattern.permute.xlu1 %v2538_v0  ;;  %2256 = vset.pattern.permute.xlu0 %v2538_v0  ;;  %v98_v3 = vld [vmem:[%s3295_s0 + $0x20] sm:$0xff]  ;;  %v158_v4 = vld [vmem:[%s3296_s1 + $0x30] sm:$0xff]  ;;  %v157_v5 = vld [vmem:[%s3296_s1 + $0x28] sm:$0xff]  ;;  %v2539_v19 = vmov 0.0   ;;  %vm239_vm9 = vcmask 261120   ;;  %s2541_s16 = smov 32  }
  0x10   :  { %2258 = vset.pattern.permute.xlu2 %v2538_v0  ;;  %111 = vperm.xlu1 %2257, %v96_v1   ;;  %v156_v6 = vld [vmem:[%s3296_s1 + $0x20] sm:$0xff]  ;;  %v97_v7 = vld [vmem:[%s3295_s0 + $0x18] sm:$0xff]  ;;  %v95_v8 = vld [vmem:[%s3295_s0 + $0x8] sm:$0xff]  ;;  %v103_v17 = vand.u32 127, %v102_v16 }
  0x11   :  { %105 = vperm.xlu0 %2256, %v94_v2   ;;  %117 = vperm.xlu2 %2258, %v98_v3   ;;  %v155_v9 = vld [vmem:[%s3296_s1 + $0x18] sm:$0xff]  ;;  %v99_v10 = vld [vmem:[%s3295_s0 + $0x28] sm:$0xff]  ;;  %v154_v11 = vld [vmem:[%s3296_s1 + $0x10] sm:$0xff] }
  0x12   :  { %193 = vmatpush.msra.mxu0 %v158_v4  ;;  %v153_v12 = vld [vmem:[%s3296_s1 + $0x8] sm:$0xff]  ;;  %v101_v13 = vld [vmem:[%s3295_s0 + $0x38] sm:$0xff]  ;;  %v100_v14 = vld [vmem:[%s3295_s0 + $0x30] sm:$0xff] }
  0x13   :  { %v152_v15 = vld [vmem:[%s3296_s1] sm:$0xff]  ;;  %v231_v28 = vld [vmem:[#allocation5 + $0x30] sm:$0xff]  ;;  %v232_v41 = vld [vmem:[#allocation5 + $0x38] sm:$0xff] }
  0x14   :  { %194 = vmatpush.msra.mxu0 %v157_v5  ;;  %v229_v29 = vld [vmem:[#allocation5 + $0x20] sm:$0xff]  ;;  %276 = vmatpush.msra.mxu1 %v231_v28  ;;  %v227_v30 = vld [vmem:[#allocation5 + $0x10] sm:$0xff]  ;;  %v230_v42 = vld [vmem:[#allocation5 + $0x28] sm:$0xff] }
  0x15   :  { %2237 = vmatpush.msra.mxu2 %v231_v28  ;;  %2238 = vmatpush.msra.mxu3 %v231_v28  ;;  %v225_v38 = vld [vmem:[#allocation5] sm:$0xff]  ;;  %v228_v43 = vld [vmem:[#allocation5 + $0x18] sm:$0xff]  ;;  %v226_v44 = vld [vmem:[#allocation5 + $0x8] sm:$0xff] }
  0x16   :  { %195 = vmatpush.msra.mxu0 %v156_v6  ;;  %277 = vmatpush.msra.mxu1 %v229_v29  ;;  %v2702_v46 = vld [vmem:[%s3298_s3 + $0x70] sm:$0xff]  ;;  %v2707_v47 = vld [vmem:[%s3298_s3 + $0x60] sm:$0xff]  ;;  %v2797_v59 = vld [vmem:[%s3298_s3 + $0x78] sm:$0xff] }
  0x17   :  { %2239 = vmatpush.msra.mxu2 %v229_v29  ;;  %2240 = vmatpush.msra.mxu3 %v229_v29  ;;  %v2714_v48 = vld [vmem:[%s3298_s3 + $0x50] sm:$0xff]  ;;  %v2725_v49 = vld [vmem:[%s3298_s3 + $0x40] sm:$0xff]  ;;  %v2802_v60 = vld [vmem:[%s3298_s3 + $0x68] sm:$0xff] }
  0x18   :  { %114 = vperm.xlu1 %2257, %v97_v7   ;;  %196 = vmatpush.msra.mxu0 %v155_v9  ;;  %v2737_v51 = vld [vmem:[%s3298_s3 + $0x30] sm:$0xff]  ;;  %v2742_v52 = vld [vmem:[%s3298_s3 + $0x20] sm:$0xff]  ;;  %v2809_v61 = vld [vmem:[%s3298_s3 + $0x58] sm:$0xff] }
  0x19   :  { %108 = vperm.xlu0 %2256, %v95_v8   ;;  %120 = vperm.xlu2 %2258, %v99_v10   ;;  %v2750_v53 = vld [vmem:[%s3298_s3 + $0x10] sm:$0xff]  ;;  %v2758_v54 = vld [vmem:[%s3298_s3] sm:$0xff]  ;;  %v2821_v62 = vld [vmem:[%s3298_s3 + $0x48] sm:$0xff] }
  0x1a   :  { %197 = vmatpush.msra.mxu0 %v154_v11  ;;  %278 = vmatpush.msra.mxu1 %v227_v30  ;;  %v2826_v63 = vld [vmem:[%s3298_s3 + $0x38] sm:$0xff]  ;;  %v2833_v0 = vld [vmem:[%s3298_s3 + $0x28] sm:$0xff]  ;;  %v233_v6 = vld [vmem:[%s3299_s4] sm:$0x3]  ;;  %s2540_s4 = smov 64  }
  0x1b   :  { %2241 = vmatpush.msra.mxu2 %v227_v30  ;;  %2242 = vmatpush.msra.mxu3 %v227_v30  ;;  %v2840_v1 = vld [vmem:[%s3298_s3 + $0x18] sm:$0xff]  ;;  %v2851_v2 = vld [vmem:[%s3298_s3 + $0x8] sm:$0xff]  ;;  %v2892_v7 = vperm.slane %v233_v6, 0 }
  0x1c   :  { %198 = vmatpush.msra.mxu0 %v153_v12  ;;  %279 = vmatpush.msra.mxu1 %v225_v38  ;;  %v236_v12 = vperm.slane %v233_v6, 1 }
  0x1d   :  { %2243 = vmatpush.msra.mxu2 %v225_v38  ;;  %2244 = vmatpush.msra.mxu3 %v225_v38 }
  0x1e   :  { %199 = vmatpush.msra.mxu0 %v152_v15  ;;  %655 = vmatpush.msrb.mxu1 %v2702_v46 }
  0x1f   :  { %317 = vmatpush.msrb.mxu2 %v232_v41  ;;  %390 = vmatpush.msrb.mxu3 %v2702_v46 }
  0x20   :  { %126 = vperm.xlu1 %2257, %v101_v13   ;;  %787 = vmatpush.msrb.mxu0 %v2702_v46 }
  0x21   :  { %123 = vperm.xlu0 %2256, %v100_v14   ;;  %318 = vmatpush.msrb.mxu2 %v230_v42 }
  0x22   :  { %391 = vmatpush.msrb.mxu3 %v2707_v47  ;;  %656 = vmatpush.msrb.mxu1 %v2707_v47 }
  0x23   :  { %319 = vmatpush.msrb.mxu2 %v228_v43  ;;  %788 = vmatpush.msrb.mxu0 %v2707_v47 }
  0x24   :  { %392 = vmatpush.msrb.mxu3 %v2714_v48  ;;  %657 = vmatpush.msrb.mxu1 %v2714_v48 }
  0x25   :  { %320 = vmatpush.msrb.mxu2 %v226_v44  ;;  %789 = vmatpush.msrb.mxu0 %v2714_v48 }
  0x26   :  { %393 = vmatpush.msrb.mxu3 %v2725_v49  ;;  %658 = vmatpush.msrb.mxu1 %v2725_v49 }
  0x27   :  { %790 = vmatpush.msrb.mxu0 %v2725_v49 }
  0x28   :  { %394 = vmatpush.msrb.mxu3 %v2737_v51  ;;  %659 = vmatpush.msrb.mxu1 %v2737_v51 }
  0x29   :  { %791 = vmatpush.msrb.mxu0 %v2737_v51 }
  0x2a   :  { %395 = vmatpush.msrb.mxu3 %v2742_v52  ;;  %660 = vmatpush.msrb.mxu1 %v2742_v52 }
  0x2b   :  { %792 = vmatpush.msrb.mxu0 %v2742_v52 }
  0x2c   :  { %396 = vmatpush.msrb.mxu3 %v2750_v53  ;;  %661 = vmatpush.msrb.mxu1 %v2750_v53 }
  0x2d   :  { %793 = vmatpush.msrb.mxu0 %v2750_v53 }
  0x2e   :  { %397 = vmatpush.msrb.mxu3 %v2758_v54  ;;  %662 = vmatpush.msrb.mxu1 %v2758_v54 }
  0x2f   :  { %794 = vmatpush.msrb.mxu0 %v2758_v54 }
  0x6b   :  { %v118_v27 = vpop.permute.xlu2 %117 }
  0x6c   :  { %vm132_vm5 = vcmp.eq.s32.totalorder %v103_v17, %v118_v27 }
  0x6d   :  { %v2152_v31 = vsel %vm132_vm5, 1.0, %v2539_v19 }
  0x73   :  { %v121_v32 = vpop.permute.xlu2 %120 }
  0x74   :  { %vm133_vm6 = vcmp.eq.s32.totalorder %v103_v17, %v121_v32 }
  0x75   :  { %v2153_v33 = vsel %vm133_vm6, 1.0, %v2539_v19 }
  0x82   :  { %v112_v23 = vpop.permute.xlu1 %111 }
  0x83   :  { %v106_v18 = vpop.permute.xlu0 %105  ;;  %vm130_vm3 = vcmp.eq.s32.totalorder %v103_v17, %v112_v23 }
  0x84   :  { %vm128_vm1 = vcmp.eq.s32.totalorder %v103_v17, %v106_v18  ;;  %v2150_v24 = vsel %vm130_vm3, 1.0, %v2539_v19  ;;  %vm378_vm3 = vcmask 523264  }
  0x85   :  { %v2148_v20 = vsel %vm128_vm1, 1.0, %v2539_v19 }
  0x86   :  { %2156 = vmatmul.msk.f32.vlgmr.msra.gmra.mxu0 %vm159_vm0, %v2148_v20 }
  0x87   :  { %1051 = vmatpush.msra.mxu0 %v2702_v46 }
  0x89   :  { %1052 = vmatpush.msra.mxu0 %v2707_v47 }
  0x8a   :  { %v115_v25 = vpop.permute.xlu1 %114 }
  0x8b   :  { %v109_v21 = vpop.permute.xlu0 %108  ;;  %vm131_vm4 = vcmp.eq.s32.totalorder %v103_v17, %v115_v25  ;;  %1053 = vmatpush.msra.mxu0 %v2714_v48 }
  0x8c   :  { %vm129_vm2 = vcmp.eq.s32.totalorder %v103_v17, %v109_v21  ;;  %v2151_v26 = vsel %vm131_vm4, 1.0, %v2539_v19 }
  0x8d   :  { %v2149_v22 = vsel %vm129_vm2, 1.0, %v2539_v19  ;;  %1054 = vmatpush.msra.mxu0 %v2725_v49  ;;  %vm510_vm2 = vcmask 523520  }
  0x8e   :  { %2157 = vmatmul.msk.f32.gmra.mxu0 %vm159_vm0, %v2149_v22 }
  0x8f   :  { %1055 = vmatpush.msra.mxu0 %v2737_v51 }
  0x91   :  { %1056 = vmatpush.msra.mxu0 %v2742_v52 }
  0x92   :  { %v127_v36 = vpop.permute.xlu1 %126 }
  0x93   :  { %v124_v34 = vpop.permute.xlu0 %123  ;;  %vm135_vm8 = vcmp.eq.s32.totalorder %v103_v17, %v127_v36  ;;  %1057 = vmatpush.msra.mxu0 %v2750_v53 }
  0x94   :  { %vm134_vm7 = vcmp.eq.s32.totalorder %v103_v17, %v124_v34  ;;  %v2155_v37 = vsel %vm135_vm8, 1.0, %v2539_v19 }
  0x95   :  { %v2154_v35 = vsel %vm134_vm7, 1.0, %v2539_v19  ;;  %1058 = vmatpush.msra.mxu0 %v2758_v54 }
  0x96   :  { %2158 = vmatmul.msk.f32.gmra.mxu0 %vm159_vm0, %v2150_v24 }
  0x9e   :  { %2159 = vmatmul.msk.f32.gmra.mxu0 %vm159_vm0, %v2151_v26 }
  0xa6   :  { %2160 = vmatmul.msk.f32.gmra.mxu0 %vm159_vm0, %v2152_v31 }
  0xae   :  { %2161 = vmatmul.msk.f32.gmra.mxu0 %vm159_vm0, %v2153_v33 }
  0xb6   :  { %2162 = vmatmul.msk.f32.gmra.mxu0 %vm159_vm0, %v2154_v35 }
  0xbe   :  { %2163 = vmatmul.msk.f32.gmra.mxu0 %vm159_vm0, %v2155_v37 }
 0x103   :  { %v2687_v39 = vpop.f32.mrf.mxu0 }
 0x104   :  { %2164 = vmatmul.msk.f32.vlgmr.msra.gmra.mxu1 %vm239_vm9, %v2687_v39 }
 0x105   :  { %919 = vmatpush.msra.mxu1 %v2702_v46 }
 0x107   :  { %920 = vmatpush.msra.mxu1 %v2707_v47 }
 0x109   :  { %921 = vmatpush.msra.mxu1 %v2714_v48 }
 0x10b   :  { %v2691_v40 = vpop.f32.mrf.mxu0  ;;  %922 = vmatpush.msra.mxu1 %v2725_v49 }
 0x10c   :  { %2165 = vmatmul.msk.f32.gmra.mxu1 %vm239_vm9, %v2691_v40 }
 0x10d   :  { %923 = vmatpush.msra.mxu1 %v2737_v51 }
 0x10f   :  { %924 = vmatpush.msra.mxu1 %v2742_v52 }
 0x111   :  { %925 = vmatpush.msra.mxu1 %v2750_v53 }
 0x113   :  { %v2695_v45 = vpop.f32.mrf.mxu0  ;;  %926 = vmatpush.msra.mxu1 %v2758_v54 }
 0x114   :  { %2166 = vmatmul.msk.f32.gmra.mxu1 %vm239_vm9, %v2695_v45 }
 0x11b   :  { %v2728_v50 = vpop.f32.mrf.mxu0 }
 0x11c   :  { %2167 = vmatmul.msk.f32.gmra.mxu1 %vm239_vm9, %v2728_v50 }
 0x123   :  { %v2764_v55 = vpop.f32.mrf.mxu0 }
 0x124   :  { %2168 = vmatmul.msk.f32.gmra.mxu1 %vm239_vm9, %v2764_v55 }
 0x12b   :  { %v216_v56 = vpop.f32.mrf.mxu0 }
 0x12c   :  { %2169 = vmatmul.msk.f32.vlgmr.msra.gmra.mxu2 %vm239_vm9, %v216_v56 }
 0x12d   :  { %675 = vmatpush.msra.mxu2 %v2797_v59 }
 0x12f   :  { %676 = vmatpush.msra.mxu2 %v2802_v60 }
 0x131   :  { %677 = vmatpush.msra.mxu2 %v2809_v61 }
 0x133   :  { %v219_v57 = vpop.f32.mrf.mxu0  ;;  %678 = vmatpush.msra.mxu2 %v2821_v62 }
 0x134   :  { %2170 = vmatmul.msk.f32.vlgmr.msra.gmra.mxu3 %vm239_vm9, %v219_v57  ;;  %2172 = vmatmul.msk.f32.vlgmr.msrb.gmra.mxu2 %vm239_vm9, %v2687_v39 }
 0x135   :  { %410 = vmatpush.msra.mxu3 %v2797_v59  ;;  %679 = vmatpush.msra.mxu2 %v2826_v63 }
 0x137   :  { %411 = vmatpush.msra.mxu3 %v2802_v60  ;;  %680 = vmatpush.msra.mxu2 %v2833_v0 }
 0x139   :  { %412 = vmatpush.msra.mxu3 %v2809_v61  ;;  %681 = vmatpush.msra.mxu2 %v2840_v1 }
 0x13b   :  { %v222_v58 = vpop.f32.mrf.mxu0  ;;  %413 = vmatpush.msra.mxu3 %v2821_v62  ;;  %682 = vmatpush.msra.mxu2 %v2851_v2 }
 0x13c   :  { %2171 = vmatmul.msk.f32.gmra.mxu3 %vm239_vm9, %v222_v58  ;;  %2173 = vmatmul.msk.f32.gmra.mxu2 %vm239_vm9, %v2691_v40 }
 0x13d   :  { %414 = vmatpush.msra.mxu3 %v2826_v63  ;;  %939 = vmatpush.msrb.mxu2 %v2797_v59 }
 0x13f   :  { %415 = vmatpush.msra.mxu3 %v2833_v0  ;;  %940 = vmatpush.msrb.mxu2 %v2802_v60 }
 0x141   :  { %416 = vmatpush.msra.mxu3 %v2840_v1  ;;  %941 = vmatpush.msrb.mxu2 %v2809_v61 }
 0x143   :  { %417 = vmatpush.msra.mxu3 %v2851_v2  ;;  %942 = vmatpush.msrb.mxu2 %v2821_v62 }
 0x144   :  { %2174 = vmatmul.msk.f32.gmra.mxu2 %vm239_vm9, %v2695_v45  ;;  %398 = vmatmul.f32.vlgmr.msrb.gmra.mxu3 %v2539_v19 }
 0x145   :  { %523 = vmatpush.msrb.mxu3 %v2702_v46  ;;  %943 = vmatpush.msrb.mxu2 %v2826_v63 }
 0x147   :  { %524 = vmatpush.msrb.mxu3 %v2707_v47  ;;  %944 = vmatpush.msrb.mxu2 %v2833_v0 }
 0x149   :  { %525 = vmatpush.msrb.mxu3 %v2714_v48  ;;  %945 = vmatpush.msrb.mxu2 %v2840_v1 }
 0x14b   :  { %526 = vmatpush.msrb.mxu3 %v2725_v49  ;;  %946 = vmatpush.msrb.mxu2 %v2851_v2 }
 0x14c   :  { %2175 = vmatmul.msk.f32.gmra.mxu2 %vm239_vm9, %v2728_v50  ;;  %418 = vmatmul.f32.vlgmr.msra.gmra.mxu3 %v2539_v19 }
 0x14d   :  { %527 = vmatpush.msrb.mxu3 %v2737_v51 }
 0x14f   :  { %528 = vmatpush.msrb.mxu3 %v2742_v52 }
 0x151   :  { %529 = vmatpush.msrb.mxu3 %v2750_v53 }
 0x153   :  { %530 = vmatpush.msrb.mxu3 %v2758_v54 }
 0x154   :  { %2176 = vmatmul.msk.f32.gmra.mxu2 %vm239_vm9, %v2764_v55 }
 0x155   :  { %543 = vmatpush.msra.mxu3 %v2797_v59 }
 0x157   :  { %544 = vmatpush.msra.mxu3 %v2802_v60 }
 0x159   :  { %545 = vmatpush.msra.mxu3 %v2809_v61 }
 0x15b   :  { %546 = vmatpush.msra.mxu3 %v2821_v62 }
 0x15c   :  { %2177 = vmatmul.msk.f32.gmra.mxu2 %vm239_vm9, %v216_v56 }
 0x15d   :  { %547 = vmatpush.msra.mxu3 %v2826_v63 }
 0x15f   :  { %548 = vmatpush.msra.mxu3 %v2833_v0 }
 0x161   :  { %549 = vmatpush.msra.mxu3 %v2840_v1 }
 0x163   :  { %550 = vmatpush.msra.mxu3 %v2851_v2 }
 0x164   :  { %2178 = vmatmul.msk.f32.gmra.mxu2 %vm239_vm9, %v219_v57 }
 0x16c   :  { %2179 = vmatmul.msk.f32.gmra.mxu2 %vm239_vm9, %v222_v58 }
 0x181   :  { %v281_v3 = vpop.f32.mrf.mxu1 }
 0x182   :  { %v282_v22 = vadd.f32 %v281_v3, %v2892_v7 }
 0x189   :  { %v2885_v4 = vpop.f32.mrf.mxu1 }
 0x191   :  { %v2887_v5 = vpop.f32.mrf.mxu1 }
 0x199   :  { %v290_v8 = vpop.f32.mrf.mxu1 }
 0x19a   :  { %v2895_v9 = vadd.f32 %v290_v8, %v2892_v7 }
 0x1af   :  { %v296_v10 = vpop.f32.mrf.mxu2 }
 0x1b0   :  { %v2898_v11 = vadd.f32 %v296_v10, %v2892_v7 }
 0x1b7   :  { %v299_v13 = vpop.f32.mrf.mxu3  ;;  %v322_v14 = vpop.f32.mrf.mxu2 }
 0x1b8   :  { %v2901_v15 = vadd.f32 %v299_v13, %v2892_v7  ;;  %v2903_v16 = vadd.f32 %v322_v14, %v236_v12 }
 0x1bf   :  { %v302_v17 = vpop.f32.mrf.mxu3  ;;  %v325_v18 = vpop.f32.mrf.mxu2 }
 0x1c0   :  { %v2906_v20 = vadd.f32 %v302_v17, %v2892_v7  ;;  %v2908_v21 = vadd.f32 %v325_v18, %v236_v12 }
 0x1c7   :  { %v328_v23 = vpop.f32.mrf.mxu2  ;;  %v399_v24 = vpop.f32.mrf.mxu3 }
 0x1c8   :  { %v2911_v25 = vadd.f32 %v328_v23, %v236_v12  ;;  %v423_v26 = vadd.f32 %v399_v24, %v282_v22 }
 0x1ca   :  { %2263 = vtanh.f32 %v423_v26  ;;  %v2180_v41 = vmul.f32 -1.442695, %v423_v26 }
 0x1cf   :  { %v331_v27 = vpop.f32.mrf.mxu2  ;;  %v419_v37 = vpop.f32.mrf.mxu3 }
 0x1d0   :  { %v2264_v28 = vpop.eup %2263  ;;  %v2913_v29 = vadd.f32 %v331_v27, %v236_v12 }
 0x1d1   :  { %467 = vrot.lane.b32.xlu2 %v2264_v28, %s2540_s4 }
 0x1d7   :  { %v334_v30 = vpop.f32.mrf.mxu2 }
 0x1d8   :  { %v2916_v31 = vadd.f32 %v334_v30, %v236_v12 }
 0x1df   :  { %v337_v32 = vpop.f32.mrf.mxu2 }
 0x1e0   :  { %v2918_v33 = vadd.f32 %v337_v32, %v236_v12 }
 0x1e7   :  { %v340_v34 = vpop.f32.mrf.mxu2 }
 0x1e8   :  { %v2920_v35 = vadd.f32 %v340_v34, %v236_v12 }
 0x1ef   :  { %v343_v36 = vpop.f32.mrf.mxu2 }
 0x1f0   :  { %v344_v38 = vadd.f32 %v343_v36, %v236_v12 }
 0x1f2   :  { %v425_v39 = vadd.f32 %v419_v37, %v344_v38 }
 0x1f4   :  { %2265 = vtanh.f32 %v425_v39  ;;  %v2181_v13 = vmul.f32 -1.442695, %v425_v39 }
 0x1f5   :  { %2267 = vpow2.f32 %v2180_v41 }
 0x1fa   :  { %v2266_v40 = vpop.eup %2265 }
 0x1fb   :  { %479 = vrot.lane.b32.xlu0 %v2266_v40, %s2540_s4  ;;  %v2268_v42 = vpop.eup %2267 }
 0x1fc   :  { %v429_v43 = vadd.f32 1.0, %v2268_v42 }
 0x1fe   :  { %2269 = vrcp.f32 %v429_v43  ;;  %v441_v57 = vand.u32 2147483648, %v429_v43  ;;  %vm435_vm11 = vweird.f32 %v429_v43  ;;  %v439_v58 = vand.u32 2147483647, %v429_v43 }
 0x1ff   :  { %2271 = vpow2.f32 %v2181_v13 }
 0x200   :  { %v442_v6 = vor.u32 1.1754944e-38, %v441_v57  ;;  %vm440_vm13 = vcmp.eq.f32.partialorder %v439_v58, 8.507059e+37 }
 0x204   :  { %v2270_v44 = vpop.eup %2269 }
 0x205   :  { %v431_v45 = vmul.f32 %v2270_v44, %v429_v43  ;;  %vm436_vm10 = vweird.f32 %v2270_v44  ;;  %v2272_v14 = vpop.eup %2271 }
 0x206   :  { %vm437_vm12 = vmor %vm435_vm11, %vm436_vm10  ;;  %v448_v17 = vadd.f32 1.0, %v2272_v14 }
 0x207   :  { %v432_v50 = vsub.f32 1.0, %v431_v45 }
 0x208   :  { %2273 = vrcp.f32 %v448_v17  ;;  %v460_v27 = vand.u32 2147483648, %v448_v17  ;;  %vm454_vm15 = vweird.f32 %v448_v17  ;;  %v458_v28 = vand.u32 2147483647, %v448_v17 }
 0x209   :  { %v433_v55 = vmul.f32 %v2270_v44, %v432_v50 }
 0x20a   :  { %v461_v32 = vor.u32 1.1754944e-38, %v460_v27  ;;  %vm459_vm1 = vcmp.eq.f32.partialorder %v458_v28, 8.507059e+37 }
 0x20b   :  { %v434_v56 = vadd.f32 %v2270_v44, %v433_v55 }
 0x20d   :  { %v438_v3 = vsel %vm437_vm12, %v2270_v44, %v434_v56 }
 0x20e   :  { %v443_v10 = vsel %vm440_vm13, %v442_v6, %v438_v3  ;;  %v2274_v18 = vpop.eup %2273 }
 0x20f   :  { %v450_v22 = vmul.f32 %v2274_v18, %v448_v17  ;;  %vm455_vm14 = vweird.f32 %v2274_v18  ;;  %v464_v38 = vmul.f32 0.0, %v443_v10 }
 0x210   :  { %vm456_vm0 = vmor %vm454_vm15, %vm455_vm14 }
 0x211   :  { %v451_v23 = vsub.f32 1.0, %v450_v22 }
 0x213   :  { %v452_v24 = vmul.f32 %v2274_v18, %v451_v23 }
 0x215   :  { %v453_v26 = vadd.f32 %v2274_v18, %v452_v24 }
 0x217   :  { %v457_v30 = vsel %vm456_vm0, %v2274_v18, %v453_v26 }
 0x218   :  { %v462_v36 = vsel %vm459_vm1, %v461_v32, %v457_v30 }
 0x219   :  { %v476_v42 = vmul.f32 0.0, %v462_v36 }
 0x22b   :  { %v468_v8 = vpop.permute.xlu2 %467 }
 0x22c   :  { %v470_v12 = vmul.f32 %v468_v8, %v443_v10  ;;  %v285_v8 = vadd.f32 %v2885_v4, %v2892_v7 }
 0x22e   :  { %472 = vrot.lane.b32.xlu1 %v470_v12, %s2541_s16 }
 0x26d   :  { %v480_v34 = vpop.permute.xlu0 %479 }
 0x26e   :  { %v482_v37 = vmul.f32 %v480_v34, %v462_v36 }
 0x270   :  { %484 = vrot.lane.b32.xlu2 %v482_v37, %s2541_s16 }
 0x2a0   :  { %v473_v39 = vpop.permute.xlu1 %472 }
 0x2a1   :  { %v2925_v40 = vadd.f32 %v473_v39, %v464_v38 }
 0x2a3   :  { %2275 = vtanh.f32 %v2925_v40 }
 0x2a9   :  { %v2276_v41 = vpop.eup %2275 }
 0x2aa   :  { %490 = vrot.lane.b32.xlu0 %v2276_v41, %s2540_s4 }
 0x2ca   :  { %v485_v43 = vpop.permute.xlu2 %484 }
 0x2cb   :  { %v2929_v44 = vadd.f32 %v485_v43, %v476_v42 }
 0x2cd   :  { %2277 = vtanh.f32 %v2929_v44 }
 0x2d3   :  { %v2278_v45 = vpop.eup %2277 }
 0x2d4   :  { %496 = vrot.lane.b32.xlu1 %v2278_v45, %s2540_s4 }
 0x31c   :  { %v491_v50 = vpop.permute.xlu0 %490 }
 0x31d   :  { %v493_v55 = vmul.f32 %v491_v50, %v443_v10 }
 0x31f   :  { %501 = vrot.lane.b32.xlu2 %v493_v55, %s2541_s16 }
 0x346   :  { %v497_v56 = vpop.permute.xlu1 %496 }
 0x347   :  { %v499_v57 = vmul.f32 %v497_v56, %v462_v36 }
 0x349   :  { %505 = vrot.lane.b32.xlu0 %v499_v57, %s2540_s4 }
 0x379   :  { %v502_v58 = vpop.permute.xlu2 %501 }
 0x37a   :  { %509 = vst.msk [vmem:[#allocation4] sm:$0xff] %vm239_vm9, %v502_v58 }
 0x3bb   :  { %v506_v3 = vpop.permute.xlu0 %505 }
 0x3bc   :  { %v508_v6 = vsel %vm239_vm9, %v502_v58, %v506_v3  ;;  %511 = vst.msk [vmem:[#allocation4 + $0x38] sm:$0xff] %vm510_vm2, %v506_v3 }
 0x3bd   :  { %2182 = vmatmul.msk.f32.vlgmr.msrb.gmra.mxu3 %vm378_vm3, %v508_v6 }
 0x3be   :  { %807 = vmatpush.msrb.mxu3 %v2797_v59 }
 0x3c0   :  { %808 = vmatpush.msrb.mxu3 %v2802_v60 }
 0x3c2   :  { %809 = vmatpush.msrb.mxu3 %v2809_v61 }
 0x3c4   :  { %810 = vmatpush.msrb.mxu3 %v2821_v62 }
 0x3c5   :  { %2183 = vmatmul.msk.f32.vlgmr.msra.gmra.mxu3 %vm378_vm3, %v508_v6 }
 0x3c6   :  { %811 = vmatpush.msrb.mxu3 %v2826_v63 }
 0x3c8   :  { %812 = vmatpush.msrb.mxu3 %v2833_v0 }
 0x3ca   :  { %813 = vmatpush.msrb.mxu3 %v2840_v1 }
 0x3cc   :  { %814 = vmatpush.msrb.mxu3 %v2851_v2 }
 0x3ce   :  { %1071 = vmatpush.msra.mxu3 %v2797_v59 }
 0x3d0   :  { %1072 = vmatpush.msra.mxu3 %v2802_v60 }
 0x3d2   :  { %1073 = vmatpush.msra.mxu3 %v2809_v61 }
 0x3d4   :  { %1074 = vmatpush.msra.mxu3 %v2821_v62 }
 0x3d6   :  { %1075 = vmatpush.msra.mxu3 %v2826_v63 }
 0x3d8   :  { %1076 = vmatpush.msra.mxu3 %v2833_v0 }
 0x3da   :  { %1077 = vmatpush.msra.mxu3 %v2840_v1 }
 0x3dc   :  { %1078 = vmatpush.msra.mxu3 %v2851_v2 }
 0x440   :  { %v532_v10 = vpop.f32.mrf.mxu3 }
 0x441   :  { %v556_v12 = vadd.f32 %v532_v10, %v285_v8 }
 0x443   :  { %2279 = vtanh.f32 %v556_v12  ;;  %v2184_v26 = vmul.f32 -1.442695, %v556_v12 }
 0x448   :  { %v552_v13 = vpop.f32.mrf.mxu3 }
 0x449   :  { %v2280_v14 = vpop.eup %2279  ;;  %v558_v17 = vadd.f32 %v552_v13, %v2920_v35 }
 0x44a   :  { %600 = vrot.lane.b32.xlu1 %v2280_v14, %s2540_s4 }
 0x44b   :  { %2281 = vtanh.f32 %v558_v17  ;;  %v2185_v22 = vmul.f32 -1.442695, %v558_v17 }
 0x44d   :  { %2283 = vpow2.f32 %v2185_v22 }
 0x451   :  { %v2282_v18 = vpop.eup %2281 }
 0x452   :  { %612 = vrot.lane.b32.xlu2 %v2282_v18, %s2540_s4 }
 0x453   :  { %v2284_v23 = vpop.eup %2283 }
 0x454   :  { %v581_v24 = vadd.f32 1.0, %v2284_v23 }
 0x456   :  { %2285 = vrcp.f32 %v581_v24  ;;  %v593_v37 = vand.u32 2147483648, %v581_v24  ;;  %vm587_vm5 = vweird.f32 %v581_v24  ;;  %v591_v38 = vand.u32 2147483647, %v581_v24 }
 0x457   :  { %2287 = vpow2.f32 %v2184_v26 }
 0x458   :  { %v594_v42 = vor.u32 1.1754944e-38, %v593_v37  ;;  %vm592_vm7 = vcmp.eq.f32.partialorder %v591_v38, 8.507059e+37 }
 0x45c   :  { %v2286_v4 = vpop.eup %2285 }
 0x45d   :  { %v2288_v27 = vpop.eup %2287  ;;  %v583_v28 = vmul.f32 %v2286_v4, %v581_v24  ;;  %vm588_vm4 = vweird.f32 %v2286_v4 }
 0x45e   :  { %v562_v30 = vadd.f32 1.0, %v2288_v27  ;;  %vm589_vm6 = vmor %vm587_vm5, %vm588_vm4 }
 0x45f   :  { %v584_v32 = vsub.f32 1.0, %v583_v28 }
 0x460   :  { %2289 = vrcp.f32 %v562_v30  ;;  %v574_v58 = vand.u32 2147483648, %v562_v30  ;;  %vm568_vm10 = vweird.f32 %v562_v30  ;;  %v572_v3 = vand.u32 2147483647, %v562_v30 }
 0x461   :  { %v585_v35 = vmul.f32 %v2286_v4, %v584_v32 }
 0x462   :  { %v575_v8 = vor.u32 1.1754944e-38, %v574_v58  ;;  %vm573_vm12 = vcmp.eq.f32.partialorder %v572_v3, 8.507059e+37 }
 0x463   :  { %v586_v34 = vadd.f32 %v2286_v4, %v585_v35 }
 0x465   :  { %v590_v39 = vsel %vm589_vm6, %v2286_v4, %v586_v34  ;;  %v2996_v34 = vpop.f32.mrf.mxu1 }
 0x466   :  { %v2290_v36 = vpop.eup %2289  ;;  %v595_v45 = vsel %vm592_vm7, %v594_v42, %v590_v39 }
 0x467   :  { %v564_v41 = vmul.f32 %v2290_v36, %v562_v30  ;;  %vm569_vm8 = vweird.f32 %v2290_v36  ;;  %v609_v14 = vmul.f32 %v595_v45, %v2929_v44 }
 0x468   :  { %vm570_vm11 = vmor %vm568_vm10, %vm569_vm8 }
 0x469   :  { %v565_v55 = vsub.f32 1.0, %v564_v41 }
 0x46b   :  { %v566_v56 = vmul.f32 %v2290_v36, %v565_v55 }
 0x46d   :  { %v567_v57 = vadd.f32 %v2290_v36, %v566_v56 }
 0x46f   :  { %v571_v6 = vsel %vm570_vm11, %v2290_v36, %v567_v57  ;;  %v288_v36 = vadd.f32 %v2887_v5, %v2892_v7 }
 0x470   :  { %v576_v12 = vsel %vm573_vm12, %v575_v8, %v571_v6 }
 0x471   :  { %v597_v23 = vmul.f32 %v576_v12, %v2925_v40 }
 0x4ac   :  { %v613_v43 = vpop.permute.xlu2 %612 }
 0x4ad   :  { %v615_v50 = vmul.f32 %v613_v43, %v595_v45 }
 0x4af   :  { %617 = vrot.lane.b32.xlu1 %v615_v50, %s2541_s16 }
 0x4bc   :  { %v601_v10 = vpop.permute.xlu1 %600 }
 0x4bd   :  { %v603_v13 = vmul.f32 %v601_v10, %v576_v12 }
 0x4bf   :  { %605 = vrot.lane.b32.xlu0 %v603_v13, %s2541_s16 }
 0x521   :  { %v618_v17 = vpop.permute.xlu1 %617 }
 0x522   :  { %v2964_v18 = vadd.f32 %v618_v17, %v609_v14 }
 0x524   :  { %2291 = vtanh.f32 %v2964_v18 }
 0x52a   :  { %v2292_v22 = vpop.eup %2291 }
 0x52b   :  { %629 = vrot.lane.b32.xlu0 %v2292_v22, %s2540_s4 }
 0x531   :  { %v606_v24 = vpop.permute.xlu0 %605 }
 0x532   :  { %v2969_v26 = vadd.f32 %v606_v24, %v597_v23 }
 0x534   :  { %2293 = vtanh.f32 %v2969_v26 }
 0x53a   :  { %v2294_v4 = vpop.eup %2293 }
 0x53b   :  { %623 = vrot.lane.b32.xlu2 %v2294_v4, %s2540_s4 }
 0x595   :  { %v624_v27 = vpop.permute.xlu2 %623 }
 0x596   :  { %v626_v44 = vmul.f32 %v624_v27, %v576_v12 }
 0x598   :  { %634 = vrot.lane.b32.xlu1 %v626_v44, %s2541_s16 }
 0x59d   :  { %v630_v28 = vpop.permute.xlu0 %629 }
 0x59e   :  { %v632_v30 = vmul.f32 %v630_v28, %v595_v45 }
 0x5a0   :  { %638 = vrot.lane.b32.xlu2 %v632_v30, %s2540_s4 }
 0x5fa   :  { %v639_v32 = vpop.permute.xlu2 %638 }
 0x5fb   :  { %643 = vst.msk [vmem:[#allocation4 + $0x30] sm:$0xff] %vm510_vm2, %v639_v32 }
 0x60a   :  { %v635_v40 = vpop.permute.xlu1 %634 }
 0x60b   :  { %v641_v35 = vsel %vm239_vm9, %v635_v40, %v639_v32  ;;  %642 = vst.msk [vmem:[#allocation4 + $0x8] sm:$0xff] %vm239_vm9, %v635_v40 }
 0x60c   :  { %2186 = vmatmul.msk.f32.vlgmr.msrb.gmra.mxu1 %vm378_vm3, %v641_v35  ;;  %2187 = vmatmul.msk.f32.vlgmr.msra.gmra.mxu2 %vm378_vm3, %v641_v35 }
 0x60d   :  { %1183 = vmatpush.msrb.mxu1 %v2702_v46  ;;  %1203 = vmatpush.msra.mxu2 %v2797_v59 }
 0x60f   :  { %1184 = vmatpush.msrb.mxu1 %v2707_v47  ;;  %1204 = vmatpush.msra.mxu2 %v2802_v60 }
 0x611   :  { %1185 = vmatpush.msrb.mxu1 %v2714_v48  ;;  %1205 = vmatpush.msra.mxu2 %v2809_v61 }
 0x613   :  { %1186 = vmatpush.msrb.mxu1 %v2725_v49  ;;  %1206 = vmatpush.msra.mxu2 %v2821_v62 }
 0x615   :  { %1187 = vmatpush.msrb.mxu1 %v2737_v51  ;;  %1207 = vmatpush.msra.mxu2 %v2826_v63 }
 0x617   :  { %1188 = vmatpush.msrb.mxu1 %v2742_v52  ;;  %1208 = vmatpush.msra.mxu2 %v2833_v0 }
 0x619   :  { %1189 = vmatpush.msrb.mxu1 %v2750_v53  ;;  %1209 = vmatpush.msra.mxu2 %v2840_v1 }
 0x61b   :  { %1190 = vmatpush.msrb.mxu1 %v2758_v54  ;;  %1210 = vmatpush.msra.mxu2 %v2851_v2 }
 0x689   :  { %v664_v37 = vpop.f32.mrf.mxu1 }
 0x68a   :  { %v688_v38 = vadd.f32 %v664_v37, %v288_v36 }
 0x68c   :  { %2295 = vtanh.f32 %v688_v38  ;;  %v2188_v45 = vmul.f32 -1.442695, %v688_v38 }
 0x68f   :  { %v684_v39 = vpop.f32.mrf.mxu2 }
 0x690   :  { %v690_v41 = vadd.f32 %v684_v39, %v2918_v33 }
 0x692   :  { %v2296_v42 = vpop.eup %2295  ;;  %2297 = vtanh.f32 %v690_v41  ;;  %v2189_v50 = vmul.f32 -1.442695, %v690_v41 }
 0x693   :  { %732 = vrot.lane.b32.xlu0 %v2296_v42, %s2540_s4  ;;  %2299 = vpow2.f32 %v2188_v45 }
 0x694   :  { %2301 = vpow2.f32 %v2189_v50 }
 0x698   :  { %v2298_v43 = vpop.eup %2297 }
 0x699   :  { %744 = vrot.lane.b32.xlu1 %v2298_v43, %s2540_s4  ;;  %v2300_v55 = vpop.eup %2299 }
 0x69a   :  { %v694_v56 = vadd.f32 1.0, %v2300_v55  ;;  %v2302_v5 = vpop.eup %2301 }
 0x69b   :  { %v713_v57 = vadd.f32 1.0, %v2302_v5 }
 0x69c   :  { %2303 = vrcp.f32 %v694_v56  ;;  %v706_v14 = vand.u32 2147483648, %v694_v56  ;;  %vm700_vm14 = vweird.f32 %v694_v56  ;;  %v704_v17 = vand.u32 2147483647, %v694_v56 }
 0x69d   :  { %2305 = vrcp.f32 %v713_v57  ;;  %v725_v28 = vand.u32 2147483648, %v713_v57  ;;  %vm719_vm4 = vweird.f32 %v713_v57  ;;  %v723_v32 = vand.u32 2147483647, %v713_v57 }
 0x69e   :  { %v707_v24 = vor.u32 1.1754944e-38, %v706_v14  ;;  %vm705_vm0 = vcmp.eq.f32.partialorder %v704_v17, 8.507059e+37 }
 0x69f   :  { %v726_v35 = vor.u32 1.1754944e-38, %v725_v28  ;;  %vm724_vm6 = vcmp.eq.f32.partialorder %v723_v32, 8.507059e+37 }
 0x6a2   :  { %v2304_v58 = vpop.eup %2303 }
 0x6a3   :  { %v696_v3 = vmul.f32 %v2304_v58, %v694_v56  ;;  %v2306_v33 = vpop.eup %2305  ;;  %vm701_vm13 = vweird.f32 %v2304_v58 }
 0x6a4   :  { %v715_v8 = vmul.f32 %v2306_v33, %v713_v57  ;;  %vm702_vm15 = vmor %vm700_vm14, %vm701_vm13  ;;  %vm720_vm1 = vweird.f32 %v2306_v33 }
 0x6a5   :  { %v697_v6 = vsub.f32 1.0, %v696_v3  ;;  %vm721_vm5 = vmor %vm719_vm4, %vm720_vm1 }
 0x6a6   :  { %v716_v12 = vsub.f32 1.0, %v715_v8 }
 0x6a7   :  { %v698_v10 = vmul.f32 %v2304_v58, %v697_v6 }
 0x6a8   :  { %v717_v22 = vmul.f32 %v2306_v33, %v716_v12 }
 0x6a9   :  { %v699_v13 = vadd.f32 %v2304_v58, %v698_v10 }
 0x6aa   :  { %v718_v4 = vadd.f32 %v2306_v33, %v717_v22 }
 0x6ab   :  { %v703_v23 = vsel %vm702_vm15, %v2304_v58, %v699_v13 }
 0x6ac   :  { %v708_v44 = vsel %vm705_vm0, %v707_v24, %v703_v23  ;;  %v722_v40 = vsel %vm721_vm5, %v2306_v33, %v718_v4 }
 0x6ad   :  { %v727_v37 = vsel %vm724_vm6, %v726_v35, %v722_v40  ;;  %v729_v39 = vmul.f32 %v708_v44, %v2969_v26 }
 0x6ae   :  { %v741_v45 = vmul.f32 %v727_v37, %v2964_v18 }
 0x705   :  { %v733_v27 = vpop.permute.xlu0 %732 }
 0x706   :  { %v735_v30 = vmul.f32 %v733_v27, %v708_v44 }
 0x708   :  { %737 = vrot.lane.b32.xlu2 %v735_v30, %s2541_s16 }
 0x70b   :  { %v745_v36 = vpop.permute.xlu1 %744 }
 0x70c   :  { %v747_v38 = vmul.f32 %v745_v36, %v727_v37 }
 0x70e   :  { %749 = vrot.lane.b32.xlu0 %v747_v38, %s2541_s16 }
 0x762   :  { %v738_v41 = vpop.permute.xlu2 %737 }
 0x763   :  { %v3006_v42 = vadd.f32 %v738_v41, %v729_v39 }
 0x765   :  { %2307 = vtanh.f32 %v3006_v42 }
 0x76b   :  { %v2308_v43 = vpop.eup %2307 }
 0x76c   :  { %755 = vrot.lane.b32.xlu1 %v2308_v43, %s2540_s4 }
 0x780   :  { %v750_v50 = vpop.permute.xlu0 %749 }
 0x781   :  { %v3011_v55 = vadd.f32 %v750_v50, %v741_v45 }
 0x783   :  { %2309 = vtanh.f32 %v3011_v55 }
 0x789   :  { %v2310_v56 = vpop.eup %2309 }
 0x78a   :  { %761 = vrot.lane.b32.xlu2 %v2310_v56, %s2540_s4 }
 0x7de   :  { %v756_v5 = vpop.permute.xlu1 %755 }
 0x7df   :  { %v758_v26 = vmul.f32 %v756_v5, %v708_v44 }
 0x7e1   :  { %766 = vrot.lane.b32.xlu0 %v758_v26, %s2541_s16 }
 0x7e4   :  { %v762_v57 = vpop.permute.xlu2 %761 }
 0x7e5   :  { %v764_v58 = vmul.f32 %v762_v57, %v727_v37 }
 0x7e7   :  { %770 = vrot.lane.b32.xlu1 %v764_v58, %s2540_s4 }
 0x853   :  { %v767_v3 = vpop.permute.xlu0 %766 }
 0x854   :  { %774 = vst.msk [vmem:[#allocation4 + $0x10] sm:$0xff] %vm239_vm9, %v767_v3 }
 0x859   :  { %v771_v18 = vpop.permute.xlu1 %770 }
 0x85a   :  { %v773_v33 = vsel %vm239_vm9, %v767_v3, %v771_v18  ;;  %775 = vst.msk [vmem:[#allocation4 + $0x28] sm:$0xff] %vm510_vm2, %v771_v18  ;;  %v294_v3 = vadd.f32 %v2996_v34, %v2892_v7 }
 0x85b   :  { %2190 = vmatmul.msk.f32.vlgmr.msrb.gmra.mxu0 %vm378_vm3, %v773_v33  ;;  %2191 = vmatmul.msk.f32.vlgmr.msrb.gmra.mxu3 %vm378_vm3, %v773_v33 }
 0x85c   :  { %1315 = vmatpush.msrb.mxu0 %v2702_v46  ;;  %1335 = vmatpush.msrb.mxu3 %v2797_v59 }
 0x85e   :  { %1316 = vmatpush.msrb.mxu0 %v2707_v47  ;;  %1336 = vmatpush.msrb.mxu3 %v2802_v60 }
 0x860   :  { %1317 = vmatpush.msrb.mxu0 %v2714_v48  ;;  %1337 = vmatpush.msrb.mxu3 %v2809_v61 }
 0x862   :  { %1318 = vmatpush.msrb.mxu0 %v2725_v49  ;;  %1338 = vmatpush.msrb.mxu3 %v2821_v62 }
 0x864   :  { %1319 = vmatpush.msrb.mxu0 %v2737_v51  ;;  %1339 = vmatpush.msrb.mxu3 %v2826_v63 }
 0x866   :  { %1320 = vmatpush.msrb.mxu0 %v2742_v52  ;;  %1340 = vmatpush.msrb.mxu3 %v2833_v0 }
 0x868   :  { %1321 = vmatpush.msrb.mxu0 %v2750_v53  ;;  %1341 = vmatpush.msrb.mxu3 %v2840_v1 }
 0x86a   :  { %1322 = vmatpush.msrb.mxu0 %v2758_v54  ;;  %1342 = vmatpush.msrb.mxu3 %v2851_v2 }
 0x8d8   :  { %v796_v46 = vpop.f32.mrf.mxu0 }
 0x8d9   :  { %v820_v47 = vadd.f32 %v796_v46, %v2895_v9 }
 0x8db   :  { %2311 = vtanh.f32 %v820_v47  ;;  %v2192_v53 = vmul.f32 -1.442695, %v820_v47 }
 0x8de   :  { %v816_v48 = vpop.f32.mrf.mxu3 }
 0x8df   :  { %v822_v49 = vadd.f32 %v816_v48, %v2916_v31 }
 0x8e1   :  { %v2312_v51 = vpop.eup %2311  ;;  %2313 = vtanh.f32 %v822_v49  ;;  %v2193_v62 = vmul.f32 -1.442695, %v822_v49 }
 0x8e2   :  { %864 = vrot.lane.b32.xlu2 %v2312_v51, %s2540_s4  ;;  %2315 = vpow2.f32 %v2192_v53 }
 0x8e7   :  { %v2314_v52 = vpop.eup %2313 }
 0x8e8   :  { %876 = vrot.lane.b32.xlu0 %v2314_v52, %s2540_s4  ;;  %v2316_v59 = vpop.eup %2315 }
 0x8e9   :  { %v826_v54 = vadd.f32 1.0, %v2316_v59 }
 0x8eb   :  { %2317 = vrcp.f32 %v826_v54  ;;  %v838_v2 = vand.u32 2147483648, %v826_v54  ;;  %vm832_vm8 = vweird.f32 %v826_v54  ;;  %v836_v31 = vand.u32 2147483647, %v826_v54 }
 0x8ec   :  { %2319 = vpow2.f32 %v2193_v62 }
 0x8ed   :  { %v839_v10 = vor.u32 1.1754944e-38, %v838_v2  ;;  %vm837_vm11 = vcmp.eq.f32.partialorder %v836_v31, 8.507059e+37 }
 0x8f1   :  { %v2318_v60 = vpop.eup %2317 }
 0x8f2   :  { %v828_v61 = vmul.f32 %v2318_v60, %v826_v54  ;;  %vm833_vm7 = vweird.f32 %v2318_v60  ;;  %v2320_v9 = vpop.eup %2319 }
 0x8f3   :  { %vm834_vm10 = vmor %vm832_vm8, %vm833_vm7  ;;  %v845_v8 = vadd.f32 1.0, %v2320_v9 }
 0x8f4   :  { %v829_v63 = vsub.f32 1.0, %v828_v61 }
 0x8f5   :  { %2321 = vrcp.f32 %v845_v8  ;;  %v857_v27 = vand.u32 2147483648, %v845_v8  ;;  %vm851_vm13 = vweird.f32 %v845_v8  ;;  %v855_v44 = vand.u32 2147483647, %v845_v8 }
 0x8f6   :  { %v830_v0 = vmul.f32 %v2318_v60, %v829_v63 }
 0x8f7   :  { %v858_v30 = vor.u32 1.1754944e-38, %v857_v27  ;;  %vm856_vm15 = vcmp.eq.f32.partialorder %v855_v44, 8.507059e+37 }
 0x8f8   :  { %v831_v1 = vadd.f32 %v2318_v60, %v830_v0 }
 0x8fa   :  { %v835_v6 = vsel %vm834_vm10, %v2318_v60, %v831_v1 }
 0x8fb   :  { %v840_v13 = vsel %vm837_vm11, %v839_v10, %v835_v6  ;;  %v2322_v17 = vpop.eup %2321 }
 0x8fc   :  { %v847_v22 = vmul.f32 %v2322_v17, %v845_v8  ;;  %vm852_vm12 = vweird.f32 %v2322_v17  ;;  %v861_v36 = vmul.f32 %v840_v13, %v3006_v42 }
 0x8fd   :  { %vm853_vm14 = vmor %vm851_vm13, %vm852_vm12 }
 0x8fe   :  { %v848_v23 = vsub.f32 1.0, %v847_v22 }
 0x900   :  { %v849_v24 = vmul.f32 %v2322_v17, %v848_v23 }
 0x902   :  { %v850_v4 = vadd.f32 %v2322_v17, %v849_v24 }
 0x904   :  { %v854_v28 = vsel %vm853_vm14, %v2322_v17, %v850_v4 }
 0x905   :  { %v859_v40 = vsel %vm856_vm15, %v858_v30, %v854_v28 }
 0x906   :  { %v873_v39 = vmul.f32 %v859_v40, %v3011_v55 }
 0x93c   :  { %v865_v12 = vpop.permute.xlu2 %864 }
 0x93d   :  { %v867_v14 = vmul.f32 %v865_v12, %v840_v13 }
 0x93f   :  { %869 = vrot.lane.b32.xlu1 %v867_v14, %s2541_s16 }
 0x95a   :  { %v877_v32 = vpop.permute.xlu0 %876 }
 0x95b   :  { %v879_v35 = vmul.f32 %v877_v32, %v859_v40 }
 0x95d   :  { %881 = vrot.lane.b32.xlu2 %v879_v35, %s2541_s16 }
 0x9b1   :  { %v870_v37 = vpop.permute.xlu1 %869 }
 0x9b2   :  { %v3045_v38 = vadd.f32 %v870_v37, %v861_v36 }
 0x9b4   :  { %2323 = vtanh.f32 %v3045_v38 }
 0x9b7   :  { %v882_v41 = vpop.permute.xlu2 %881 }
 0x9b8   :  { %v3049_v43 = vadd.f32 %v882_v41, %v873_v39 }
 0x9ba   :  { %v2324_v45 = vpop.eup %2323  ;;  %2325 = vtanh.f32 %v3049_v43 }
 0x9bb   :  { %887 = vrot.lane.b32.xlu0 %v2324_v45, %s2540_s4 }
 0x9c0   :  { %v2326_v50 = vpop.eup %2325 }
 0x9c1   :  { %893 = vrot.lane.b32.xlu1 %v2326_v50, %s2540_s4 }
 0xa2d   :  { %v888_v56 = vpop.permute.xlu0 %887 }
 0xa2e   :  { %v890_v42 = vmul.f32 %v888_v56, %v840_v13 }
 0xa30   :  { %898 = vrot.lane.b32.xlu2 %v890_v42, %s2541_s16 }
 0xa33   :  { %v894_v5 = vpop.permute.xlu1 %893 }
 0xa34   :  { %v896_v26 = vmul.f32 %v894_v5, %v859_v40 }
 0xa36   :  { %902 = vrot.lane.b32.xlu0 %v896_v26, %s2540_s4 }
 0xa8a   :  { %v899_v55 = vpop.permute.xlu2 %898 }
 0xa8b   :  { %906 = vst.msk [vmem:[#allocation4 + $0x18] sm:$0xff] %vm239_vm9, %v899_v55 }
 0xaa8   :  { %v903_v57 = vpop.permute.xlu0 %902 }
 0xaa9   :  { %v905_v58 = vsel %vm239_vm9, %v899_v55, %v903_v57  ;;  %907 = vst.msk [vmem:[#allocation4 + $0x20] sm:$0xff] %vm510_vm2, %v903_v57 }
 0xaaa   :  { %2194 = vmatmul.msk.f32.vlgmr.msra.gmra.mxu1 %vm378_vm3, %v905_v58  ;;  %2195 = vmatmul.msk.f32.vlgmr.msrb.gmra.mxu2 %vm378_vm3, %v905_v58 }
 0xb27   :  { %v928_v18 = vpop.f32.mrf.mxu1 }
 0xb28   :  { %v952_v33 = vadd.f32 %v928_v18, %v294_v3 }
 0xb2a   :  { %2327 = vtanh.f32 %v952_v33  ;;  %v2196_v59 = vmul.f32 -1.442695, %v952_v33 }
 0xb2d   :  { %v948_v46 = vpop.f32.mrf.mxu2 }
 0xb2e   :  { %v954_v47 = vadd.f32 %v948_v46, %v2913_v29 }
 0xb30   :  { %v2328_v48 = vpop.eup %2327  ;;  %2329 = vtanh.f32 %v954_v47  ;;  %v2197_v51 = vmul.f32 -1.442695, %v954_v47 }
 0xb31   :  { %996 = vrot.lane.b32.xlu1 %v2328_v48, %s2540_s4 }
 0xb32   :  { %2331 = vpow2.f32 %v2197_v51 }
 0xb36   :  { %v2330_v49 = vpop.eup %2329 }
 0xb37   :  { %1008 = vrot.lane.b32.xlu2 %v2330_v49, %s2540_s4 }
 0xb38   :  { %v2332_v52 = vpop.eup %2331 }
 0xb39   :  { %v977_v53 = vadd.f32 1.0, %v2332_v52 }
 0xb3b   :  { %2333 = vrcp.f32 %v977_v53  ;;  %v989_v63 = vand.u32 2147483648, %v977_v53  ;;  %vm983_vm1 = vweird.f32 %v977_v53  ;;  %v987_v0 = vand.u32 2147483647, %v977_v53 }
 0xb3c   :  { %2335 = vpow2.f32 %v2196_v59 }
 0xb3d   :  { %v990_v9 = vor.u32 1.1754944e-38, %v989_v63  ;;  %vm988_vm5 = vcmp.eq.f32.partialorder %v987_v0, 8.507059e+37 }
 0xb41   :  { %v2334_v7 = vpop.eup %2333 }
 0xb42   :  { %v979_v34 = vmul.f32 %v2334_v7, %v977_v53  ;;  %v2336_v54 = vpop.eup %2335  ;;  %vm984_vm0 = vweird.f32 %v2334_v7 }
 0xb43   :  { %v958_v61 = vadd.f32 1.0, %v2336_v54  ;;  %vm985_vm4 = vmor %vm983_vm1, %vm984_vm0 }
 0xb44   :  { %v980_v60 = vsub.f32 1.0, %v979_v34 }
 0xb45   :  { %2337 = vrcp.f32 %v958_v61  ;;  %v970_v17 = vand.u32 2147483648, %v958_v61  ;;  %vm964_vm7 = vweird.f32 %v958_v61  ;;  %v968_v22 = vand.u32 2147483647, %v958_v61 }
 0xb46   :  { %v981_v29 = vmul.f32 %v2334_v7, %v980_v60 }
 0xb47   :  { %v971_v24 = vor.u32 1.1754944e-38, %v970_v17  ;;  %vm969_vm10 = vcmp.eq.f32.partialorder %v968_v22, 8.507059e+37 }
 0xb48   :  { %v982_v62 = vadd.f32 %v2334_v7, %v981_v29 }
 0xb4a   :  { %v986_v2 = vsel %vm985_vm4, %v2334_v7, %v982_v62 }
 0xb4b   :  { %v2338_v1 = vpop.eup %2337  ;;  %v991_v8 = vsel %vm988_vm5, %v990_v9, %v986_v2 }
 0xb4c   :  { %v960_v31 = vmul.f32 %v2338_v1, %v958_v61  ;;  %vm965_vm6 = vweird.f32 %v2338_v1  ;;  %v1005_v28 = vmul.f32 %v991_v8, %v3049_v43 }
 0xb4d   :  { %vm966_vm8 = vmor %vm964_vm7, %vm965_vm6 }
 0xb4e   :  { %v961_v12 = vsub.f32 1.0, %v960_v31 }
 0xb50   :  { %v962_v13 = vmul.f32 %v2338_v1, %v961_v12 }
 0xb52   :  { %v963_v14 = vadd.f32 %v2338_v1, %v962_v13 }
 0xb54   :  { %v967_v23 = vsel %vm966_vm8, %v2338_v1, %v963_v14 }
 0xb55   :  { %v972_v27 = vsel %vm969_vm10, %v971_v24, %v967_v23 }
 0xb56   :  { %v993_v35 = vmul.f32 %v972_v27, %v3045_v38 }
 0xb91   :  { %v1009_v6 = vpop.permute.xlu2 %1008 }
 0xb92   :  { %v1011_v10 = vmul.f32 %v1009_v6, %v991_v8 }
 0xb94   :  { %1013 = vrot.lane.b32.xlu1 %v1011_v10, %s2541_s16 }
 0xba3   :  { %v997_v4 = vpop.permute.xlu1 %996 }
 0xba4   :  { %v999_v44 = vmul.f32 %v997_v4, %v972_v27 }
 0xba6   :  { %1001 = vrot.lane.b32.xlu0 %v999_v44, %s2541_s16 }
 0xc06   :  { %v1014_v30 = vpop.permute.xlu1 %1013 }
 0xc07   :  { %v3069_v32 = vadd.f32 %v1014_v30, %v1005_v28 }
 0xc09   :  { %2339 = vtanh.f32 %v3069_v32 }
 0xc0f   :  { %v2340_v40 = vpop.eup %2339 }
 0xc10   :  { %1025 = vrot.lane.b32.xlu0 %v2340_v40, %s2540_s4 }
 0xc18   :  { %v1002_v36 = vpop.permute.xlu0 %1001 }
 0xc19   :  { %v3074_v37 = vadd.f32 %v1002_v36, %v993_v35 }
 0xc1b   :  { %2341 = vtanh.f32 %v3074_v37 }
 0xc21   :  { %v2342_v39 = vpop.eup %2341 }
 0xc22   :  { %1019 = vrot.lane.b32.xlu2 %v2342_v39, %s2540_s4 }
 0xc7c   :  { %v1020_v41 = vpop.permute.xlu2 %1019 }
 0xc7d   :  { %v1022_v43 = vmul.f32 %v1020_v41, %v972_v27 }
 0xc7f   :  { %1030 = vrot.lane.b32.xlu1 %v1022_v43, %s2541_s16 }
 0xc82   :  { %v1026_v45 = vpop.permute.xlu0 %1025 }
 0xc83   :  { %v1028_v50 = vmul.f32 %v1026_v45, %v991_v8 }
 0xc85   :  { %1034 = vrot.lane.b32.xlu2 %v1028_v50, %s2540_s4 }
 0xcdf   :  { %v1035_v56 = vpop.permute.xlu2 %1034 }
 0xce0   :  { %1039 = vst.msk [vmem:[#allocation4 + $0x18] sm:$0xff] %vm510_vm2, %v1035_v56 }
 0xcf1   :  { %v1031_v38 = vpop.permute.xlu1 %1030 }
 0xcf2   :  { %v1037_v42 = vsel %vm239_vm9, %v1031_v38, %v1035_v56  ;;  %1038 = vst.msk [vmem:[#allocation4 + $0x20] sm:$0xff] %vm239_vm9, %v1031_v38 }
 0xcf3   :  { %2198 = vmatmul.msk.f32.vlgmr.msra.gmra.mxu0 %vm378_vm3, %v1037_v42  ;;  %2199 = vmatmul.msk.f32.vlgmr.msra.gmra.mxu3 %vm378_vm3, %v1037_v42 }
 0xd70   :  { %v1060_v5 = vpop.f32.mrf.mxu0 }
 0xd71   :  { %v1084_v26 = vadd.f32 %v1060_v5, %v2898_v11 }
 0xd73   :  { %2343 = vtanh.f32 %v1084_v26  ;;  %v2200_v18 = vmul.f32 -1.442695, %v1084_v26 }
 0xd76   :  { %v1080_v55 = vpop.f32.mrf.mxu3 }
 0xd77   :  { %v1086_v57 = vadd.f32 %v1080_v55, %v2911_v25 }
 0xd79   :  { %v2344_v58 = vpop.eup %2343  ;;  %2345 = vtanh.f32 %v1086_v57  ;;  %v2201_v33 = vmul.f32 -1.442695, %v1086_v57 }
 0xd7a   :  { %1128 = vrot.lane.b32.xlu0 %v2344_v58, %s2540_s4  ;;  %2347 = vpow2.f32 %v2200_v18 }
 0xd7b   :  { %2349 = vpow2.f32 %v2201_v33 }
 0xd7f   :  { %v2346_v3 = vpop.eup %2345 }
 0xd80   :  { %1140 = vrot.lane.b32.xlu1 %v2346_v3, %s2540_s4  ;;  %v2348_v46 = vpop.eup %2347 }
 0xd81   :  { %v1090_v47 = vadd.f32 1.0, %v2348_v46  ;;  %v2350_v48 = vpop.eup %2349 }
 0xd82   :  { %v1109_v11 = vadd.f32 1.0, %v2350_v48 }
 0xd83   :  { %2351 = vrcp.f32 %v1090_v47  ;;  %v1102_v54 = vand.u32 2147483648, %v1090_v47  ;;  %vm1096_vm12 = vweird.f32 %v1090_v47  ;;  %v1100_v60 = vand.u32 2147483647, %v1090_v47 }
 0xd84   :  { %2353 = vrcp.f32 %v1109_v11  ;;  %v1121_v2 = vand.u32 2147483648, %v1109_v11  ;;  %vm1115_vm0 = vweird.f32 %v1109_v11  ;;  %v1119_v31 = vand.u32 2147483647, %v1109_v11 }
 0xd85   :  { %v1103_v62 = vor.u32 1.1754944e-38, %v1102_v54  ;;  %vm1101_vm14 = vcmp.eq.f32.partialorder %v1100_v60, 8.507059e+37 }
 0xd86   :  { %v1122_v8 = vor.u32 1.1754944e-38, %v1121_v2  ;;  %vm1120_vm4 = vcmp.eq.f32.partialorder %v1119_v31, 8.507059e+37 }
 0xd89   :  { %v2352_v49 = vpop.eup %2351 }
 0xd8a   :  { %v1092_v51 = vmul.f32 %v2352_v49, %v1090_v47  ;;  %v2354_v25 = vpop.eup %2353  ;;  %vm1097_vm11 = vweird.f32 %v2352_v49 }
 0xd8b   :  { %v1111_v53 = vmul.f32 %v2354_v25, %v1109_v11  ;;  %vm1098_vm13 = vmor %vm1096_vm12, %vm1097_vm11  ;;  %vm1116_vm15 = vweird.f32 %v2354_v25 }
 0xd8c   :  { %v1093_v52 = vsub.f32 1.0, %v1092_v51  ;;  %vm1117_vm1 = vmor %vm1115_vm0, %vm1116_vm15 }
 0xd8d   :  { %v1112_v7 = vsub.f32 1.0, %v1111_v53 }
 0xd8e   :  { %v1094_v59 = vmul.f32 %v2352_v49, %v1093_v52 }
 0xd8f   :  { %v1113_v61 = vmul.f32 %v2354_v25, %v1112_v7 }
 0xd90   :  { %v1095_v34 = vadd.f32 %v2352_v49, %v1094_v59 }
 0xd91   :  { %v1114_v63 = vadd.f32 %v2354_v25, %v1113_v61 }
 0xd92   :  { %v1099_v29 = vsel %vm1098_vm13, %v2352_v49, %v1095_v34 }
 0xd93   :  { %v1104_v1 = vsel %vm1101_vm14, %v1103_v62, %v1099_v29  ;;  %v1118_v6 = vsel %vm1117_vm1, %v2354_v25, %v1114_v63 }
 0xd94   :  { %v1123_v12 = vsel %vm1120_vm4, %v1122_v8, %v1118_v6  ;;  %v1125_v14 = vmul.f32 %v1104_v1, %v3074_v37 }
 0xd95   :  { %v1137_v24 = vmul.f32 %v1123_v12, %v3069_v32 }
 0xdec   :  { %v1129_v0 = vpop.permute.xlu0 %1128 }
 0xded   :  { %v1131_v9 = vmul.f32 %v1129_v0, %v1104_v1 }
 0xdef   :  { %1133 = vrot.lane.b32.xlu2 %v1131_v9, %s2541_s16 }
 0xdf2   :  { %v1141_v10 = vpop.permute.xlu1 %1140 }
 0xdf3   :  { %v1143_v13 = vmul.f32 %v1141_v10, %v1123_v12 }
 0xdf5   :  { %1145 = vrot.lane.b32.xlu0 %v1143_v13, %s2541_s16 }
 0xe49   :  { %v1134_v17 = vpop.permute.xlu2 %1133 }
 0xe4a   :  { %v3092_v22 = vadd.f32 %v1134_v17, %v1125_v14 }
 0xe4c   :  { %2355 = vtanh.f32 %v3092_v22 }
 0xe52   :  { %v2356_v23 = vpop.eup %2355 }
 0xe53   :  { %1151 = vrot.lane.b32.xlu1 %v2356_v23, %s2540_s4 }
 0xe67   :  { %v1146_v4 = vpop.permute.xlu0 %1145 }
 0xe68   :  { %v3097_v27 = vadd.f32 %v1146_v4, %v1137_v24 }
 0xe6a   :  { %2357 = vtanh.f32 %v3097_v27 }
 0xe70   :  { %v2358_v44 = vpop.eup %2357 }
 0xe71   :  { %1157 = vrot.lane.b32.xlu2 %v2358_v44, %s2540_s4 }
 0xec5   :  { %v1152_v28 = vpop.permute.xlu1 %1151 }
 0xec6   :  { %v1154_v30 = vmul.f32 %v1152_v28, %v1104_v1 }
 0xec8   :  { %1162 = vrot.lane.b32.xlu0 %v1154_v30, %s2541_s16 }
 0xecb   :  { %v1158_v40 = vpop.permute.xlu2 %1157 }
 0xecc   :  { %v1160_v35 = vmul.f32 %v1158_v40, %v1123_v12 }
 0xece   :  { %1166 = vrot.lane.b32.xlu1 %v1160_v35, %s2540_s4 }
 0xf3a   :  { %v1163_v36 = vpop.permute.xlu0 %1162 }
 0xf3b   :  { %1170 = vst.msk [vmem:[#allocation4 + $0x28] sm:$0xff] %vm239_vm9, %v1163_v36 }
 0xf40   :  { %v1167_v32 = vpop.permute.xlu1 %1166 }
 0xf41   :  { %v1169_v37 = vsel %vm239_vm9, %v1163_v36, %v1167_v32  ;;  %1171 = vst.msk [vmem:[#allocation4 + $0x10] sm:$0xff] %vm510_vm2, %v1167_v32 }
 0xf42   :  { %2202 = vmatmul.msk.f32.vlgmr.msrb.gmra.mxu1 %vm378_vm3, %v1169_v37  ;;  %2203 = vmatmul.msk.f32.vlgmr.msra.gmra.mxu2 %vm378_vm3, %v1169_v37 }
 0xfbf   :  { %v1192_v39 = vpop.f32.mrf.mxu1 }
 0xfc0   :  { %v1216_v41 = vadd.f32 %v1192_v39, %v2901_v15 }
 0xfc2   :  { %2359 = vtanh.f32 %v1216_v41  ;;  %v2204_v38 = vmul.f32 -1.442695, %v1216_v41 }
 0xfc5   :  { %v1212_v43 = vpop.f32.mrf.mxu2 }
 0xfc6   :  { %v1218_v45 = vadd.f32 %v1212_v43, %v2908_v21 }
 0xfc8   :  { %v2360_v50 = vpop.eup %2359  ;;  %2361 = vtanh.f32 %v1218_v45  ;;  %v2205_v57 = vmul.f32 -1.442695, %v1218_v45 }
 0xfc9   :  { %1260 = vrot.lane.b32.xlu2 %v2360_v50, %s2540_s4  ;;  %2363 = vpow2.f32 %v2204_v38 }
 0xfce   :  { %v2362_v56 = vpop.eup %2361 }
 0xfcf   :  { %1272 = vrot.lane.b32.xlu0 %v2362_v56, %s2540_s4  ;;  %v2364_v42 = vpop.eup %2363 }
 0xfd0   :  { %v1222_v5 = vadd.f32 1.0, %v2364_v42 }
 0xfd2   :  { %2365 = vrcp.f32 %v1222_v5  ;;  %v1234_v21 = vand.u32 2147483648, %v1222_v5  ;;  %vm1228_vm6 = vweird.f32 %v1222_v5  ;;  %v1232_v33 = vand.u32 2147483647, %v1222_v5 }
 0xfd3   :  { %2367 = vpow2.f32 %v2205_v57 }
 0xfd4   :  { %v1235_v48 = vor.u32 1.1754944e-38, %v1234_v21  ;;  %vm1233_vm8 = vcmp.eq.f32.partialorder %v1232_v33, 8.507059e+37 }
 0xfd8   :  { %v2366_v26 = vpop.eup %2365 }
 0xfd9   :  { %v1224_v55 = vmul.f32 %v2366_v26, %v1222_v5  ;;  %vm1229_vm5 = vweird.f32 %v2366_v26  ;;  %v2368_v18 = vpop.eup %2367 }
 0xfda   :  { %vm1230_vm7 = vmor %vm1228_vm6, %vm1229_vm5  ;;  %v1241_v47 = vadd.f32 1.0, %v2368_v18 }
 0xfdb   :  { %v1225_v15 = vsub.f32 1.0, %v1224_v55 }
 0xfdc   :  { %2369 = vrcp.f32 %v1241_v47  ;;  %v1253_v34 = vand.u32 2147483648, %v1241_v47  ;;  %vm1247_vm11 = vweird.f32 %v1241_v47  ;;  %v1251_v54 = vand.u32 2147483647, %v1241_v47 }
 0xfdd   :  { %v1226_v58 = vmul.f32 %v2366_v26, %v1225_v15 }
 0xfde   :  { %v1254_v61 = vor.u32 1.1754944e-38, %v1253_v34  ;;  %vm1252_vm13 = vcmp.eq.f32.partialorder %v1251_v54, 8.507059e+37 }
 0xfdf   :  { %v1227_v3 = vadd.f32 %v2366_v26, %v1226_v58 }
 0xfe1   :  { %v1231_v46 = vsel %vm1230_vm7, %v2366_v26, %v1227_v3 }
 0xfe2   :  { %v1236_v49 = vsel %vm1233_vm8, %v1235_v48, %v1231_v46  ;;  %v2370_v25 = vpop.eup %2369 }
 0xfe3   :  { %v1243_v52 = vmul.f32 %v2370_v25, %v1241_v47  ;;  %vm1248_vm10 = vweird.f32 %v2370_v25  ;;  %v1257_v0 = vmul.f32 %v1236_v49, %v3092_v22 }
 0xfe4   :  { %vm1249_vm12 = vmor %vm1247_vm11, %vm1248_vm10 }
 0xfe5   :  { %v1244_v53 = vsub.f32 1.0, %v1243_v52 }
 0xfe7   :  { %v1245_v59 = vmul.f32 %v2370_v25, %v1244_v53 }
 0xfe9   :  { %v1246_v7 = vadd.f32 %v2370_v25, %v1245_v59 }
 0xfeb   :  { %v1250_v60 = vsel %vm1249_vm12, %v2370_v25, %v1246_v7 }
 0xfec   :  { %v1255_v62 = vsel %vm1252_vm13, %v1254_v61, %v1250_v60 }
 0xfed   :  { %v1269_v9 = vmul.f32 %v1255_v62, %v3097_v27 }
0x1023   :  { %v1261_v11 = vpop.permute.xlu2 %1260 }
0x1024   :  { %v1263_v51 = vmul.f32 %v1261_v11, %v1236_v49 }
0x1026   :  { %1265 = vrot.lane.b32.xlu1 %v1263_v51, %s2541_s16 }
0x1041   :  { %v1273_v29 = vpop.permute.xlu0 %1272 }
0x1042   :  { %v1275_v63 = vmul.f32 %v1273_v29, %v1255_v62 }
0x1044   :  { %1277 = vrot.lane.b32.xlu2 %v1275_v63, %s2541_s16 }
0x1098   :  { %v1266_v1 = vpop.permute.xlu1 %1265 }
0x1099   :  { %v3115_v2 = vadd.f32 %v1266_v1, %v1257_v0  ;;  %v1450_v0 = vld [vmem:[#allocation7 + $0x38] sm:$0xff]  ;;  %v1449_v1 = vld [vmem:[#allocation7 + $0x30] sm:$0xff] }
0x109a   :  { %1487 = vmatpush.msra.mxu1 %v1450_v0 }
0x109b   :  { %2371 = vtanh.f32 %v3115_v2 }
0x109c   :  { %1488 = vmatpush.msra.mxu1 %v1449_v1 }
0x109e   :  { %v1278_v31 = vpop.permute.xlu2 %1277 }
0x109f   :  { %v3119_v6 = vadd.f32 %v1278_v31, %v1269_v9  ;;  %v1447_v9 = vld [vmem:[#allocation7 + $0x20] sm:$0xff]  ;;  %v1446_v31 = vld [vmem:[#allocation7 + $0x18] sm:$0xff] }
0x10a1   :  { %v2372_v8 = vpop.eup %2371  ;;  %2373 = vtanh.f32 %v3119_v6 }
0x10a2   :  { %1283 = vrot.lane.b32.xlu0 %v2372_v8, %s2540_s4  ;;  %v1444_v8 = vld [vmem:[#allocation7 + $0x8] sm:$0xff] }
0x10a7   :  { %v2374_v10 = vpop.eup %2373 }
0x10a8   :  { %1289 = vrot.lane.b32.xlu1 %v2374_v10, %s2540_s4  ;;  %v1443_v10 = vld [vmem:[#allocation7] sm:$0xff] }
0x1114   :  { %v1284_v12 = vpop.permute.xlu0 %1283 }
0x1115   :  { %v1286_v13 = vmul.f32 %v1284_v12, %v1236_v49 }
0x1117   :  { %1294 = vrot.lane.b32.xlu2 %v1286_v13, %s2541_s16 }
0x111a   :  { %v1290_v14 = vpop.permute.xlu1 %1289 }
0x111b   :  { %v1292_v17 = vmul.f32 %v1290_v14, %v1255_v62 }
0x111d   :  { %1298 = vrot.lane.b32.xlu0 %v1292_v17, %s2540_s4 }
0x1171   :  { %v1295_v22 = vpop.permute.xlu2 %1294 }
0x1172   :  { %1302 = vst.msk [vmem:[#allocation4 + $0x30] sm:$0xff] %vm239_vm9, %v1295_v22 }
0x118f   :  { %v1299_v23 = vpop.permute.xlu0 %1298 }
0x1190   :  { %v1301_v24 = vsel %vm239_vm9, %v1295_v22, %v1299_v23  ;;  %1303 = vst.msk [vmem:[#allocation4 + $0x8] sm:$0xff] %vm510_vm2, %v1299_v23  ;;  %v3150_v22 = vld [vmem:[%s3301_s6 + $0x18] sm:$0xff]  ;;  %v3155_v23 = vld [vmem:[%s3301_s6 + $0x10] sm:$0xff] }
0x1191   :  { %2206 = vmatmul.msk.f32.vlgmr.msrb.gmra.mxu0 %vm378_vm3, %v1301_v24  ;;  %2207 = vmatmul.msk.f32.vlgmr.msrb.gmra.mxu3 %vm378_vm3, %v1301_v24  ;;  %v1437_v24 = vld [vmem:[#allocation4 + $0x10] sm:$0xff] }
0x1192   :  { %1547 = vmatpush.msrb.mxu2 %v3150_v22  ;;  %1611 = vmatpush.msra.mxu0 %v3150_v22 }
0x1193   :  { %1739 = vmatpush.msra.mxu3 %v3150_v22 }
0x1194   :  { %1548 = vmatpush.msrb.mxu2 %v3155_v23  ;;  %1612 = vmatpush.msra.mxu0 %v3155_v23 }
0x1195   :  { %1740 = vmatpush.msra.mxu3 %v3155_v23 }
0x1197   :  { %v1436_v17 = vld [vmem:[#allocation4 + $0x8] sm:$0xff] }
0x120e   :  { %v1324_v4 = vpop.f32.mrf.mxu0 }
0x120f   :  { %v1348_v27 = vadd.f32 %v1324_v4, %v2906_v20  ;;  %v3167_v4 = vld [vmem:[%s3301_s6 + $0x8] sm:$0xff] }
0x1210   :  { %1549 = vmatpush.msrb.mxu2 %v3167_v4  ;;  %1613 = vmatpush.msra.mxu0 %v3167_v4 }
0x1211   :  { %2375 = vtanh.f32 %v1348_v27  ;;  %v2208_v36 = vmul.f32 -1.442695, %v1348_v27  ;;  %v3172_v27 = vld [vmem:[%s3301_s6] sm:$0xff]  ;;  %1741 = vmatpush.msra.mxu3 %v3167_v4 }
0x1212   :  { %1550 = vmatpush.msrb.mxu2 %v3172_v27  ;;  %1614 = vmatpush.msra.mxu0 %v3172_v27 }
0x1213   :  { %1551 = vmatmul.f32.vlgmr.msrb.gmra.mxu2 %v2539_v19  ;;  %1742 = vmatpush.msra.mxu3 %v3172_v27  ;;  %v1439_v19 = vld [vmem:[#allocation4 + $0x20] sm:$0xff] }
0x1214   :  { %v1344_v44 = vpop.f32.mrf.mxu3  ;;  %1675 = vmatpush.msra.mxu2 %v3150_v22  ;;  %1803 = vmatpush.msrb.mxu0 %v3150_v22 }
0x1215   :  { %v1350_v28 = vadd.f32 %v1344_v44, %v2903_v16  ;;  %1931 = vmatpush.msrb.mxu3 %v3150_v22  ;;  %v1438_v44 = vld [vmem:[#allocation4 + $0x18] sm:$0xff] }
0x1216   :  { %1676 = vmatpush.msra.mxu2 %v3155_v23  ;;  %1804 = vmatpush.msrb.mxu0 %v3155_v23 }
0x1217   :  { %v2376_v30 = vpop.eup %2375  ;;  %2377 = vtanh.f32 %v1350_v28  ;;  %v2209_v35 = vmul.f32 -1.442695, %v1350_v28  ;;  %1932 = vmatpush.msrb.mxu3 %v3155_v23  ;;  %v1440_v28 = vld [vmem:[#allocation4 + $0x28] sm:$0xff] }
0x1218   :  { %1392 = vrot.lane.b32.xlu0 %v2376_v30, %s2540_s4  ;;  %1677 = vmatpush.msra.mxu2 %v3167_v4  ;;  %v1441_v30 = vld [vmem:[#allocation4 + $0x30] sm:$0xff] }
0x1219   :  { %2379 = vpow2.f32 %v2209_v35  ;;  %1805 = vmatpush.msrb.mxu0 %v3167_v4  ;;  %1933 = vmatpush.msrb.mxu3 %v3167_v4  ;;  %v2259_v35 = vld [vmem:[%s3302_s7] ss:$0 sm:$0xff] }
0x121a   :  { %2381 = vpow2.f32 %v2208_v36  ;;  %1678 = vmatpush.msra.mxu2 %v3172_v27 }
0x121b   :  { %1806 = vmatpush.msrb.mxu0 %v3172_v27  ;;  %1934 = vmatpush.msrb.mxu3 %v3172_v27 }
0x121c   :  { %1867 = vmatpush.msrb.mxu2 %v3150_v22 }
0x121d   :  { %v2378_v40 = vpop.eup %2377 }
0x121e   :  { %1404 = vrot.lane.b32.xlu1 %v2378_v40, %s2540_s4  ;;  %1868 = vmatpush.msrb.mxu2 %v3155_v23 }
0x121f   :  { %v2380_v32 = vpop.eup %2379 }
0x1220   :  { %v1373_v37 = vadd.f32 1.0, %v2380_v32  ;;  %v2382_v39 = vpop.eup %2381  ;;  %1869 = vmatpush.msrb.mxu2 %v3167_v4 }
0x1221   :  { %v1354_v20 = vadd.f32 1.0, %v2382_v39 }
0x1222   :  { %2383 = vrcp.f32 %v1373_v37  ;;  %v1385_v5 = vand.u32 2147483648, %v1373_v37  ;;  %vm1379_vm15 = vweird.f32 %v1373_v37  ;;  %v1383_v26 = vand.u32 2147483647, %v1373_v37  ;;  %1870 = vmatpush.msrb.mxu2 %v3172_v27 }
0x1223   :  { %2385 = vrcp.f32 %v1354_v20  ;;  %v1366_v33 = vand.u32 2147483648, %v1354_v20  ;;  %vm1360_vm5 = vweird.f32 %v1354_v20  ;;  %v1364_v46 = vand.u32 2147483647, %v1354_v20 }
0x1224   :  { %v1386_v15 = vor.u32 1.1754944e-38, %v1385_v5  ;;  %vm1384_vm1 = vcmp.eq.f32.partialorder %v1383_v26, 8.507059e+37 }
0x1225   :  { %v1367_v11 = vor.u32 1.1754944e-38, %v1366_v33  ;;  %vm1365_vm7 = vcmp.eq.f32.partialorder %v1364_v46, 8.507059e+37 }
0x1228   :  { %v2384_v41 = vpop.eup %2383 }
0x1229   :  { %v1375_v43 = vmul.f32 %v2384_v41, %v1373_v37  ;;  %v2386_v45 = vpop.eup %2385  ;;  %vm1380_vm14 = vweird.f32 %v2384_v41 }
0x122a   :  { %v1356_v50 = vmul.f32 %v2386_v45, %v1354_v20  ;;  %vm1381_vm0 = vmor %vm1379_vm15, %vm1380_vm14  ;;  %vm1361_vm4 = vweird.f32 %v2386_v45 }
0x122b   :  { %v1376_v16 = vsub.f32 1.0, %v1375_v43  ;;  %vm1362_vm6 = vmor %vm1360_vm5, %vm1361_vm4 }
0x122c   :  { %v1357_v38 = vsub.f32 1.0, %v1356_v50 }
0x122d   :  { %v1377_v56 = vmul.f32 %v2384_v41, %v1376_v16 }
0x122e   :  { %v1358_v55 = vmul.f32 %v2386_v45, %v1357_v38 }
0x122f   :  { %v1378_v42 = vadd.f32 %v2384_v41, %v1377_v56 }
0x1230   :  { %v1359_v21 = vadd.f32 %v2386_v45, %v1358_v55 }
0x1231   :  { %v1382_v57 = vsel %vm1381_vm0, %v2384_v41, %v1378_v42 }
0x1232   :  { %v1387_v3 = vsel %vm1384_vm1, %v1386_v15, %v1382_v57  ;;  %v1363_v47 = vsel %vm1362_vm6, %v2386_v45, %v1359_v21 }
0x1233   :  { %v1368_v49 = vsel %vm1365_vm7, %v1367_v11, %v1363_v47  ;;  %v1401_v25 = vmul.f32 %v1387_v3, %v3119_v6  ;;  %v1445_v6 = vld [vmem:[#allocation7 + $0x10] sm:$0xff] }
0x1234   :  { %v1389_v59 = vmul.f32 %v1368_v49, %v3115_v2  ;;  %v1448_v2 = vld [vmem:[#allocation7 + $0x28] sm:$0xff] }
0x1235   :  { %1489 = vmatpush.msra.mxu1 %v1448_v2 }
0x1237   :  { %1490 = vmatpush.msra.mxu1 %v1447_v9 }
0x1239   :  { %1491 = vmatpush.msra.mxu1 %v1446_v31 }
0x123b   :  { %1492 = vmatpush.msra.mxu1 %v1445_v6 }
0x123d   :  { %1493 = vmatpush.msra.mxu1 %v1444_v8 }
0x123f   :  { %1494 = vmatpush.msra.mxu1 %v1443_v10 }
0x128a   :  { %v1393_v48 = vpop.permute.xlu0 %1392 }
0x128b   :  { %v1395_v51 = vmul.f32 %v1393_v48, %v1368_v49 }
0x1290   :  { %v1405_v58 = vpop.permute.xlu1 %1404 }
0x1291   :  { %v1407_v18 = vmul.f32 %v1405_v58, %v1387_v3 }
0x1293   :  { %1409 = vrot.lane.b32.xlu2 %v1407_v18, %s2541_s16 }
0x1296   :  { %v1552_v55 = vpop.f32.mrf.mxu2 }
0x129b   :  { %1397 = vrot.lane.b32.xlu2 %v1395_v51, %s2541_s16 }
0x12ed   :  { %v1410_v52 = vpop.permute.xlu2 %1409 }
0x12ee   :  { %v1412_v53 = vadd.f32 %v1410_v52, %v1401_v25 }
0x12f0   :  { %2387 = vtanh.f32 %v1412_v53 }
0x12f5   :  { %v1398_v7 = vpop.permute.xlu2 %1397 }
0x12f6   :  { %v2388_v34 = vpop.eup %2387  ;;  %v1400_v54 = vadd.f32 %v1398_v7, %v1389_v59 }
0x12f7   :  { %1421 = vrot.lane.b32.xlu1 %v2388_v34, %s2540_s4 }
0x12f8   :  { %2389 = vtanh.f32 %v1400_v54 }
0x12fe   :  { %v2390_v60 = vpop.eup %2389 }
0x12ff   :  { %1415 = vrot.lane.b32.xlu1 %v2390_v60, %s2540_s4 }
0x1369   :  { %v1422_v61 = vpop.permute.xlu1 %1421 }
0x136a   :  { %v1424_v29 = vmul.f32 %v1422_v61, %v1387_v3 }
0x136c   :  { %1431 = vrot.lane.b32.xlu0 %v1424_v29, %s2540_s4 }
0x1371   :  { %v1416_v62 = vpop.permute.xlu1 %1415 }
0x1372   :  { %v1418_v63 = vmul.f32 %v1416_v62, %v1368_v49 }
0x1374   :  { %1426 = vrot.lane.b32.xlu2 %v1418_v63, %s2541_s16 }
0x13ce   :  { %v1427_v12 = vpop.permute.xlu2 %1426 }
0x13cf   :  { %1429 = vst.msk [vmem:[#allocation4 + $0x38] sm:$0xff] %vm239_vm9, %v1427_v12 }
0x13d6   :  { %v1442_v40 = vld [vmem:[#allocation4 + $0x38] sm:$0xff] }
0x13de   :  { %v1432_v13 = vpop.permute.xlu0 %1431 }
0x13df   :  { %1434 = vst.msk [vmem:[#allocation4] sm:$0xff] %vm510_vm2, %v1432_v13 }
0x13e6   :  { %v1435_v14 = vld [vmem:[#allocation4] sm:$0xff] }
0x13e7   :  { %2210 = vmatmul.msk.f32.vlgmr.msra.gmra.mxu1 %vm378_vm3, %v1435_v14 }
0x13ef   :  { %2211 = vmatmul.msk.f32.gmra.mxu1 %vm378_vm3, %v1436_v17 }
0x13f7   :  { %2212 = vmatmul.msk.f32.gmra.mxu1 %vm378_vm3, %v1437_v24 }
0x13ff   :  { %2213 = vmatmul.msk.f32.gmra.mxu1 %vm378_vm3, %v1438_v44 }
0x1407   :  { %2214 = vmatmul.msk.f32.gmra.mxu1 %vm378_vm3, %v1439_v19 }
0x140f   :  { %2215 = vmatmul.msk.f32.gmra.mxu1 %vm378_vm3, %v1440_v28 }
0x1417   :  { %2216 = vmatmul.msk.f32.gmra.mxu1 %vm378_vm3, %v1441_v30 }
0x141f   :  { %2217 = vmatmul.msk.f32.gmra.mxu1 %vm378_vm3, %v1442_v40 }
0x1464   :  { %v1496_v36 = vpop.f32.mrf.mxu1 }
0x1465   :  { %v3205_v32 = vadd.f32 %v2259_v35, %v1496_v36 }
0x146c   :  { %v1499_v37 = vpop.f32.mrf.mxu1 }
0x146d   :  { %v3207_v39 = vadd.f32 %v2259_v35, %v1499_v37 }
0x1474   :  { %v1502_v20 = vpop.f32.mrf.mxu1 }
0x1475   :  { %v3209_v41 = vadd.f32 %v2259_v35, %v1502_v20 }
0x147c   :  { %v1505_v43 = vpop.f32.mrf.mxu1 }
0x147d   :  { %v3211_v16 = vadd.f32 %v2259_v35, %v1505_v43 }
0x1484   :  { %v1508_v45 = vpop.f32.mrf.mxu1 }
0x1485   :  { %v3213_v50 = vadd.f32 %v2259_v35, %v1508_v45 }
0x148c   :  { %v1511_v56 = vpop.f32.mrf.mxu1 }
0x148d   :  { %v3215_v38 = vadd.f32 %v2259_v35, %v1511_v56 }
0x1494   :  { %v1514_v42 = vpop.f32.mrf.mxu1 }
0x1495   :  { %v1515_v5 = vadd.f32 %v2259_v35, %v1514_v42 }
0x149c   :  { %v1517_v26 = vpop.f32.mrf.mxu1 }
0x149d   :  { %v1518_v57 = vadd.f32 %v2259_v35, %v1517_v26 }
0x149f   :  { %v1555_v15 = vadd.f32 %v1552_v55, %v1518_v57 }
0x14a1   :  { %2391 = vtanh.f32 %v1555_v15  ;;  %v2218_v3 = vmul.f32 -1.442695, %v1555_v15 }
0x14a3   :  { %2393 = vpow2.f32 %v2218_v3 }
0x14a7   :  { %v2392_v58 = vpop.eup %2391 }
0x14a8   :  { %1578 = vrot.lane.b32.xlu0 %v2392_v58, %s2540_s4 }
0x14a9   :  { %v2394_v21 = vpop.eup %2393 }
0x14aa   :  { %v1559_v18 = vadd.f32 1.0, %v2394_v21 }
0x14ac   :  { %2395 = vrcp.f32 %v1559_v18  ;;  %v1571_v49 = vand.u32 2147483648, %v1559_v18  ;;  %vm1565_vm3 = vweird.f32 %v1559_v18  ;;  %v1569_v51 = vand.u32 2147483647, %v1559_v18 }
0x14ae   :  { %v1572_v52 = vor.u32 1.1754944e-38, %v1571_v49  ;;  %vm1570_vm10 = vcmp.eq.f32.partialorder %v1569_v51, 8.507059e+37 }
0x14b2   :  { %v2396_v33 = vpop.eup %2395 }
0x14b3   :  { %v1561_v46 = vmul.f32 %v2396_v33, %v1559_v18  ;;  %vm1566_vm2 = vweird.f32 %v2396_v33 }
0x14b4   :  { %vm1567_vm8 = vmor %vm1565_vm3, %vm1566_vm2 }
0x14b5   :  { %v1562_v47 = vsub.f32 1.0, %v1561_v46 }
0x14b7   :  { %v1563_v48 = vmul.f32 %v2396_v33, %v1562_v47 }
0x14b9   :  { %v1564_v11 = vadd.f32 %v2396_v33, %v1563_v48 }
0x14bb   :  { %v1568_v25 = vsel %vm1567_vm8, %v2396_v33, %v1564_v11 }
0x14bc   :  { %v1573_v59 = vsel %vm1570_vm10, %v1572_v52, %v1568_v25 }
0x14bd   :  { %v1575_v34 = vmul.f32 0.0, %v1573_v59 }
0x151a   :  { %v1579_v53 = vpop.permute.xlu0 %1578 }
0x151b   :  { %v1581_v7 = vmul.f32 %v1579_v53, %v1573_v59 }
0x151d   :  { %1583 = vrot.lane.b32.xlu1 %v1581_v7, %s2541_s16 }
0x158f   :  { %v1584_v54 = vpop.permute.xlu1 %1583 }
0x1590   :  { %v1586_v60 = vadd.f32 %v1584_v54, %v1575_v34 }
0x1592   :  { %2397 = vtanh.f32 %v1586_v60 }
0x1598   :  { %v2398_v61 = vpop.eup %2397 }
0x1599   :  { %1589 = vrot.lane.b32.xlu2 %v2398_v61, %s2540_s4 }
0x15f3   :  { %v1590_v29 = vpop.permute.xlu2 %1589 }
0x15f4   :  { %v1592_v62 = vmul.f32 %v1590_v29, %v1573_v59 }
0x15f6   :  { %1595 = vrot.lane.b32.xlu0 %v1592_v62, %s2541_s16 }
0x1668   :  { %v1596_v63 = vpop.permute.xlu0 %1595 }
0x1669   :  { %2219 = vmatmul.msk.f32.vlgmr.msra.gmra.mxu0 %vm239_vm9, %v1596_v63 }
0x166a   :  { %1995 = vmatpush.msra.mxu0 %v3150_v22 }
0x166c   :  { %1996 = vmatpush.msra.mxu0 %v3155_v23 }
0x166e   :  { %1997 = vmatpush.msra.mxu0 %v3167_v4 }
0x1670   :  { %1998 = vmatpush.msra.mxu0 %v3172_v27 }
0x16e6   :  { %v1616_v0 = vpop.f32.mrf.mxu0 }
0x16e7   :  { %v1619_v1 = vadd.f32 %v1616_v0, %v1515_v5 }
0x16e9   :  { %2399 = vtanh.f32 %v1619_v1  ;;  %v2220_v9 = vmul.f32 -1.442695, %v1619_v1 }
0x16eb   :  { %2401 = vpow2.f32 %v2220_v9 }
0x16ef   :  { %v2400_v2 = vpop.eup %2399 }
0x16f0   :  { %1642 = vrot.lane.b32.xlu1 %v2400_v2, %s2540_s4 }
0x16f1   :  { %v2402_v31 = vpop.eup %2401 }
0x16f2   :  { %v1623_v6 = vadd.f32 1.0, %v2402_v31 }
0x16f4   :  { %2403 = vrcp.f32 %v1623_v6  ;;  %v1635_v17 = vand.u32 2147483648, %v1623_v6  ;;  %vm1629_vm12 = vweird.f32 %v1623_v6  ;;  %v1633_v22 = vand.u32 2147483647, %v1623_v6 }
0x16f6   :  { %v1636_v24 = vor.u32 1.1754944e-38, %v1635_v17  ;;  %vm1634_vm14 = vcmp.eq.f32.partialorder %v1633_v22, 8.507059e+37 }
0x16fa   :  { %v2404_v8 = vpop.eup %2403 }
0x16fb   :  { %v1625_v10 = vmul.f32 %v2404_v8, %v1623_v6  ;;  %vm1630_vm11 = vweird.f32 %v2404_v8 }
0x16fc   :  { %vm1631_vm13 = vmor %vm1629_vm12, %vm1630_vm11 }
0x16fd   :  { %v1626_v12 = vsub.f32 1.0, %v1625_v10 }
0x16ff   :  { %v1627_v13 = vmul.f32 %v2404_v8, %v1626_v12 }
0x1701   :  { %v1628_v14 = vadd.f32 %v2404_v8, %v1627_v13 }
0x1703   :  { %v1632_v23 = vsel %vm1631_vm13, %v2404_v8, %v1628_v14 }
0x1704   :  { %v1637_v27 = vsel %vm1634_vm14, %v1636_v24, %v1632_v23 }
0x1705   :  { %v1639_v19 = vmul.f32 %v1637_v27, %v1586_v60 }
0x1762   :  { %v1643_v4 = vpop.permute.xlu1 %1642 }
0x1763   :  { %v1645_v44 = vmul.f32 %v1643_v4, %v1637_v27 }
0x1765   :  { %1647 = vrot.lane.b32.xlu2 %v1645_v44, %s2541_s16 }
0x17bf   :  { %v1648_v28 = vpop.permute.xlu2 %1647 }
0x17c0   :  { %v1650_v30 = vadd.f32 %v1648_v28, %v1639_v19 }
0x17c2   :  { %2405 = vtanh.f32 %v1650_v30 }
0x17c8   :  { %v2406_v40 = vpop.eup %2405 }
0x17c9   :  { %1653 = vrot.lane.b32.xlu0 %v2406_v40, %s2540_s4 }
0x183b   :  { %v1654_v35 = vpop.permute.xlu0 %1653 }
0x183c   :  { %v1656_v36 = vmul.f32 %v1654_v35, %v1637_v27 }
0x183e   :  { %1659 = vrot.lane.b32.xlu1 %v1656_v36, %s2541_s16 }
0x18b0   :  { %v1660_v37 = vpop.permute.xlu1 %1659 }
0x18b1   :  { %2221 = vmatmul.msk.f32.vlgmr.msra.gmra.mxu2 %vm239_vm9, %v1660_v37 }
0x1934   :  { %v1680_v20 = vpop.f32.mrf.mxu2 }
0x1935   :  { %v1683_v43 = vadd.f32 %v1680_v20, %v3215_v38 }
0x1937   :  { %2407 = vtanh.f32 %v1683_v43  ;;  %v2222_v56 = vmul.f32 -1.442695, %v1683_v43 }
0x1939   :  { %2409 = vpow2.f32 %v2222_v56 }
0x193d   :  { %v2408_v45 = vpop.eup %2407 }
0x193e   :  { %1706 = vrot.lane.b32.xlu2 %v2408_v45, %s2540_s4 }
0x193f   :  { %v2410_v42 = vpop.eup %2409 }
0x1940   :  { %v1687_v5 = vadd.f32 1.0, %v2410_v42 }
0x1942   :  { %2411 = vrcp.f32 %v1687_v5  ;;  %v1699_v3 = vand.u32 2147483648, %v1687_v5  ;;  %vm1693_vm0 = vweird.f32 %v1687_v5  ;;  %v1697_v21 = vand.u32 2147483647, %v1687_v5 }
0x1944   :  { %v1700_v18 = vor.u32 1.1754944e-38, %v1699_v3  ;;  %vm1698_vm4 = vcmp.eq.f32.partialorder %v1697_v21, 8.507059e+37 }
0x1948   :  { %v2412_v26 = vpop.eup %2411 }
0x1949   :  { %v1689_v55 = vmul.f32 %v2412_v26, %v1687_v5  ;;  %vm1694_vm15 = vweird.f32 %v2412_v26 }
0x194a   :  { %vm1695_vm1 = vmor %vm1693_vm0, %vm1694_vm15 }
0x194b   :  { %v1690_v57 = vsub.f32 1.0, %v1689_v55 }
0x194d   :  { %v1691_v15 = vmul.f32 %v2412_v26, %v1690_v57 }
0x194f   :  { %v1692_v58 = vadd.f32 %v2412_v26, %v1691_v15 }
0x1951   :  { %v1696_v38 = vsel %vm1695_vm1, %v2412_v26, %v1692_v58 }
0x1952   :  { %v1701_v46 = vsel %vm1698_vm4, %v1700_v18, %v1696_v38 }
0x1953   :  { %v1703_v48 = vmul.f32 %v1701_v46, %v1650_v30 }
0x1998   :  { %v1707_v33 = vpop.permute.xlu2 %1706 }
0x1999   :  { %v1709_v47 = vmul.f32 %v1707_v33, %v1701_v46 }
0x199b   :  { %1711 = vrot.lane.b32.xlu0 %v1709_v47, %s2541_s16 }
0x1a0d   :  { %v1712_v11 = vpop.permute.xlu0 %1711 }
0x1a0e   :  { %v1714_v49 = vadd.f32 %v1712_v11, %v1703_v48 }
0x1a10   :  { %2413 = vtanh.f32 %v1714_v49 }
0x1a16   :  { %v2414_v51 = vpop.eup %2413 }
0x1a17   :  { %1717 = vrot.lane.b32.xlu1 %v2414_v51, %s2540_s4 }
0x1a89   :  { %v1718_v25 = vpop.permute.xlu1 %1717 }
0x1a8a   :  { %v1720_v52 = vmul.f32 %v1718_v25, %v1701_v46 }
0x1a8c   :  { %1723 = vrot.lane.b32.xlu2 %v1720_v52, %s2541_s16 }
0x1ae6   :  { %v1724_v53 = vpop.permute.xlu2 %1723 }
0x1ae7   :  { %2223 = vmatmul.msk.f32.vlgmr.msra.gmra.mxu3 %vm239_vm9, %v1724_v53 }
0x1b6a   :  { %v1744_v59 = vpop.f32.mrf.mxu3 }
0x1b6b   :  { %v1747_v7 = vadd.f32 %v1744_v59, %v3213_v50 }
0x1b6d   :  { %2415 = vtanh.f32 %v1747_v7  ;;  %v2224_v54 = vmul.f32 -1.442695, %v1747_v7 }
0x1b6f   :  { %2417 = vpow2.f32 %v2224_v54 }
0x1b73   :  { %v2416_v34 = vpop.eup %2415 }
0x1b74   :  { %1770 = vrot.lane.b32.xlu0 %v2416_v34, %s2540_s4 }
0x1b75   :  { %v2418_v60 = vpop.eup %2417 }
0x1b76   :  { %v1751_v61 = vadd.f32 1.0, %v2418_v60 }
0x1b78   :  { %2419 = vrcp.f32 %v1751_v61  ;;  %v1763_v2 = vand.u32 2147483648, %v1751_v61  ;;  %vm1757_vm6 = vweird.f32 %v1751_v61  ;;  %v1761_v9 = vand.u32 2147483647, %v1751_v61 }
0x1b7a   :  { %v1764_v31 = vor.u32 1.1754944e-38, %v1763_v2  ;;  %vm1762_vm2 = vcmp.eq.f32.partialorder %v1761_v9, 8.507059e+37 }
0x1b7e   :  { %v2420_v29 = vpop.eup %2419 }
0x1b7f   :  { %v1753_v62 = vmul.f32 %v2420_v29, %v1751_v61  ;;  %vm1758_vm5 = vweird.f32 %v2420_v29 }
0x1b80   :  { %vm1759_vm7 = vmor %vm1757_vm6, %vm1758_vm5 }
0x1b81   :  { %v1754_v63 = vsub.f32 1.0, %v1753_v62 }
0x1b83   :  { %v1755_v0 = vmul.f32 %v2420_v29, %v1754_v63 }
0x1b85   :  { %v1756_v1 = vadd.f32 %v2420_v29, %v1755_v0 }
0x1b87   :  { %v1760_v50 = vsel %vm1759_vm7, %v2420_v29, %v1756_v1 }
0x1b88   :  { %v1765_v8 = vsel %vm1762_vm2, %v1764_v31, %v1760_v50 }
0x1b89   :  { %v1767_v12 = vmul.f32 %v1765_v8, %v1714_v49 }
0x1be6   :  { %v1771_v6 = vpop.permute.xlu0 %1770 }
0x1be7   :  { %v1773_v10 = vmul.f32 %v1771_v6, %v1765_v8 }
0x1be9   :  { %1775 = vrot.lane.b32.xlu1 %v1773_v10, %s2541_s16 }
0x1c5b   :  { %v1776_v13 = vpop.permute.xlu1 %1775 }
0x1c5c   :  { %v1778_v14 = vadd.f32 %v1776_v13, %v1767_v12 }
0x1c5e   :  { %2421 = vtanh.f32 %v1778_v14 }
0x1c64   :  { %v2422_v17 = vpop.eup %2421 }
0x1c65   :  { %1781 = vrot.lane.b32.xlu2 %v2422_v17, %s2540_s4 }
0x1cbf   :  { %v1782_v22 = vpop.permute.xlu2 %1781 }
0x1cc0   :  { %v1784_v23 = vmul.f32 %v1782_v22, %v1765_v8 }
0x1cc2   :  { %1787 = vrot.lane.b32.xlu0 %v1784_v23, %s2541_s16 }
0x1d34   :  { %v1788_v24 = vpop.permute.xlu0 %1787 }
0x1d35   :  { %2225 = vmatmul.msk.f32.vlgmr.msrb.gmra.mxu0 %vm239_vm9, %v1788_v24 }
0x1db2   :  { %v1808_v4 = vpop.f32.mrf.mxu0 }
0x1db3   :  { %v1811_v27 = vadd.f32 %v1808_v4, %v3211_v16 }
0x1db5   :  { %2423 = vtanh.f32 %v1811_v27  ;;  %v2226_v19 = vmul.f32 -1.442695, %v1811_v27 }
0x1db7   :  { %2425 = vpow2.f32 %v2226_v19 }
0x1dbb   :  { %v2424_v44 = vpop.eup %2423 }
0x1dbc   :  { %1834 = vrot.lane.b32.xlu1 %v2424_v44, %s2540_s4 }
0x1dbd   :  { %v2426_v28 = vpop.eup %2425 }
0x1dbe   :  { %v1815_v30 = vadd.f32 1.0, %v2426_v28 }
0x1dc0   :  { %2427 = vrcp.f32 %v1815_v30  ;;  %v1827_v43 = vand.u32 2147483648, %v1815_v30  ;;  %vm1821_vm8 = vweird.f32 %v1815_v30  ;;  %v1825_v45 = vand.u32 2147483647, %v1815_v30 }
0x1dc2   :  { %v1828_v56 = vor.u32 1.1754944e-38, %v1827_v43  ;;  %vm1826_vm11 = vcmp.eq.f32.partialorder %v1825_v45, 8.507059e+37 }
0x1dc6   :  { %v2428_v40 = vpop.eup %2427 }
0x1dc7   :  { %v1817_v35 = vmul.f32 %v2428_v40, %v1815_v30  ;;  %vm1822_vm3 = vweird.f32 %v2428_v40 }
0x1dc8   :  { %vm1823_vm10 = vmor %vm1821_vm8, %vm1822_vm3  ;;  %vm2116_vm8 = vcmask 1043456  }
0x1dc9   :  { %v1818_v36 = vsub.f32 1.0, %v1817_v35 }
0x1dcb   :  { %v1819_v37 = vmul.f32 %v2428_v40, %v1818_v36 }
0x1dcd   :  { %v1820_v20 = vadd.f32 %v2428_v40, %v1819_v37 }
0x1dcf   :  { %v1824_v16 = vsel %vm1823_vm10, %v2428_v40, %v1820_v20  ;;  %vm2112_vm10 = vcmask 31744  }
0x1dd0   :  { %v1829_v5 = vsel %vm1826_vm11, %v1828_v56, %v1824_v16  ;;  %vm2140_vm11 = vcmask 23552  }
0x1dd1   :  { %v1831_v55 = vmul.f32 %v1829_v5, %v1778_v14 }
0x1e2e   :  { %v1835_v42 = vpop.permute.xlu1 %1834 }
0x1e2f   :  { %v1837_v26 = vmul.f32 %v1835_v42, %v1829_v5 }
0x1e31   :  { %1839 = vrot.lane.b32.xlu2 %v1837_v26, %s2541_s16 }
0x1e8b   :  { %v1840_v57 = vpop.permute.xlu2 %1839 }
0x1e8c   :  { %v1842_v15 = vadd.f32 %v1840_v57, %v1831_v55 }
0x1e8e   :  { %2429 = vtanh.f32 %v1842_v15 }
0x1e94   :  { %v2430_v58 = vpop.eup %2429 }
0x1e95   :  { %1845 = vrot.lane.b32.xlu0 %v2430_v58, %s2540_s4 }
0x1f07   :  { %v1846_v3 = vpop.permute.xlu0 %1845 }
0x1f08   :  { %v1848_v21 = vmul.f32 %v1846_v3, %v1829_v5 }
0x1f0a   :  { %1851 = vrot.lane.b32.xlu1 %v1848_v21, %s2541_s16 }
0x1f7c   :  { %v1852_v38 = vpop.permute.xlu1 %1851 }
0x1f7d   :  { %2227 = vmatmul.msk.f32.vlgmr.msrb.gmra.mxu2 %vm239_vm9, %v1852_v38 }
0x2000   :  { %v1872_v18 = vpop.f32.mrf.mxu2 }
0x2001   :  { %v1875_v33 = vadd.f32 %v1872_v18, %v3209_v41 }
0x2003   :  { %2431 = vtanh.f32 %v1875_v33  ;;  %v2228_v47 = vmul.f32 -1.442695, %v1875_v33 }
0x2005   :  { %2433 = vpow2.f32 %v2228_v47 }
0x2009   :  { %v2432_v46 = vpop.eup %2431 }
0x200a   :  { %1898 = vrot.lane.b32.xlu2 %v2432_v46, %s2540_s4 }
0x200b   :  { %v2434_v48 = vpop.eup %2433 }
0x200c   :  { %v1879_v11 = vadd.f32 1.0, %v2434_v48 }
0x200e   :  { %2435 = vrcp.f32 %v1879_v11  ;;  %v1891_v59 = vand.u32 2147483648, %v1879_v11  ;;  %vm1885_vm13 = vweird.f32 %v1879_v11  ;;  %v1889_v7 = vand.u32 2147483647, %v1879_v11 }
0x2010   :  { %v1892_v34 = vor.u32 1.1754944e-38, %v1891_v59  ;;  %vm1890_vm15 = vcmp.eq.f32.partialorder %v1889_v7, 8.507059e+37  ;;  %v2041_v59 = vld [vmem:[#allocation9] sm:$0xff] }
0x2014   :  { %v2436_v49 = vpop.eup %2435 }
0x2015   :  { %v1881_v51 = vmul.f32 %v2436_v49, %v1879_v11  ;;  %vm1886_vm12 = vweird.f32 %v2436_v49 }
0x2016   :  { %vm1887_vm14 = vmor %vm1885_vm13, %vm1886_vm12 }
0x2017   :  { %v1882_v25 = vsub.f32 1.0, %v1881_v51 }
0x2019   :  { %v1883_v52 = vmul.f32 %v2436_v49, %v1882_v25  ;;  %v2044_v25 = vld [vmem:[#allocation9 + $0x18] sm:$0xff] }
0x201a   :  { %2066 = vmatpush.msra.mxu2 %v2044_v25 }
0x201b   :  { %v1884_v53 = vadd.f32 %v2436_v49, %v1883_v52  ;;  %v2043_v52 = vld [vmem:[#allocation9 + $0x10] sm:$0xff] }
0x201c   :  { %2067 = vmatpush.msra.mxu2 %v2043_v52 }
0x201d   :  { %v1888_v41 = vsel %vm1887_vm14, %v2436_v49, %v1884_v53  ;;  %v2042_v53 = vld [vmem:[#allocation9 + $0x8] sm:$0xff] }
0x201e   :  { %v1893_v60 = vsel %vm1890_vm15, %v1892_v34, %v1888_v41  ;;  %2068 = vmatpush.msra.mxu2 %v2042_v53  ;;  %v2078_v34 = vld [vmem:[%s3305_s10 + $0x18] sm:$0xff] }
0x201f   :  { %v1895_v29 = vmul.f32 %v1893_v60, %v1842_v15  ;;  %2098 = vmatpush.msra.mxu3 %v2078_v34 }
0x2020   :  { %2069 = vmatpush.msra.mxu2 %v2041_v59 }
0x2064   :  { %v1899_v54 = vpop.permute.xlu2 %1898 }
0x2065   :  { %v1901_v61 = vmul.f32 %v1899_v54, %v1893_v60  ;;  %v2077_v54 = vld [vmem:[%s3305_s10 + $0x10] sm:$0xff] }
0x2066   :  { %2099 = vmatpush.msra.mxu3 %v2077_v54 }
0x2067   :  { %1903 = vrot.lane.b32.xlu0 %v1901_v61, %s2541_s16  ;;  %v2076_v61 = vld [vmem:[%s3305_s10 + $0x8] sm:$0xff] }
0x2068   :  { %2100 = vmatpush.msra.mxu3 %v2076_v61 }
0x20d9   :  { %v1904_v62 = vpop.permute.xlu0 %1903 }
0x20da   :  { %v1906_v63 = vadd.f32 %v1904_v62, %v1895_v29  ;;  %v2075_v29 = vld [vmem:[%s3305_s10] sm:$0xff] }
0x20db   :  { %2101 = vmatpush.msra.mxu3 %v2075_v29  ;;  %v2107_v62 = vld [vmem:[%s3307_s12] sm:$0xf] }
0x20dc   :  { %2437 = vtanh.f32 %v1906_v63  ;;  %2235 = vmatpush.msk.msrb.mxu0 %vm2116_vm8, %v2107_v62 }
0x20e2   :  { %v2438_v0 = vpop.eup %2437 }
0x20e3   :  { %1909 = vrot.lane.b32.xlu1 %v2438_v0, %s2540_s4 }
0x2155   :  { %v1910_v1 = vpop.permute.xlu1 %1909 }
0x2156   :  { %v1912_v2 = vmul.f32 %v1910_v1, %v1893_v60 }
0x2158   :  { %1915 = vrot.lane.b32.xlu2 %v1912_v2, %s2541_s16 }
0x21b2   :  { %v1916_v9 = vpop.permute.xlu2 %1915 }
0x21b3   :  { %2229 = vmatmul.msk.f32.vlgmr.msrb.gmra.mxu3 %vm239_vm9, %v1916_v9  ;;  %v2261_v9 = vld [vmem:[%s3306_s11] ss:$0 sm:$0xff] }
0x2236   :  { %v1936_v50 = vpop.f32.mrf.mxu3 }
0x2237   :  { %v1939_v31 = vadd.f32 %v1936_v50, %v3207_v39 }
0x2239   :  { %2439 = vtanh.f32 %v1939_v31  ;;  %v2230_v8 = vmul.f32 -1.442695, %v1939_v31 }
0x223b   :  { %2441 = vpow2.f32 %v2230_v8  ;;  %v2262_v8 = vld [vmem:[%s3308_s13] ss:$0 sm:$0xff] }
0x223f   :  { %v2440_v6 = vpop.eup %2439 }
0x2240   :  { %1962 = vrot.lane.b32.xlu0 %v2440_v6, %s2540_s4 }
0x2241   :  { %v2442_v10 = vpop.eup %2441 }
0x2242   :  { %v1943_v12 = vadd.f32 1.0, %v2442_v10 }
0x2244   :  { %2443 = vrcp.f32 %v1943_v12  ;;  %v1955_v24 = vand.u32 2147483648, %v1943_v12  ;;  %vm1949_vm1 = vweird.f32 %v1943_v12  ;;  %v1953_v4 = vand.u32 2147483647, %v1943_v12 }
0x2246   :  { %v1956_v27 = vor.u32 1.1754944e-38, %v1955_v24  ;;  %vm1954_vm5 = vcmp.eq.f32.partialorder %v1953_v4, 8.507059e+37 }
0x224a   :  { %v2444_v13 = vpop.eup %2443 }
0x224b   :  { %v1945_v14 = vmul.f32 %v2444_v13, %v1943_v12  ;;  %vm1950_vm0 = vweird.f32 %v2444_v13 }
0x224c   :  { %vm1951_vm4 = vmor %vm1949_vm1, %vm1950_vm0 }
0x224d   :  { %v1946_v17 = vsub.f32 1.0, %v1945_v14 }
0x224f   :  { %v1947_v22 = vmul.f32 %v2444_v13, %v1946_v17 }
0x2251   :  { %v1948_v23 = vadd.f32 %v2444_v13, %v1947_v22 }
0x2253   :  { %v1952_v39 = vsel %vm1951_vm4, %v2444_v13, %v1948_v23 }
0x2254   :  { %v1957_v19 = vsel %vm1954_vm5, %v1956_v27, %v1952_v39 }
0x2255   :  { %v1959_v30 = vmul.f32 %v1957_v19, %v1906_v63  ;;  %v2260_v63 = vld [vmem:[%s3304_s9] ss:$0 sm:$0xff] }
0x22b2   :  { %v1963_v44 = vpop.permute.xlu0 %1962 }
0x22b3   :  { %v1965_v28 = vmul.f32 %v1963_v44, %v1957_v19 }
0x22b5   :  { %1967 = vrot.lane.b32.xlu1 %v1965_v28, %s2541_s16 }
0x2327   :  { %v1968_v40 = vpop.permute.xlu1 %1967 }
0x2328   :  { %v1970_v35 = vadd.f32 %v1968_v40, %v1959_v30 }
0x232a   :  { %2445 = vtanh.f32 %v1970_v35 }
0x2330   :  { %v2446_v36 = vpop.eup %2445 }
0x2331   :  { %1973 = vrot.lane.b32.xlu2 %v2446_v36, %s2540_s4 }
0x238b   :  { %v1974_v37 = vpop.permute.xlu2 %1973 }
0x238c   :  { %v1976_v20 = vmul.f32 %v1974_v37, %v1957_v19 }
0x238e   :  { %1979 = vrot.lane.b32.xlu0 %v1976_v20, %s2541_s16 }
0x2400   :  { %v1980_v43 = vpop.permute.xlu0 %1979 }
0x2401   :  { %2231 = vmatmul.msk.f32.vlgmr.msra.gmra.mxu0 %vm239_vm9, %v1980_v43 }
0x247e   :  { %v2000_v45 = vpop.f32.mrf.mxu0 }
0x247f   :  { %v2003_v16 = vadd.f32 %v2000_v45, %v3205_v32 }
0x2481   :  { %2447 = vtanh.f32 %v2003_v16  ;;  %v2232_v42 = vmul.f32 -1.442695, %v2003_v16 }
0x2483   :  { %2449 = vpow2.f32 %v2232_v42 }
0x2487   :  { %v2448_v56 = vpop.eup %2447 }
0x2488   :  { %2026 = vrot.lane.b32.xlu1 %v2448_v56, %s2540_s4 }
0x2489   :  { %v2450_v5 = vpop.eup %2449 }
0x248a   :  { %v2007_v26 = vadd.f32 1.0, %v2450_v5 }
0x248c   :  { %2451 = vrcp.f32 %v2007_v26  ;;  %v2019_v21 = vand.u32 2147483648, %v2007_v26  ;;  %vm2013_vm7 = vweird.f32 %v2007_v26  ;;  %v2017_v38 = vand.u32 2147483647, %v2007_v26 }
0x248e   :  { %v2020_v18 = vor.u32 1.1754944e-38, %v2019_v21  ;;  %vm2018_vm3 = vcmp.eq.f32.partialorder %v2017_v38, 8.507059e+37 }
0x2492   :  { %v2452_v55 = vpop.eup %2451 }
0x2493   :  { %v2009_v57 = vmul.f32 %v2452_v55, %v2007_v26  ;;  %vm2014_vm6 = vweird.f32 %v2452_v55 }
0x2494   :  { %vm2015_vm2 = vmor %vm2013_vm7, %vm2014_vm6 }
0x2495   :  { %v2010_v15 = vsub.f32 1.0, %v2009_v57 }
0x2497   :  { %v2011_v58 = vmul.f32 %v2452_v55, %v2010_v15 }
0x2499   :  { %v2012_v3 = vadd.f32 %v2452_v55, %v2011_v58 }
0x249b   :  { %v2016_v32 = vsel %vm2015_vm2, %v2452_v55, %v2012_v3 }
0x249c   :  { %v2021_v46 = vsel %vm2018_vm3, %v2020_v18, %v2016_v32 }
0x249d   :  { %v2023_v48 = vmul.f32 %v2021_v46, %v1970_v35 }
0x24fa   :  { %v2027_v33 = vpop.permute.xlu1 %2026 }
0x24fb   :  { %v2029_v47 = vmul.f32 %v2027_v33, %v2021_v46 }
0x24fd   :  { %2031 = vrot.lane.b32.xlu2 %v2029_v47, %s2541_s16 }
0x2557   :  { %v2032_v11 = vpop.permute.xlu2 %2031 }
0x2558   :  { %v2034_v49 = vadd.f32 %v2032_v11, %v2023_v48 }
0x255a   :  { %2453 = vtanh.f32 %v2034_v49 }
0x2560   :  { %v2454_v51 = vpop.eup %2453 }
0x2561   :  { %2037 = vrot.lane.b32.xlu0 %v2454_v51, %s2540_s4 }
0x25d3   :  { %v2038_v7 = vpop.permute.xlu0 %2037 }
0x25d4   :  { %v2040_v41 = vmul.f32 %v2038_v7, %v2021_v46 }
0x25d6   :  { %2050 = vrot.lane.b32.xlu1 %v2040_v41, %s2541_s16 }
0x2648   :  { %v2051_v60 = vpop.permute.xlu1 %2050 }
0x2649   :  { %2233 = vmatmul.msk.f32.vlgmr.msra.gmra.mxu2 %vm239_vm9, %v2051_v60 }
0x26cc   :  { %v2071_v0 = vpop.f32.mrf.mxu2 }
0x26cd   :  { %v2072_v1 = vadd.f32 %v2260_v63, %v2071_v0 }
0x26cf   :  { %v2074_v2 = vmax.f32 %v2072_v1, 0.0 }
0x26d1   :  { %2234 = vmatmul.msk.f32.vlgmr.msra.gmra.mxu3 %vm239_vm9, %v2074_v2 }
0x2754   :  { %v2103_v50 = vpop.f32.mrf.mxu3 }
0x2755   :  { %v2104_v31 = vadd.f32 %v2261_v9, %v2103_v50 }
0x2757   :  { %v2106_v6 = vmax.f32 %v2104_v31, 0.0 }
0x2759   :  { %2236 = vmatmul.msk.f32.vlgmr.msrb.gmra.mxu0 %vm2112_vm10, %v2106_v6 }
0x27d6   :  { %v2137_v10 = vpop.f32.mrf.mxu0 }
0x27d7   :  { %v2138_v12 = vadd.f32 %v2262_v8, %v2137_v10 }
0x27d9   :  { %2141 = vst.msk [vmem:[%s3309_s14] sm:$0xff] %vm2140_vm11, %v2138_v12 }
0x27da   :  { %2146 = vsyncpa [#allocation6], 1 }
0x27db   :  { %2147 = vsyncpa [#allocation8], 1 }

</bundles_post_ra>
